<compile_context>
chip_gen: v5e
topology: v5e:2x2
jax: 0.10.0
libtpu: 0.0.40
codegen_flags: <defaults>
</compile_context>

<pallas_src>
import functools

import jax
import jax.numpy as jnp
from jax import lax
from jax.experimental import pallas as pl
from jax.experimental.pallas import tpu as pltpu


# ----------------------------- in-kernel LSTM layer -----------------------------
def _lstm_layer(src, wih_ref, whh_ref, b_ref, dst, xp_ref, *, seq_len, apply_tanh):
    """One LSTM layer over the whole sequence (PyTorch gate order i,f,g,o).

    src:  (T, In) ref (input or previous layer's VMEM activation)
    wih_ref: (In, 4H), whh_ref: (H, 4H), b_ref: (1, 4H) == b_ih + b_hh
    dst:  (T, H) ref (VMEM scratch or the kernel output)
    xp_ref: (T, 4H) VMEM scratch for the hoisted input projection
    """
    H = whh_ref.shape[0]
    G = 4 * H

    # Hoisted input projection + bias: one (T,In)x(In,4H) MXU matmul instead of
    # T matmuls with M=1 inside the recurrence.
    xp_ref[...] = (jnp.dot(src[...], wih_ref[...],
                           preferred_element_type=jnp.float32) + b_ref[...])

    whh = whh_ref[...]                                       # (H, 4H), stays in vregs

    # Lane mask selecting the "g" gate (tanh) lanes; hoisted out of the loop.
    lane = lax.broadcasted_iota(jnp.int32, (1, G), 1)
    g_lane = (lane >= 2 * H) & (lane < 3 * H)

    def step(t, carry):
        h, c = carry                                         # (1, H), (1, H)
        gates = xp_ref[pl.ds(t, 1), :] + jnp.dot(
            h, whh, preferred_element_type=jnp.float32)      # (1, 4H)
        # Full-vreg EUP calls + VPU select instead of 4 sliced EUP calls.
        act = jnp.where(g_lane, jnp.tanh(gates), jax.nn.sigmoid(gates))
        i = act[:, 0 * H:1 * H]
        f = act[:, 1 * H:2 * H]
        g = act[:, 2 * H:3 * H]
        o = act[:, 3 * H:4 * H]
        c_new = f * c + i * g
        h_new = o * jnp.tanh(c_new)
        dst[pl.ds(t, 1), :] = jnp.tanh(h_new) if apply_tanh else h_new
        return h_new, c_new

    h0 = jnp.zeros((1, H), jnp.float32)
    c0 = jnp.zeros((1, H), jnp.float32)
    # seq_len is static & tiny: fully unroll so the LLO scheduler sees the whole
    # recurrence (only true serial dep is through h/c).
    lax.fori_loop(0, seq_len, step, (h0, c0), unroll=True)


# ----------------------------- fused AE kernel -----------------------------
def _lstm_ae_kernel(*refs, seq_len, apply_tanh, n_layers):
    x_ref = refs[0]
    w_refs = refs[1:1 + 3 * n_layers]                # (wih_t, whh_t, b) per layer
    out_ref = refs[1 + 3 * n_layers]
    scratch = refs[2 + 3 * n_layers:]
    act_refs = scratch[:n_layers - 1]                # intermediate activations
    xproj_refs = scratch[n_layers - 1:]              # per-layer (T, 4H) projections

    src = x_ref
    for li in range(n_layers):
        wih_ref = w_refs[3 * li + 0]
        whh_ref = w_refs[3 * li + 1]
        b_ref = w_refs[3 * li + 2]
        dst = out_ref if li == n_layers - 1 else act_refs[li]
        _lstm_layer(src, wih_ref, whh_ref, b_ref, dst, xproj_refs[li],
                    seq_len=seq_len, apply_tanh=apply_tanh[li])
        src = dst
    # NOTE: the PyTorch Encoder does out_activ(x).squeeze() — a no-op at these
    # static dims (T>1, encoding_dim>1), so no rank change is materialized here.


def lstm_ae_forward(params, x, apply_tanh):
    """params: list of (wih_t (In,4H), whh_t (H,4H), b (1,4H)); x: (T, In)."""
    T = x.shape[0]
    n_layers = len(params)
    h_out = params[-1][1].shape[0]
    flat_w = [w for layer in params for w in layer]

    in_specs = [pl.BlockSpec(x.shape, lambda i: (0, 0))]
    in_specs += [pl.BlockSpec(w.shape, lambda i: (0, 0)) for w in flat_w]

    # Intermediate activations + per-layer hoisted projections stay in VMEM.
    act_shapes = [(T, params[li][1].shape[0]) for li in range(n_layers - 1)]
    xproj_shapes = [(T, 4 * params[li][1].shape[0]) for li in range(n_layers)]

    kernel = functools.partial(_lstm_ae_kernel, seq_len=T,
                               apply_tanh=apply_tanh, n_layers=n_layers)
    return pl.pallas_call(
        kernel,
        out_shape=jax.ShapeDtypeStruct((T, h_out), jnp.float32),
        grid=(1,),
        in_specs=in_specs,
        out_specs=pl.BlockSpec((T, h_out), lambda i: (0, 0)),
        scratch_shapes=[pltpu.VMEM(s, jnp.float32) for s in act_shapes]
                       + [pltpu.VMEM(s, jnp.float32) for s in xproj_shapes],
        compiler_params=pltpu.CompilerParams(
            dimension_semantics=("arbitrary",)),
    )(x, *flat_w)


# ----------------------------- parameters -----------------------------
def _init_lstm_layer(key, in_dim, hidden):
    """PyTorch-style uniform(-1/sqrt(H), 1/sqrt(H)); pre-transposed kernel layout."""
    k = 1.0 / (hidden ** 0.5)
    ks = jax.random.split(key, 4)
    w_ih = jax.random.uniform(ks[0], (4 * hidden, in_dim), jnp.float32, -k, k)
    w_hh = jax.random.uniform(ks[1], (4 * hidden, hidden), jnp.float32, -k, k)
    b_ih = jax.random.uniform(ks[2], (4 * hidden,), jnp.float32, -k, k)
    b_hh = jax.random.uniform(ks[3], (4 * hidden,), jnp.float32, -k, k)
    # Precompute W_ih.T, W_hh.T and b_ih + b_hh ONCE (not per forward call).
    return (jnp.transpose(w_ih), jnp.transpose(w_hh),
            (b_ih + b_hh).reshape(1, 4 * hidden))


def init_lstm_ae_params(key, input_dim, encoding_dim, h_dims):
    enc_dims = [input_dim] + h_dims + [encoding_dim]
    dec_h = h_dims[::-1]
    dec_dims = [encoding_dim] + dec_h + [dec_h[-1]]
    n_enc, n_dec = len(enc_dims) - 1, len(dec_dims) - 1
    keys = jax.random.split(key, n_enc + n_dec)

    params = []
    apply_tanh = []
    for i in range(n_enc):
        params.append(_init_lstm_layer(keys[i], enc_dims[i], enc_dims[i + 1]))
        # Encoder: h_activ=Tanh between layers, out_activ=Tanh on the last layer.
        apply_tanh.append(True)
    for i in range(n_dec):
        params.append(_init_lstm_layer(keys[n_enc + i], dec_dims[i], dec_dims[i + 1]))
        # Decoder: h_activ=Tanh only between layers; no activation on the last.
        apply_tanh.append(i < n_dec - 1)
    # TODO(synk): Decoder.output_layer (nn.Linear) is defined in __init__ but never
    # used in Decoder.forward, so it is intentionally not materialized here.
    return params, tuple(apply_tanh)


class Config:
    def __init__(self, len_seq):
        self.len_seq = len_seq  # passed to Decoder.forward in PyTorch but unused


# ----------------------------- pure-JAX reference -----------------------------
def _lstm_layer_ref(x, wih_t, whh_t, b):
    H = whh_t.shape[0]

    def step(carry, x_t):
        h, c = carry
        gates = x_t @ wih_t + h @ whh_t + b[0]
        i = jax.nn.sigmoid(gates[0 * H:1 * H])
        f = jax.nn.sigmoid(gates[1 * H:2 * H])
        g = jnp.tanh(gates[2 * H:3 * H])
        o = jax.nn.sigmoid(gates[3 * H:4 * H])
        c = f * c + i * g
        h = o * jnp.tanh(c)
        return (h, c), h

    (_, _), ys = lax.scan(step, (jnp.zeros(H), jnp.zeros(H)), x)
    return ys


def lstm_ae_ref(params, x, apply_tanh):
    h = x
    for (wih_t, whh_t, b), tflag in zip(params, apply_tanh):
        h = _lstm_layer_ref(h, wih_t, whh_t, b)
        if tflag:
            h = jnp.tanh(h)
    return h


# ----------------------------- main -----------------------------
if __name__ == "__main__":
    input_dim, encoding_dim, h_dims, seq_len = 16, 8, [32], 8
    _ = Config(len_seq=seq_len)  # mirrors the PyTorch module; unused by the math

    key = jax.random.PRNGKey(0)
    kx, kp = jax.random.split(key)
    x = jax.random.normal(kx, (seq_len, input_dim), dtype=jnp.float32)
    params, apply_tanh = init_lstm_ae_params(kp, input_dim, encoding_dim, h_dims)

    fwd = jax.jit(lstm_ae_forward, static_argnames=("apply_tanh",))
    out = jax.block_until_ready(fwd(params, x, apply_tanh=apply_tanh))
    ref = lstm_ae_ref(params, x, apply_tanh)

    assert out.shape == (seq_len, h_dims[::-1][-1]), out.shape
    assert jnp.allclose(out, ref, atol=1e-4, rtol=1e-4), \
        float(jnp.max(jnp.abs(out - ref)))
    print("KERNEL_OK")
</pallas_src>

<mosaic_0001>
module attributes {stable_mosaic.version = 11 : i64} {
  func.func @_lstm_ae_kernel(%arg0: i32, %arg1: memref<8x16xf32, #tpu.memory_space<vmem>>, %arg2: memref<16x128xf32, #tpu.memory_space<vmem>>, %arg3: memref<32x128xf32, #tpu.memory_space<vmem>>, %arg4: memref<1x128xf32, #tpu.memory_space<vmem>>, %arg5: memref<32x32xf32, #tpu.memory_space<vmem>>, %arg6: memref<8x32xf32, #tpu.memory_space<vmem>>, %arg7: memref<1x32xf32, #tpu.memory_space<vmem>>, %arg8: memref<8x128xf32, #tpu.memory_space<vmem>>, %arg9: memref<32x128xf32, #tpu.memory_space<vmem>>, %arg10: memref<1x128xf32, #tpu.memory_space<vmem>>, %arg11: memref<32x128xf32, #tpu.memory_space<vmem>>, %arg12: memref<32x128xf32, #tpu.memory_space<vmem>>, %arg13: memref<1x128xf32, #tpu.memory_space<vmem>>, %arg14: memref<8x32xf32, #tpu.memory_space<vmem>>, %arg15: memref<8x32xf32, #tpu.memory_space<vmem>>, %arg16: memref<8x8xf32, #tpu.memory_space<vmem>>, %arg17: memref<8x32xf32, #tpu.memory_space<vmem>>, %arg18: memref<8x128xf32, #tpu.memory_space<vmem>>, %arg19: memref<8x32xf32, #tpu.memory_space<vmem>>, %arg20: memref<8x128xf32, #tpu.memory_space<vmem>>, %arg21: memref<8x128xf32, #tpu.memory_space<vmem>>) attributes {dimension_semantics = [#tpu.dimension_semantics<arbitrary>], iteration_bounds = array<i64: 1>, scalar_prefetch = 0 : i64, scratch_operands = 7 : i64, tpu.core_type = #tpu.core_type<tc>, window_params = [{pipeline_mode = #tpu.pipeline_mode<synchronous>, transform_indices = @transform_0, window_bounds = array<i64: 8, 16>}, {pipeline_mode = #tpu.pipeline_mode<synchronous>, transform_indices = @transform_1, window_bounds = array<i64: 16, 128>}, {pipeline_mode = #tpu.pipeline_mode<synchronous>, transform_indices = @transform_2, window_bounds = array<i64: 32, 128>}, {pipeline_mode = #tpu.pipeline_mode<synchronous>, transform_indices = @transform_3, window_bounds = array<i64: 1, 128>}, {pipeline_mode = #tpu.pipeline_mode<synchronous>, transform_indices = @transform_4, window_bounds = array<i64: 32, 32>}, {pipeline_mode = #tpu.pipeline_mode<synchronous>, transform_indices = @transform_5, window_bounds = array<i64: 8, 32>}, {pipeline_mode = #tpu.pipeline_mode<synchronous>, transform_indices = @transform_6, window_bounds = array<i64: 1, 32>}, {pipeline_mode = #tpu.pipeline_mode<synchronous>, transform_indices = @transform_7, window_bounds = array<i64: 8, 128>}, {pipeline_mode = #tpu.pipeline_mode<synchronous>, transform_indices = @transform_8, window_bounds = array<i64: 32, 128>}, {pipeline_mode = #tpu.pipeline_mode<synchronous>, transform_indices = @transform_9, window_bounds = array<i64: 1, 128>}, {pipeline_mode = #tpu.pipeline_mode<synchronous>, transform_indices = @transform_10, window_bounds = array<i64: 32, 128>}, {pipeline_mode = #tpu.pipeline_mode<synchronous>, transform_indices = @transform_11, window_bounds = array<i64: 32, 128>}, {pipeline_mode = #tpu.pipeline_mode<synchronous>, transform_indices = @transform_12, window_bounds = array<i64: 1, 128>}, {pipeline_mode = #tpu.pipeline_mode<synchronous>, transform_indices = @transform_13, window_bounds = array<i64: 8, 32>}]} {
    %c0 = arith.constant 0 : index
    %c0_0 = arith.constant 0 : index
    %0 = vector.load %arg1[%c0, %c0_0] : memref<8x16xf32, #tpu.memory_space<vmem>>, vector<8x16xf32>
    %c0_1 = arith.constant 0 : index
    %c0_2 = arith.constant 0 : index
    %1 = vector.load %arg2[%c0_1, %c0_2] : memref<16x128xf32, #tpu.memory_space<vmem>>, vector<16x128xf32>
    %cst = arith.constant dense<0.000000e+00> : vector<8x128xf32>
    %2 = tpu.matmul %0, %1, %cst {dimension_numbers = #tpu.dot_dimension_numbers<[1], [0], [0], [1], [0, 0, 1, 1], [], []>} : vector<8x16xf32>, vector<16x128xf32>, vector<8x128xf32> -> vector<8x128xf32>
    %c0_3 = arith.constant 0 : index
    %c0_4 = arith.constant 0 : index
    %3 = vector.load %arg4[%c0_3, %c0_4] : memref<1x128xf32, #tpu.memory_space<vmem>>, vector<1x128xf32>
    %4 = vector.broadcast %3 : vector<1x128xf32> to vector<8x128xf32>
    %5 = arith.addf %2, %4 : vector<8x128xf32>
    %c0_5 = arith.constant 0 : index
    %c0_6 = arith.constant 0 : index
    %6 = vector.load %arg18[%c0_5, %c0_6] : memref<8x128xf32, #tpu.memory_space<vmem>>, vector<8x128xf32>
    tpu.vector_store %arg18[%c0_5, %c0_6], %5 {strides = array<i32>} : memref<8x128xf32, #tpu.memory_space<vmem>>, vector<8x128xf32>,
    %c0_7 = arith.constant 0 : index
    %c0_8 = arith.constant 0 : index
    %7 = vector.load %arg3[%c0_7, %c0_8] : memref<32x128xf32, #tpu.memory_space<vmem>>, vector<32x128xf32>
    %8 = tpu.iota {dimensions = array<i32: 1>} : vector<1x128xi32>
    %c64_i32 = arith.constant 64 : i32
    %9 = vector.broadcast %c64_i32 : i32 to vector<1x128xi32>
    %10 = arith.cmpi sge, %8, %9 : vector<1x128xi32>
    %c96_i32 = arith.constant 96 : i32
    %11 = vector.broadcast %c96_i32 : i32 to vector<1x128xi32>
    %12 = arith.cmpi slt, %8, %11 : vector<1x128xi32>
    %13 = arith.andi %10, %12 : vector<1x128xi1>
    %cst_9 = arith.constant 0.000000e+00 : f32
    %14 = vector.broadcast %cst_9 : f32 to vector<1x32xf32>
    %cst_10 = arith.constant 0.000000e+00 : f32
    %15 = vector.broadcast %cst_10 : f32 to vector<1x32xf32>
    %c0_i32 = arith.constant 0 : i32
    %16 = arith.index_cast %c0_i32 : i32 to index
    %c0_11 = arith.constant 0 : index
    %17 = vector.load %arg18[%16, %c0_11] : memref<8x128xf32, #tpu.memory_space<vmem>>, vector<1x128xf32>
    %cst_12 = arith.constant dense<0.000000e+00> : vector<1x128xf32>
    %18 = tpu.matmul %14, %7, %cst_12 {dimension_numbers = #tpu.dot_dimension_numbers<[1], [0], [0], [1], [0, 0, 1, 1], [], []>} : vector<1x32xf32>, vector<32x128xf32>, vector<1x128xf32> -> vector<1x128xf32>
    %19 = arith.addf %17, %18 : vector<1x128xf32>
    %20 = math.tanh %19 : vector<1x128xf32>
    %21 = arith.negf %19 : vector<1x128xf32>
    %22 = math.exp %21 : vector<1x128xf32>
    %cst_13 = arith.constant 1.000000e+00 : f32
    %23 = vector.broadcast %cst_13 : f32 to vector<1x128xf32>
    %24 = arith.addf %23, %22 : vector<1x128xf32>
    %25 = arith.divf %23, %24 : vector<1x128xf32>
    %26 = arith.select %13, %20, %25 : vector<1x128xi1>, vector<1x128xf32>
    %27 = vector.extract_strided_slice %26 {offsets = [0, 0], sizes = [1, 32], strides = [1, 1]} : vector<1x128xf32> to vector<1x32xf32>
    %28 = vector.extract_strided_slice %26 {offsets = [0, 32], sizes = [1, 32], strides = [1, 1]} : vector<1x128xf32> to vector<1x32xf32>
    %29 = vector.extract_strided_slice %26 {offsets = [0, 64], sizes = [1, 32], strides = [1, 1]} : vector<1x128xf32> to vector<1x32xf32>
    %30 = vector.extract_strided_slice %26 {offsets = [0, 96], sizes = [1, 32], strides = [1, 1]} : vector<1x128xf32> to vector<1x32xf32>
    %31 = arith.mulf %28, %15 : vector<1x32xf32>
    %32 = arith.mulf %27, %29 : vector<1x32xf32>
    %33 = arith.addf %31, %32 : vector<1x32xf32>
    %34 = math.tanh %33 : vector<1x32xf32>
    %35 = arith.mulf %30, %34 : vector<1x32xf32>
    %36 = math.tanh %35 : vector<1x32xf32>
    %37 = arith.index_cast %c0_i32 : i32 to index
    %c0_14 = arith.constant 0 : index
    %38 = vector.load %arg15[%37, %c0_14] : memref<8x32xf32, #tpu.memory_space<vmem>>, vector<1x32xf32>
    tpu.vector_store %arg15[%37, %c0_14], %36 {strides = array<i32>} : memref<8x32xf32, #tpu.memory_space<vmem>>, vector<1x32xf32>,
    %c1_i32 = arith.constant 1 : i32
    %39 = arith.index_cast %c1_i32 : i32 to index
    %c0_15 = arith.constant 0 : index
    %40 = vector.load %arg18[%39, %c0_15] : memref<8x128xf32, #tpu.memory_space<vmem>>, vector<1x128xf32>
    %cst_16 = arith.constant dense<0.000000e+00> : vector<1x128xf32>
    %41 = tpu.matmul %35, %7, %cst_16 {dimension_numbers = #tpu.dot_dimension_numbers<[1], [0], [0], [1], [0, 0, 1, 1], [], []>} : vector<1x32xf32>, vector<32x128xf32>, vector<1x128xf32> -> vector<1x128xf32>
    %42 = arith.addf %40, %41 : vector<1x128xf32>
    %43 = math.tanh %42 : vector<1x128xf32>
    %44 = arith.negf %42 : vector<1x128xf32>
    %45 = math.exp %44 : vector<1x128xf32>
    %cst_17 = arith.constant 1.000000e+00 : f32
    %46 = vector.broadcast %cst_17 : f32 to vector<1x128xf32>
    %47 = arith.addf %46, %45 : vector<1x128xf32>
    %48 = arith.divf %46, %47 : vector<1x128xf32>
    %49 = arith.select %13, %43, %48 : vector<1x128xi1>, vector<1x128xf32>
    %50 = vector.extract_strided_slice %49 {offsets = [0, 0], sizes = [1, 32], strides = [1, 1]} : vector<1x128xf32> to vector<1x32xf32>
    %51 = vector.extract_strided_slice %49 {offsets = [0, 32], sizes = [1, 32], strides = [1, 1]} : vector<1x128xf32> to vector<1x32xf32>
    %52 = vector.extract_strided_slice %49 {offsets = [0, 64], sizes = [1, 32], strides = [1, 1]} : vector<1x128xf32> to vector<1x32xf32>
    %53 = vector.extract_strided_slice %49 {offsets = [0, 96], sizes = [1, 32], strides = [1, 1]} : vector<1x128xf32> to vector<1x32xf32>
    %54 = arith.mulf %51, %33 : vector<1x32xf32>
    %55 = arith.mulf %50, %52 : vector<1x32xf32>
    %56 = arith.addf %54, %55 : vector<1x32xf32>
    %57 = math.tanh %56 : vector<1x32xf32>
    %58 = arith.mulf %53, %57 : vector<1x32xf32>
    %59 = math.tanh %58 : vector<1x32xf32>
    %60 = arith.index_cast %c1_i32 : i32 to index
    %c0_18 = arith.constant 0 : index
    %61 = vector.load %arg15[%60, %c0_18] : memref<8x32xf32, #tpu.memory_space<vmem>>, vector<1x32xf32>
    tpu.vector_store %arg15[%60, %c0_18], %59 {strides = array<i32>} : memref<8x32xf32, #tpu.memory_space<vmem>>, vector<1x32xf32>,
    %c2_i32 = arith.constant 2 : i32
    %62 = arith.index_cast %c2_i32 : i32 to index
    %c0_19 = arith.constant 0 : index
    %63 = vector.load %arg18[%62, %c0_19] : memref<8x128xf32, #tpu.memory_space<vmem>>, vector<1x128xf32>
    %cst_20 = arith.constant dense<0.000000e+00> : vector<1x128xf32>
    %64 = tpu.matmul %58, %7, %cst_20 {dimension_numbers = #tpu.dot_dimension_numbers<[1], [0], [0], [1], [0, 0, 1, 1], [], []>} : vector<1x32xf32>, vector<32x128xf32>, vector<1x128xf32> -> vector<1x128xf32>
    %65 = arith.addf %63, %64 : vector<1x128xf32>
    %66 = math.tanh %65 : vector<1x128xf32>
    %67 = arith.negf %65 : vector<1x128xf32>
    %68 = math.exp %67 : vector<1x128xf32>
    %cst_21 = arith.constant 1.000000e+00 : f32
    %69 = vector.broadcast %cst_21 : f32 to vector<1x128xf32>
    %70 = arith.addf %69, %68 : vector<1x128xf32>
    %71 = arith.divf %69, %70 : vector<1x128xf32>
    %72 = arith.select %13, %66, %71 : vector<1x128xi1>, vector<1x128xf32>
    %73 = vector.extract_strided_slice %72 {offsets = [0, 0], sizes = [1, 32], strides = [1, 1]} : vector<1x128xf32> to vector<1x32xf32>
    %74 = vector.extract_strided_slice %72 {offsets = [0, 32], sizes = [1, 32], strides = [1, 1]} : vector<1x128xf32> to vector<1x32xf32>
    %75 = vector.extract_strided_slice %72 {offsets = [0, 64], sizes = [1, 32], strides = [1, 1]} : vector<1x128xf32> to vector<1x32xf32>
    %76 = vector.extract_strided_slice %72 {offsets = [0, 96], sizes = [1, 32], strides = [1, 1]} : vector<1x128xf32> to vector<1x32xf32>
    %77 = arith.mulf %74, %56 : vector<1x32xf32>
    %78 = arith.mulf %73, %75 : vector<1x32xf32>
    %79 = arith.addf %77, %78 : vector<1x32xf32>
    %80 = math.tanh %79 : vector<1x32xf32>
    %81 = arith.mulf %76, %80 : vector<1x32xf32>
    %82 = math.tanh %81 : vector<1x32xf32>
    %83 = arith.index_cast %c2_i32 : i32 to index
    %c0_22 = arith.constant 0 : index
    %84 = vector.load %arg15[%83, %c0_22] : memref<8x32xf32, #tpu.memory_space<vmem>>, vector<1x32xf32>
    tpu.vector_store %arg15[%83, %c0_22], %82 {strides = array<i32>} : memref<8x32xf32, #tpu.memory_space<vmem>>, vector<1x32xf32>,
    %c3_i32 = arith.constant 3 : i32
    %85 = arith.index_cast %c3_i32 : i32 to index
    %c0_23 = arith.constant 0 : index
    %86 = vector.load %arg18[%85, %c0_23] : memref<8x128xf32, #tpu.memory_space<vmem>>, vector<1x128xf32>
    %cst_24 = arith.constant dense<0.000000e+00> : vector<1x128xf32>
    %87 = tpu.matmul %81, %7, %cst_24 {dimension_numbers = #tpu.dot_dimension_numbers<[1], [0], [0], [1], [0, 0, 1, 1], [], []>} : vector<1x32xf32>, vector<32x128xf32>, vector<1x128xf32> -> vector<1x128xf32>
    %88 = arith.addf %86, %87 : vector<1x128xf32>
    %89 = math.tanh %88 : vector<1x128xf32>
    %90 = arith.negf %88 : vector<1x128xf32>
    %91 = math.exp %90 : vector<1x128xf32>
    %cst_25 = arith.constant 1.000000e+00 : f32
    %92 = vector.broadcast %cst_25 : f32 to vector<1x128xf32>
    %93 = arith.addf %92, %91 : vector<1x128xf32>
    %94 = arith.divf %92, %93 : vector<1x128xf32>
    %95 = arith.select %13, %89, %94 : vector<1x128xi1>, vector<1x128xf32>
    %96 = vector.extract_strided_slice %95 {offsets = [0, 0], sizes = [1, 32], strides = [1, 1]} : vector<1x128xf32> to vector<1x32xf32>
    %97 = vector.extract_strided_slice %95 {offsets = [0, 32], sizes = [1, 32], strides = [1, 1]} : vector<1x128xf32> to vector<1x32xf32>
    %98 = vector.extract_strided_slice %95 {offsets = [0, 64], sizes = [1, 32], strides = [1, 1]} : vector<1x128xf32> to vector<1x32xf32>
    %99 = vector.extract_strided_slice %95 {offsets = [0, 96], sizes = [1, 32], strides = [1, 1]} : vector<1x128xf32> to vector<1x32xf32>
    %100 = arith.mulf %97, %79 : vector<1x32xf32>
    %101 = arith.mulf %96, %98 : vector<1x32xf32>
    %102 = arith.addf %100, %101 : vector<1x32xf32>
    %103 = math.tanh %102 : vector<1x32xf32>
    %104 = arith.mulf %99, %103 : vector<1x32xf32>
    %105 = math.tanh %104 : vector<1x32xf32>
    %106 = arith.index_cast %c3_i32 : i32 to index
    %c0_26 = arith.constant 0 : index
    %107 = vector.load %arg15[%106, %c0_26] : memref<8x32xf32, #tpu.memory_space<vmem>>, vector<1x32xf32>
    tpu.vector_store %arg15[%106, %c0_26], %105 {strides = array<i32>} : memref<8x32xf32, #tpu.memory_space<vmem>>, vector<1x32xf32>,
    %c4_i32 = arith.constant 4 : i32
    %108 = arith.index_cast %c4_i32 : i32 to index
    %c0_27 = arith.constant 0 : index
    %109 = vector.load %arg18[%108, %c0_27] : memref<8x128xf32, #tpu.memory_space<vmem>>, vector<1x128xf32>
    %cst_28 = arith.constant dense<0.000000e+00> : vector<1x128xf32>
    %110 = tpu.matmul %104, %7, %cst_28 {dimension_numbers = #tpu.dot_dimension_numbers<[1], [0], [0], [1], [0, 0, 1, 1], [], []>} : vector<1x32xf32>, vector<32x128xf32>, vector<1x128xf32> -> vector<1x128xf32>
    %111 = arith.addf %109, %110 : vector<1x128xf32>
    %112 = math.tanh %111 : vector<1x128xf32>
    %113 = arith.negf %111 : vector<1x128xf32>
    %114 = math.exp %113 : vector<1x128xf32>
    %cst_29 = arith.constant 1.000000e+00 : f32
    %115 = vector.broadcast %cst_29 : f32 to vector<1x128xf32>
    %116 = arith.addf %115, %114 : vector<1x128xf32>
    %117 = arith.divf %115, %116 : vector<1x128xf32>
    %118 = arith.select %13, %112, %117 : vector<1x128xi1>, vector<1x128xf32>
    %119 = vector.extract_strided_slice %118 {offsets = [0, 0], sizes = [1, 32], strides = [1, 1]} : vector<1x128xf32> to vector<1x32xf32>
    %120 = vector.extract_strided_slice %118 {offsets = [0, 32], sizes = [1, 32], strides = [1, 1]} : vector<1x128xf32> to vector<1x32xf32>
    %121 = vector.extract_strided_slice %118 {offsets = [0, 64], sizes = [1, 32], strides = [1, 1]} : vector<1x128xf32> to vector<1x32xf32>
    %122 = vector.extract_strided_slice %118 {offsets = [0, 96], sizes = [1, 32], strides = [1, 1]} : vector<1x128xf32> to vector<1x32xf32>
    %123 = arith.mulf %120, %102 : vector<1x32xf32>
    %124 = arith.mulf %119, %121 : vector<1x32xf32>
    %125 = arith.addf %123, %124 : vector<1x32xf32>
    %126 = math.tanh %125 : vector<1x32xf32>
    %127 = arith.mulf %122, %126 : vector<1x32xf32>
    %128 = math.tanh %127 : vector<1x32xf32>
    %129 = arith.index_cast %c4_i32 : i32 to index
    %c0_30 = arith.constant 0 : index
    %130 = vector.load %arg15[%129, %c0_30] : memref<8x32xf32, #tpu.memory_space<vmem>>, vector<1x32xf32>
    tpu.vector_store %arg15[%129, %c0_30], %128 {strides = array<i32>} : memref<8x32xf32, #tpu.memory_space<vmem>>, vector<1x32xf32>,
    %c5_i32 = arith.constant 5 : i32
    %131 = arith.index_cast %c5_i32 : i32 to index
    %c0_31 = arith.constant 0 : index
    %132 = vector.load %arg18[%131, %c0_31] : memref<8x128xf32, #tpu.memory_space<vmem>>, vector<1x128xf32>
    %cst_32 = arith.constant dense<0.000000e+00> : vector<1x128xf32>
    %133 = tpu.matmul %127, %7, %cst_32 {dimension_numbers = #tpu.dot_dimension_numbers<[1], [0], [0], [1], [0, 0, 1, 1], [], []>} : vector<1x32xf32>, vector<32x128xf32>, vector<1x128xf32> -> vector<1x128xf32>
    %134 = arith.addf %132, %133 : vector<1x128xf32>
    %135 = math.tanh %134 : vector<1x128xf32>
    %136 = arith.negf %134 : vector<1x128xf32>
    %137 = math.exp %136 : vector<1x128xf32>
    %cst_33 = arith.constant 1.000000e+00 : f32
    %138 = vector.broadcast %cst_33 : f32 to vector<1x128xf32>
    %139 = arith.addf %138, %137 : vector<1x128xf32>
    %140 = arith.divf %138, %139 : vector<1x128xf32>
    %141 = arith.select %13, %135, %140 : vector<1x128xi1>, vector<1x128xf32>
    %142 = vector.extract_strided_slice %141 {offsets = [0, 0], sizes = [1, 32], strides = [1, 1]} : vector<1x128xf32> to vector<1x32xf32>
    %143 = vector.extract_strided_slice %141 {offsets = [0, 32], sizes = [1, 32], strides = [1, 1]} : vector<1x128xf32> to vector<1x32xf32>
    %144 = vector.extract_strided_slice %141 {offsets = [0, 64], sizes = [1, 32], strides = [1, 1]} : vector<1x128xf32> to vector<1x32xf32>
    %145 = vector.extract_strided_slice %141 {offsets = [0, 96], sizes = [1, 32], strides = [1, 1]} : vector<1x128xf32> to vector<1x32xf32>
    %146 = arith.mulf %143, %125 : vector<1x32xf32>
    %147 = arith.mulf %142, %144 : vector<1x32xf32>
    %148 = arith.addf %146, %147 : vector<1x32xf32>
    %149 = math.tanh %148 : vector<1x32xf32>
    %150 = arith.mulf %145, %149 : vector<1x32xf32>
    %151 = math.tanh %150 : vector<1x32xf32>
    %152 = arith.index_cast %c5_i32 : i32 to index
    %c0_34 = arith.constant 0 : index
    %153 = vector.load %arg15[%152, %c0_34] : memref<8x32xf32, #tpu.memory_space<vmem>>, vector<1x32xf32>
    tpu.vector_store %arg15[%152, %c0_34], %151 {strides = array<i32>} : memref<8x32xf32, #tpu.memory_space<vmem>>, vector<1x32xf32>,
    %c6_i32 = arith.constant 6 : i32
    %154 = arith.index_cast %c6_i32 : i32 to index
    %c0_35 = arith.constant 0 : index
    %155 = vector.load %arg18[%154, %c0_35] : memref<8x128xf32, #tpu.memory_space<vmem>>, vector<1x128xf32>
    %cst_36 = arith.constant dense<0.000000e+00> : vector<1x128xf32>
    %156 = tpu.matmul %150, %7, %cst_36 {dimension_numbers = #tpu.dot_dimension_numbers<[1], [0], [0], [1], [0, 0, 1, 1], [], []>} : vector<1x32xf32>, vector<32x128xf32>, vector<1x128xf32> -> vector<1x128xf32>
    %157 = arith.addf %155, %156 : vector<1x128xf32>
    %158 = math.tanh %157 : vector<1x128xf32>
    %159 = arith.negf %157 : vector<1x128xf32>
    %160 = math.exp %159 : vector<1x128xf32>
    %cst_37 = arith.constant 1.000000e+00 : f32
    %161 = vector.broadcast %cst_37 : f32 to vector<1x128xf32>
    %162 = arith.addf %161, %160 : vector<1x128xf32>
    %163 = arith.divf %161, %162 : vector<1x128xf32>
    %164 = arith.select %13, %158, %163 : vector<1x128xi1>, vector<1x128xf32>
    %165 = vector.extract_strided_slice %164 {offsets = [0, 0], sizes = [1, 32], strides = [1, 1]} : vector<1x128xf32> to vector<1x32xf32>
    %166 = vector.extract_strided_slice %164 {offsets = [0, 32], sizes = [1, 32], strides = [1, 1]} : vector<1x128xf32> to vector<1x32xf32>
    %167 = vector.extract_strided_slice %164 {offsets = [0, 64], sizes = [1, 32], strides = [1, 1]} : vector<1x128xf32> to vector<1x32xf32>
    %168 = vector.extract_strided_slice %164 {offsets = [0, 96], sizes = [1, 32], strides = [1, 1]} : vector<1x128xf32> to vector<1x32xf32>
    %169 = arith.mulf %166, %148 : vector<1x32xf32>
    %170 = arith.mulf %165, %167 : vector<1x32xf32>
    %171 = arith.addf %169, %170 : vector<1x32xf32>
    %172 = math.tanh %171 : vector<1x32xf32>
    %173 = arith.mulf %168, %172 : vector<1x32xf32>
    %174 = math.tanh %173 : vector<1x32xf32>
    %175 = arith.index_cast %c6_i32 : i32 to index
    %c0_38 = arith.constant 0 : index
    %176 = vector.load %arg15[%175, %c0_38] : memref<8x32xf32, #tpu.memory_space<vmem>>, vector<1x32xf32>
    tpu.vector_store %arg15[%175, %c0_38], %174 {strides = array<i32>} : memref<8x32xf32, #tpu.memory_space<vmem>>, vector<1x32xf32>,
    %c7_i32 = arith.constant 7 : i32
    %177 = arith.index_cast %c7_i32 : i32 to index
    %c0_39 = arith.constant 0 : index
    %178 = vector.load %arg18[%177, %c0_39] : memref<8x128xf32, #tpu.memory_space<vmem>>, vector<1x128xf32>
    %cst_40 = arith.constant dense<0.000000e+00> : vector<1x128xf32>
    %179 = tpu.matmul %173, %7, %cst_40 {dimension_numbers = #tpu.dot_dimension_numbers<[1], [0], [0], [1], [0, 0, 1, 1], [], []>} : vector<1x32xf32>, vector<32x128xf32>, vector<1x128xf32> -> vector<1x128xf32>
    %180 = arith.addf %178, %179 : vector<1x128xf32>
    %181 = math.tanh %180 : vector<1x128xf32>
    %182 = arith.negf %180 : vector<1x128xf32>
    %183 = math.exp %182 : vector<1x128xf32>
    %cst_41 = arith.constant 1.000000e+00 : f32
    %184 = vector.broadcast %cst_41 : f32 to vector<1x128xf32>
    %185 = arith.addf %184, %183 : vector<1x128xf32>
    %186 = arith.divf %184, %185 : vector<1x128xf32>
    %187 = arith.select %13, %181, %186 : vector<1x128xi1>, vector<1x128xf32>
    %188 = vector.extract_strided_slice %187 {offsets = [0, 0], sizes = [1, 32], strides = [1, 1]} : vector<1x128xf32> to vector<1x32xf32>
    %189 = vector.extract_strided_slice %187 {offsets = [0, 32], sizes = [1, 32], strides = [1, 1]} : vector<1x128xf32> to vector<1x32xf32>
    %190 = vector.extract_strided_slice %187 {offsets = [0, 64], sizes = [1, 32], strides = [1, 1]} : vector<1x128xf32> to vector<1x32xf32>
    %191 = vector.extract_strided_slice %187 {offsets = [0, 96], sizes = [1, 32], strides = [1, 1]} : vector<1x128xf32> to vector<1x32xf32>
    %192 = arith.mulf %189, %171 : vector<1x32xf32>
    %193 = arith.mulf %188, %190 : vector<1x32xf32>
    %194 = arith.addf %192, %193 : vector<1x32xf32>
    %195 = math.tanh %194 : vector<1x32xf32>
    %196 = arith.mulf %191, %195 : vector<1x32xf32>
    %197 = math.tanh %196 : vector<1x32xf32>
    %198 = arith.index_cast %c7_i32 : i32 to index
    %c0_42 = arith.constant 0 : index
    %199 = vector.load %arg15[%198, %c0_42] : memref<8x32xf32, #tpu.memory_space<vmem>>, vector<1x32xf32>
    tpu.vector_store %arg15[%198, %c0_42], %197 {strides = array<i32>} : memref<8x32xf32, #tpu.memory_space<vmem>>, vector<1x32xf32>,
    %c8_i32 = arith.constant 8 : i32
    %c0_43 = arith.constant 0 : index
    %c0_44 = arith.constant 0 : index
    %200 = vector.load %arg15[%c0_43, %c0_44] : memref<8x32xf32, #tpu.memory_space<vmem>>, vector<8x32xf32>
    %c0_45 = arith.constant 0 : index
    %c0_46 = arith.constant 0 : index
    %201 = vector.load %arg5[%c0_45, %c0_46] : memref<32x32xf32, #tpu.memory_space<vmem>>, vector<32x32xf32>
    %cst_47 = arith.constant dense<0.000000e+00> : vector<8x32xf32>
    %202 = tpu.matmul %200, %201, %cst_47 {dimension_numbers = #tpu.dot_dimension_numbers<[1], [0], [0], [1], [0, 0, 1, 1], [], []>} : vector<8x32xf32>, vector<32x32xf32>, vector<8x32xf32> -> vector<8x32xf32>
    %c0_48 = arith.constant 0 : index
    %c0_49 = arith.constant 0 : index
    %203 = vector.load %arg7[%c0_48, %c0_49] : memref<1x32xf32, #tpu.memory_space<vmem>>, vector<1x32xf32>
    %204 = vector.broadcast %203 : vector<1x32xf32> to vector<8x32xf32>
    %205 = arith.addf %202, %204 : vector<8x32xf32>
    %c0_50 = arith.constant 0 : index
    %c0_51 = arith.constant 0 : index
    %206 = vector.load %arg19[%c0_50, %c0_51] : memref<8x32xf32, #tpu.memory_space<vmem>>, vector<8x32xf32>
    tpu.vector_store %arg19[%c0_50, %c0_51], %205 {strides = array<i32>} : memref<8x32xf32, #tpu.memory_space<vmem>>, vector<8x32xf32>,
    %c0_52 = arith.constant 0 : index
    %c0_53 = arith.constant 0 : index
    %207 = vector.load %arg6[%c0_52, %c0_53] : memref<8x32xf32, #tpu.memory_space<vmem>>, vector<8x32xf32>
    %208 = tpu.iota {dimensions = array<i32: 1>} : vector<1x32xi32>
    %c16_i32 = arith.constant 16 : i32
    %209 = vector.broadcast %c16_i32 : i32 to vector<1x32xi32>
    %210 = arith.cmpi sge, %208, %209 : vector<1x32xi32>
    %c24_i32 = arith.constant 24 : i32
    %211 = vector.broadcast %c24_i32 : i32 to vector<1x32xi32>
    %212 = arith.cmpi slt, %208, %211 : vector<1x32xi32>
    %213 = arith.andi %210, %212 : vector<1x32xi1>
    %cst_54 = arith.constant 0.000000e+00 : f32
    %214 = vector.broadcast %cst_54 : f32 to vector<1x8xf32>
    %cst_55 = arith.constant 0.000000e+00 : f32
    %215 = vector.broadcast %cst_55 : f32 to vector<1x8xf32>
    %c0_i32_56 = arith.constant 0 : i32
    %216 = arith.index_cast %c0_i32_56 : i32 to index
    %c0_57 = arith.constant 0 : index
    %217 = vector.load %arg19[%216, %c0_57] : memref<8x32xf32, #tpu.memory_space<vmem>>, vector<1x32xf32>
    %cst_58 = arith.constant dense<0.000000e+00> : vector<1x32xf32>
    %218 = tpu.matmul %214, %207, %cst_58 {dimension_numbers = #tpu.dot_dimension_numbers<[1], [0], [0], [1], [0, 0, 1, 1], [], []>} : vector<1x8xf32>, vector<8x32xf32>, vector<1x32xf32> -> vector<1x32xf32>
    %219 = arith.addf %217, %218 : vector<1x32xf32>
    %220 = math.tanh %219 : vector<1x32xf32>
    %221 = arith.negf %219 : vector<1x32xf32>
    %222 = math.exp %221 : vector<1x32xf32>
    %cst_59 = arith.constant 1.000000e+00 : f32
    %223 = vector.broadcast %cst_59 : f32 to vector<1x32xf32>
    %224 = arith.addf %223, %222 : vector<1x32xf32>
    %225 = arith.divf %223, %224 : vector<1x32xf32>
    %226 = arith.select %213, %220, %225 : vector<1x32xi1>, vector<1x32xf32>
    %227 = vector.extract_strided_slice %226 {offsets = [0, 0], sizes = [1, 8], strides = [1, 1]} : vector<1x32xf32> to vector<1x8xf32>
    %228 = vector.extract_strided_slice %226 {offsets = [0, 8], sizes = [1, 8], strides = [1, 1]} : vector<1x32xf32> to vector<1x8xf32>
    %229 = vector.extract_strided_slice %226 {offsets = [0, 16], sizes = [1, 8], strides = [1, 1]} : vector<1x32xf32> to vector<1x8xf32>
    %230 = vector.extract_strided_slice %226 {offsets = [0, 24], sizes = [1, 8], strides = [1, 1]} : vector<1x32xf32> to vector<1x8xf32>
    %231 = arith.mulf %228, %215 : vector<1x8xf32>
    %232 = arith.mulf %227, %229 : vector<1x8xf32>
    %233 = arith.addf %231, %232 : vector<1x8xf32>
    %234 = math.tanh %233 : vector<1x8xf32>
    %235 = arith.mulf %230, %234 : vector<1x8xf32>
    %236 = math.tanh %235 : vector<1x8xf32>
    %237 = arith.index_cast %c0_i32_56 : i32 to index
    %c0_60 = arith.constant 0 : index
    %238 = vector.load %arg16[%237, %c0_60] : memref<8x8xf32, #tpu.memory_space<vmem>>, vector<1x8xf32>
    tpu.vector_store %arg16[%237, %c0_60], %236 {strides = array<i32>} : memref<8x8xf32, #tpu.memory_space<vmem>>, vector<1x8xf32>,
    %c1_i32_61 = arith.constant 1 : i32
    %239 = arith.index_cast %c1_i32_61 : i32 to index
    %c0_62 = arith.constant 0 : index
    %240 = vector.load %arg19[%239, %c0_62] : memref<8x32xf32, #tpu.memory_space<vmem>>, vector<1x32xf32>
    %cst_63 = arith.constant dense<0.000000e+00> : vector<1x32xf32>
    %241 = tpu.matmul %235, %207, %cst_63 {dimension_numbers = #tpu.dot_dimension_numbers<[1], [0], [0], [1], [0, 0, 1, 1], [], []>} : vector<1x8xf32>, vector<8x32xf32>, vector<1x32xf32> -> vector<1x32xf32>
    %242 = arith.addf %240, %241 : vector<1x32xf32>
    %243 = math.tanh %242 : vector<1x32xf32>
    %244 = arith.negf %242 : vector<1x32xf32>
    %245 = math.exp %244 : vector<1x32xf32>
    %cst_64 = arith.constant 1.000000e+00 : f32
    %246 = vector.broadcast %cst_64 : f32 to vector<1x32xf32>
    %247 = arith.addf %246, %245 : vector<1x32xf32>
    %248 = arith.divf %246, %247 : vector<1x32xf32>
    %249 = arith.select %213, %243, %248 : vector<1x32xi1>, vector<1x32xf32>
    %250 = vector.extract_strided_slice %249 {offsets = [0, 0], sizes = [1, 8], strides = [1, 1]} : vector<1x32xf32> to vector<1x8xf32>
    %251 = vector.extract_strided_slice %249 {offsets = [0, 8], sizes = [1, 8], strides = [1, 1]} : vector<1x32xf32> to vector<1x8xf32>
    %252 = vector.extract_strided_slice %249 {offsets = [0, 16], sizes = [1, 8], strides = [1, 1]} : vector<1x32xf32> to vector<1x8xf32>
    %253 = vector.extract_strided_slice %249 {offsets = [0, 24], sizes = [1, 8], strides = [1, 1]} : vector<1x32xf32> to vector<1x8xf32>
    %254 = arith.mulf %251, %233 : vector<1x8xf32>
    %255 = arith.mulf %250, %252 : vector<1x8xf32>
    %256 = arith.addf %254, %255 : vector<1x8xf32>
    %257 = math.tanh %256 : vector<1x8xf32>
    %258 = arith.mulf %253, %257 : vector<1x8xf32>
    %259 = math.tanh %258 : vector<1x8xf32>
    %260 = arith.index_cast %c1_i32_61 : i32 to index
    %c0_65 = arith.constant 0 : index
    %261 = vector.load %arg16[%260, %c0_65] : memref<8x8xf32, #tpu.memory_space<vmem>>, vector<1x8xf32>
    tpu.vector_store %arg16[%260, %c0_65], %259 {strides = array<i32>} : memref<8x8xf32, #tpu.memory_space<vmem>>, vector<1x8xf32>,
    %c2_i32_66 = arith.constant 2 : i32
    %262 = arith.index_cast %c2_i32_66 : i32 to index
    %c0_67 = arith.constant 0 : index
    %263 = vector.load %arg19[%262, %c0_67] : memref<8x32xf32, #tpu.memory_space<vmem>>, vector<1x32xf32>
    %cst_68 = arith.constant dense<0.000000e+00> : vector<1x32xf32>
    %264 = tpu.matmul %258, %207, %cst_68 {dimension_numbers = #tpu.dot_dimension_numbers<[1], [0], [0], [1], [0, 0, 1, 1], [], []>} : vector<1x8xf32>, vector<8x32xf32>, vector<1x32xf32> -> vector<1x32xf32>
    %265 = arith.addf %263, %264 : vector<1x32xf32>
    %266 = math.tanh %265 : vector<1x32xf32>
    %267 = arith.negf %265 : vector<1x32xf32>
    %268 = math.exp %267 : vector<1x32xf32>
    %cst_69 = arith.constant 1.000000e+00 : f32
    %269 = vector.broadcast %cst_69 : f32 to vector<1x32xf32>
    %270 = arith.addf %269, %268 : vector<1x32xf32>
    %271 = arith.divf %269, %270 : vector<1x32xf32>
    %272 = arith.select %213, %266, %271 : vector<1x32xi1>, vector<1x32xf32>
    %273 = vector.extract_strided_slice %272 {offsets = [0, 0], sizes = [1, 8], strides = [1, 1]} : vector<1x32xf32> to vector<1x8xf32>
    %274 = vector.extract_strided_slice %272 {offsets = [0, 8], sizes = [1, 8], strides = [1, 1]} : vector<1x32xf32> to vector<1x8xf32>
    %275 = vector.extract_strided_slice %272 {offsets = [0, 16], sizes = [1, 8], strides = [1, 1]} : vector<1x32xf32> to vector<1x8xf32>
    %276 = vector.extract_strided_slice %272 {offsets = [0, 24], sizes = [1, 8], strides = [1, 1]} : vector<1x32xf32> to vector<1x8xf32>
    %277 = arith.mulf %274, %256 : vector<1x8xf32>
    %278 = arith.mulf %273, %275 : vector<1x8xf32>
    %279 = arith.addf %277, %278 : vector<1x8xf32>
    %280 = math.tanh %279 : vector<1x8xf32>
    %281 = arith.mulf %276, %280 : vector<1x8xf32>
    %282 = math.tanh %281 : vector<1x8xf32>
    %283 = arith.index_cast %c2_i32_66 : i32 to index
    %c0_70 = arith.constant 0 : index
    %284 = vector.load %arg16[%283, %c0_70] : memref<8x8xf32, #tpu.memory_space<vmem>>, vector<1x8xf32>
    tpu.vector_store %arg16[%283, %c0_70], %282 {strides = array<i32>} : memref<8x8xf32, #tpu.memory_space<vmem>>, vector<1x8xf32>,
    %c3_i32_71 = arith.constant 3 : i32
    %285 = arith.index_cast %c3_i32_71 : i32 to index
    %c0_72 = arith.constant 0 : index
    %286 = vector.load %arg19[%285, %c0_72] : memref<8x32xf32, #tpu.memory_space<vmem>>, vector<1x32xf32>
    %cst_73 = arith.constant dense<0.000000e+00> : vector<1x32xf32>
    %287 = tpu.matmul %281, %207, %cst_73 {dimension_numbers = #tpu.dot_dimension_numbers<[1], [0], [0], [1], [0, 0, 1, 1], [], []>} : vector<1x8xf32>, vector<8x32xf32>, vector<1x32xf32> -> vector<1x32xf32>
    %288 = arith.addf %286, %287 : vector<1x32xf32>
    %289 = math.tanh %288 : vector<1x32xf32>
    %290 = arith.negf %288 : vector<1x32xf32>
    %291 = math.exp %290 : vector<1x32xf32>
    %cst_74 = arith.constant 1.000000e+00 : f32
    %292 = vector.broadcast %cst_74 : f32 to vector<1x32xf32>
    %293 = arith.addf %292, %291 : vector<1x32xf32>
    %294 = arith.divf %292, %293 : vector<1x32xf32>
    %295 = arith.select %213, %289, %294 : vector<1x32xi1>, vector<1x32xf32>
    %296 = vector.extract_strided_slice %295 {offsets = [0, 0], sizes = [1, 8], strides = [1, 1]} : vector<1x32xf32> to vector<1x8xf32>
    %297 = vector.extract_strided_slice %295 {offsets = [0, 8], sizes = [1, 8], strides = [1, 1]} : vector<1x32xf32> to vector<1x8xf32>
    %298 = vector.extract_strided_slice %295 {offsets = [0, 16], sizes = [1, 8], strides = [1, 1]} : vector<1x32xf32> to vector<1x8xf32>
    %299 = vector.extract_strided_slice %295 {offsets = [0, 24], sizes = [1, 8], strides = [1, 1]} : vector<1x32xf32> to vector<1x8xf32>
    %300 = arith.mulf %297, %279 : vector<1x8xf32>
    %301 = arith.mulf %296, %298 : vector<1x8xf32>
    %302 = arith.addf %300, %301 : vector<1x8xf32>
    %303 = math.tanh %302 : vector<1x8xf32>
    %304 = arith.mulf %299, %303 : vector<1x8xf32>
    %305 = math.tanh %304 : vector<1x8xf32>
    %306 = arith.index_cast %c3_i32_71 : i32 to index
    %c0_75 = arith.constant 0 : index
    %307 = vector.load %arg16[%306, %c0_75] : memref<8x8xf32, #tpu.memory_space<vmem>>, vector<1x8xf32>
    tpu.vector_store %arg16[%306, %c0_75], %305 {strides = array<i32>} : memref<8x8xf32, #tpu.memory_space<vmem>>, vector<1x8xf32>,
    %c4_i32_76 = arith.constant 4 : i32
    %308 = arith.index_cast %c4_i32_76 : i32 to index
    %c0_77 = arith.constant 0 : index
    %309 = vector.load %arg19[%308, %c0_77] : memref<8x32xf32, #tpu.memory_space<vmem>>, vector<1x32xf32>
    %cst_78 = arith.constant dense<0.000000e+00> : vector<1x32xf32>
    %310 = tpu.matmul %304, %207, %cst_78 {dimension_numbers = #tpu.dot_dimension_numbers<[1], [0], [0], [1], [0, 0, 1, 1], [], []>} : vector<1x8xf32>, vector<8x32xf32>, vector<1x32xf32> -> vector<1x32xf32>
    %311 = arith.addf %309, %310 : vector<1x32xf32>
    %312 = math.tanh %311 : vector<1x32xf32>
    %313 = arith.negf %311 : vector<1x32xf32>
    %314 = math.exp %313 : vector<1x32xf32>
    %cst_79 = arith.constant 1.000000e+00 : f32
    %315 = vector.broadcast %cst_79 : f32 to vector<1x32xf32>
    %316 = arith.addf %315, %314 : vector<1x32xf32>
    %317 = arith.divf %315, %316 : vector<1x32xf32>
    %318 = arith.select %213, %312, %317 : vector<1x32xi1>, vector<1x32xf32>
    %319 = vector.extract_strided_slice %318 {offsets = [0, 0], sizes = [1, 8], strides = [1, 1]} : vector<1x32xf32> to vector<1x8xf32>
    %320 = vector.extract_strided_slice %318 {offsets = [0, 8], sizes = [1, 8], strides = [1, 1]} : vector<1x32xf32> to vector<1x8xf32>
    %321 = vector.extract_strided_slice %318 {offsets = [0, 16], sizes = [1, 8], strides = [1, 1]} : vector<1x32xf32> to vector<1x8xf32>
    %322 = vector.extract_strided_slice %318 {offsets = [0, 24], sizes = [1, 8], strides = [1, 1]} : vector<1x32xf32> to vector<1x8xf32>
    %323 = arith.mulf %320, %302 : vector<1x8xf32>
    %324 = arith.mulf %319, %321 : vector<1x8xf32>
    %325 = arith.addf %323, %324 : vector<1x8xf32>
    %326 = math.tanh %325 : vector<1x8xf32>
    %327 = arith.mulf %322, %326 : vector<1x8xf32>
    %328 = math.tanh %327 : vector<1x8xf32>
    %329 = arith.index_cast %c4_i32_76 : i32 to index
    %c0_80 = arith.constant 0 : index
    %330 = vector.load %arg16[%329, %c0_80] : memref<8x8xf32, #tpu.memory_space<vmem>>, vector<1x8xf32>
    tpu.vector_store %arg16[%329, %c0_80], %328 {strides = array<i32>} : memref<8x8xf32, #tpu.memory_space<vmem>>, vector<1x8xf32>,
    %c5_i32_81 = arith.constant 5 : i32
    %331 = arith.index_cast %c5_i32_81 : i32 to index
    %c0_82 = arith.constant 0 : index
    %332 = vector.load %arg19[%331, %c0_82] : memref<8x32xf32, #tpu.memory_space<vmem>>, vector<1x32xf32>
    %cst_83 = arith.constant dense<0.000000e+00> : vector<1x32xf32>
    %333 = tpu.matmul %327, %207, %cst_83 {dimension_numbers = #tpu.dot_dimension_numbers<[1], [0], [0], [1], [0, 0, 1, 1], [], []>} : vector<1x8xf32>, vector<8x32xf32>, vector<1x32xf32> -> vector<1x32xf32>
    %334 = arith.addf %332, %333 : vector<1x32xf32>
    %335 = math.tanh %334 : vector<1x32xf32>
    %336 = arith.negf %334 : vector<1x32xf32>
    %337 = math.exp %336 : vector<1x32xf32>
    %cst_84 = arith.constant 1.000000e+00 : f32
    %338 = vector.broadcast %cst_84 : f32 to vector<1x32xf32>
    %339 = arith.addf %338, %337 : vector<1x32xf32>
    %340 = arith.divf %338, %339 : vector<1x32xf32>
    %341 = arith.select %213, %335, %340 : vector<1x32xi1>, vector<1x32xf32>
    %342 = vector.extract_strided_slice %341 {offsets = [0, 0], sizes = [1, 8], strides = [1, 1]} : vector<1x32xf32> to vector<1x8xf32>
    %343 = vector.extract_strided_slice %341 {offsets = [0, 8], sizes = [1, 8], strides = [1, 1]} : vector<1x32xf32> to vector<1x8xf32>
    %344 = vector.extract_strided_slice %341 {offsets = [0, 16], sizes = [1, 8], strides = [1, 1]} : vector<1x32xf32> to vector<1x8xf32>
    %345 = vector.extract_strided_slice %341 {offsets = [0, 24], sizes = [1, 8], strides = [1, 1]} : vector<1x32xf32> to vector<1x8xf32>
    %346 = arith.mulf %343, %325 : vector<1x8xf32>
    %347 = arith.mulf %342, %344 : vector<1x8xf32>
    %348 = arith.addf %346, %347 : vector<1x8xf32>
    %349 = math.tanh %348 : vector<1x8xf32>
    %350 = arith.mulf %345, %349 : vector<1x8xf32>
    %351 = math.tanh %350 : vector<1x8xf32>
    %352 = arith.index_cast %c5_i32_81 : i32 to index
    %c0_85 = arith.constant 0 : index
    %353 = vector.load %arg16[%352, %c0_85] : memref<8x8xf32, #tpu.memory_space<vmem>>, vector<1x8xf32>
    tpu.vector_store %arg16[%352, %c0_85], %351 {strides = array<i32>} : memref<8x8xf32, #tpu.memory_space<vmem>>, vector<1x8xf32>,
    %c6_i32_86 = arith.constant 6 : i32
    %354 = arith.index_cast %c6_i32_86 : i32 to index
    %c0_87 = arith.constant 0 : index
    %355 = vector.load %arg19[%354, %c0_87] : memref<8x32xf32, #tpu.memory_space<vmem>>, vector<1x32xf32>
    %cst_88 = arith.constant dense<0.000000e+00> : vector<1x32xf32>
    %356 = tpu.matmul %350, %207, %cst_88 {dimension_numbers = #tpu.dot_dimension_numbers<[1], [0], [0], [1], [0, 0, 1, 1], [], []>} : vector<1x8xf32>, vector<8x32xf32>, vector<1x32xf32> -> vector<1x32xf32>
    %357 = arith.addf %355, %356 : vector<1x32xf32>
    %358 = math.tanh %357 : vector<1x32xf32>
    %359 = arith.negf %357 : vector<1x32xf32>
    %360 = math.exp %359 : vector<1x32xf32>
    %cst_89 = arith.constant 1.000000e+00 : f32
    %361 = vector.broadcast %cst_89 : f32 to vector<1x32xf32>
    %362 = arith.addf %361, %360 : vector<1x32xf32>
    %363 = arith.divf %361, %362 : vector<1x32xf32>
    %364 = arith.select %213, %358, %363 : vector<1x32xi1>, vector<1x32xf32>
    %365 = vector.extract_strided_slice %364 {offsets = [0, 0], sizes = [1, 8], strides = [1, 1]} : vector<1x32xf32> to vector<1x8xf32>
    %366 = vector.extract_strided_slice %364 {offsets = [0, 8], sizes = [1, 8], strides = [1, 1]} : vector<1x32xf32> to vector<1x8xf32>
    %367 = vector.extract_strided_slice %364 {offsets = [0, 16], sizes = [1, 8], strides = [1, 1]} : vector<1x32xf32> to vector<1x8xf32>
    %368 = vector.extract_strided_slice %364 {offsets = [0, 24], sizes = [1, 8], strides = [1, 1]} : vector<1x32xf32> to vector<1x8xf32>
    %369 = arith.mulf %366, %348 : vector<1x8xf32>
    %370 = arith.mulf %365, %367 : vector<1x8xf32>
    %371 = arith.addf %369, %370 : vector<1x8xf32>
    %372 = math.tanh %371 : vector<1x8xf32>
    %373 = arith.mulf %368, %372 : vector<1x8xf32>
    %374 = math.tanh %373 : vector<1x8xf32>
    %375 = arith.index_cast %c6_i32_86 : i32 to index
    %c0_90 = arith.constant 0 : index
    %376 = vector.load %arg16[%375, %c0_90] : memref<8x8xf32, #tpu.memory_space<vmem>>, vector<1x8xf32>
    tpu.vector_store %arg16[%375, %c0_90], %374 {strides = array<i32>} : memref<8x8xf32, #tpu.memory_space<vmem>>, vector<1x8xf32>,
    %c7_i32_91 = arith.constant 7 : i32
    %377 = arith.index_cast %c7_i32_91 : i32 to index
    %c0_92 = arith.constant 0 : index
    %378 = vector.load %arg19[%377, %c0_92] : memref<8x32xf32, #tpu.memory_space<vmem>>, vector<1x32xf32>
    %cst_93 = arith.constant dense<0.000000e+00> : vector<1x32xf32>
    %379 = tpu.matmul %373, %207, %cst_93 {dimension_numbers = #tpu.dot_dimension_numbers<[1], [0], [0], [1], [0, 0, 1, 1], [], []>} : vector<1x8xf32>, vector<8x32xf32>, vector<1x32xf32> -> vector<1x32xf32>
    %380 = arith.addf %378, %379 : vector<1x32xf32>
    %381 = math.tanh %380 : vector<1x32xf32>
    %382 = arith.negf %380 : vector<1x32xf32>
    %383 = math.exp %382 : vector<1x32xf32>
    %cst_94 = arith.constant 1.000000e+00 : f32
    %384 = vector.broadcast %cst_94 : f32 to vector<1x32xf32>
    %385 = arith.addf %384, %383 : vector<1x32xf32>
    %386 = arith.divf %384, %385 : vector<1x32xf32>
    %387 = arith.select %213, %381, %386 : vector<1x32xi1>, vector<1x32xf32>
    %388 = vector.extract_strided_slice %387 {offsets = [0, 0], sizes = [1, 8], strides = [1, 1]} : vector<1x32xf32> to vector<1x8xf32>
    %389 = vector.extract_strided_slice %387 {offsets = [0, 8], sizes = [1, 8], strides = [1, 1]} : vector<1x32xf32> to vector<1x8xf32>
    %390 = vector.extract_strided_slice %387 {offsets = [0, 16], sizes = [1, 8], strides = [1, 1]} : vector<1x32xf32> to vector<1x8xf32>
    %391 = vector.extract_strided_slice %387 {offsets = [0, 24], sizes = [1, 8], strides = [1, 1]} : vector<1x32xf32> to vector<1x8xf32>
    %392 = arith.mulf %389, %371 : vector<1x8xf32>
    %393 = arith.mulf %388, %390 : vector<1x8xf32>
    %394 = arith.addf %392, %393 : vector<1x8xf32>
    %395 = math.tanh %394 : vector<1x8xf32>
    %396 = arith.mulf %391, %395 : vector<1x8xf32>
    %397 = math.tanh %396 : vector<1x8xf32>
    %398 = arith.index_cast %c7_i32_91 : i32 to index
    %c0_95 = arith.constant 0 : index
    %399 = vector.load %arg16[%398, %c0_95] : memref<8x8xf32, #tpu.memory_space<vmem>>, vector<1x8xf32>
    tpu.vector_store %arg16[%398, %c0_95], %397 {strides = array<i32>} : memref<8x8xf32, #tpu.memory_space<vmem>>, vector<1x8xf32>,
    %c8_i32_96 = arith.constant 8 : i32
    %c0_97 = arith.constant 0 : index
    %c0_98 = arith.constant 0 : index
    %400 = vector.load %arg16[%c0_97, %c0_98] : memref<8x8xf32, #tpu.memory_space<vmem>>, vector<8x8xf32>
    %c0_99 = arith.constant 0 : index
    %c0_100 = arith.constant 0 : index
    %401 = vector.load %arg8[%c0_99, %c0_100] : memref<8x128xf32, #tpu.memory_space<vmem>>, vector<8x128xf32>
    %cst_101 = arith.constant dense<0.000000e+00> : vector<8x128xf32>
    %402 = tpu.matmul %400, %401, %cst_101 {dimension_numbers = #tpu.dot_dimension_numbers<[1], [0], [0], [1], [0, 0, 1, 1], [], []>} : vector<8x8xf32>, vector<8x128xf32>, vector<8x128xf32> -> vector<8x128xf32>
    %c0_102 = arith.constant 0 : index
    %c0_103 = arith.constant 0 : index
    %403 = vector.load %arg10[%c0_102, %c0_103] : memref<1x128xf32, #tpu.memory_space<vmem>>, vector<1x128xf32>
    %404 = vector.broadcast %403 : vector<1x128xf32> to vector<8x128xf32>
    %405 = arith.addf %402, %404 : vector<8x128xf32>
    %c0_104 = arith.constant 0 : index
    %c0_105 = arith.constant 0 : index
    %406 = vector.load %arg20[%c0_104, %c0_105] : memref<8x128xf32, #tpu.memory_space<vmem>>, vector<8x128xf32>
    tpu.vector_store %arg20[%c0_104, %c0_105], %405 {strides = array<i32>} : memref<8x128xf32, #tpu.memory_space<vmem>>, vector<8x128xf32>,
    %c0_106 = arith.constant 0 : index
    %c0_107 = arith.constant 0 : index
    %407 = vector.load %arg9[%c0_106, %c0_107] : memref<32x128xf32, #tpu.memory_space<vmem>>, vector<32x128xf32>
    %408 = tpu.iota {dimensions = array<i32: 1>} : vector<1x128xi32>
    %c64_i32_108 = arith.constant 64 : i32
    %409 = vector.broadcast %c64_i32_108 : i32 to vector<1x128xi32>
    %410 = arith.cmpi sge, %408, %409 : vector<1x128xi32>
    %c96_i32_109 = arith.constant 96 : i32
    %411 = vector.broadcast %c96_i32_109 : i32 to vector<1x128xi32>
    %412 = arith.cmpi slt, %408, %411 : vector<1x128xi32>
    %413 = arith.andi %410, %412 : vector<1x128xi1>
    %cst_110 = arith.constant 0.000000e+00 : f32
    %414 = vector.broadcast %cst_110 : f32 to vector<1x32xf32>
    %cst_111 = arith.constant 0.000000e+00 : f32
    %415 = vector.broadcast %cst_111 : f32 to vector<1x32xf32>
    %c0_i32_112 = arith.constant 0 : i32
    %416 = arith.index_cast %c0_i32_112 : i32 to index
    %c0_113 = arith.constant 0 : index
    %417 = vector.load %arg20[%416, %c0_113] : memref<8x128xf32, #tpu.memory_space<vmem>>, vector<1x128xf32>
    %cst_114 = arith.constant dense<0.000000e+00> : vector<1x128xf32>
    %418 = tpu.matmul %414, %407, %cst_114 {dimension_numbers = #tpu.dot_dimension_numbers<[1], [0], [0], [1], [0, 0, 1, 1], [], []>} : vector<1x32xf32>, vector<32x128xf32>, vector<1x128xf32> -> vector<1x128xf32>
    %419 = arith.addf %417, %418 : vector<1x128xf32>
    %420 = math.tanh %419 : vector<1x128xf32>
    %421 = arith.negf %419 : vector<1x128xf32>
    %422 = math.exp %421 : vector<1x128xf32>
    %cst_115 = arith.constant 1.000000e+00 : f32
    %423 = vector.broadcast %cst_115 : f32 to vector<1x128xf32>
    %424 = arith.addf %423, %422 : vector<1x128xf32>
    %425 = arith.divf %423, %424 : vector<1x128xf32>
    %426 = arith.select %413, %420, %425 : vector<1x128xi1>, vector<1x128xf32>
    %427 = vector.extract_strided_slice %426 {offsets = [0, 0], sizes = [1, 32], strides = [1, 1]} : vector<1x128xf32> to vector<1x32xf32>
    %428 = vector.extract_strided_slice %426 {offsets = [0, 32], sizes = [1, 32], strides = [1, 1]} : vector<1x128xf32> to vector<1x32xf32>
    %429 = vector.extract_strided_slice %426 {offsets = [0, 64], sizes = [1, 32], strides = [1, 1]} : vector<1x128xf32> to vector<1x32xf32>
    %430 = vector.extract_strided_slice %426 {offsets = [0, 96], sizes = [1, 32], strides = [1, 1]} : vector<1x128xf32> to vector<1x32xf32>
    %431 = arith.mulf %428, %415 : vector<1x32xf32>
    %432 = arith.mulf %427, %429 : vector<1x32xf32>
    %433 = arith.addf %431, %432 : vector<1x32xf32>
    %434 = math.tanh %433 : vector<1x32xf32>
    %435 = arith.mulf %430, %434 : vector<1x32xf32>
    %436 = math.tanh %435 : vector<1x32xf32>
    %437 = arith.index_cast %c0_i32_112 : i32 to index
    %c0_116 = arith.constant 0 : index
    %438 = vector.load %arg17[%437, %c0_116] : memref<8x32xf32, #tpu.memory_space<vmem>>, vector<1x32xf32>
    tpu.vector_store %arg17[%437, %c0_116], %436 {strides = array<i32>} : memref<8x32xf32, #tpu.memory_space<vmem>>, vector<1x32xf32>,
    %c1_i32_117 = arith.constant 1 : i32
    %439 = arith.index_cast %c1_i32_117 : i32 to index
    %c0_118 = arith.constant 0 : index
    %440 = vector.load %arg20[%439, %c0_118] : memref<8x128xf32, #tpu.memory_space<vmem>>, vector<1x128xf32>
    %cst_119 = arith.constant dense<0.000000e+00> : vector<1x128xf32>
    %441 = tpu.matmul %435, %407, %cst_119 {dimension_numbers = #tpu.dot_dimension_numbers<[1], [0], [0], [1], [0, 0, 1, 1], [], []>} : vector<1x32xf32>, vector<32x128xf32>, vector<1x128xf32> -> vector<1x128xf32>
    %442 = arith.addf %440, %441 : vector<1x128xf32>
    %443 = math.tanh %442 : vector<1x128xf32>
    %444 = arith.negf %442 : vector<1x128xf32>
    %445 = math.exp %444 : vector<1x128xf32>
    %cst_120 = arith.constant 1.000000e+00 : f32
    %446 = vector.broadcast %cst_120 : f32 to vector<1x128xf32>
    %447 = arith.addf %446, %445 : vector<1x128xf32>
    %448 = arith.divf %446, %447 : vector<1x128xf32>
    %449 = arith.select %413, %443, %448 : vector<1x128xi1>, vector<1x128xf32>
    %450 = vector.extract_strided_slice %449 {offsets = [0, 0], sizes = [1, 32], strides = [1, 1]} : vector<1x128xf32> to vector<1x32xf32>
    %451 = vector.extract_strided_slice %449 {offsets = [0, 32], sizes = [1, 32], strides = [1, 1]} : vector<1x128xf32> to vector<1x32xf32>
    %452 = vector.extract_strided_slice %449 {offsets = [0, 64], sizes = [1, 32], strides = [1, 1]} : vector<1x128xf32> to vector<1x32xf32>
    %453 = vector.extract_strided_slice %449 {offsets = [0, 96], sizes = [1, 32], strides = [1, 1]} : vector<1x128xf32> to vector<1x32xf32>
    %454 = arith.mulf %451, %433 : vector<1x32xf32>
    %455 = arith.mulf %450, %452 : vector<1x32xf32>
    %456 = arith.addf %454, %455 : vector<1x32xf32>
    %457 = math.tanh %456 : vector<1x32xf32>
    %458 = arith.mulf %453, %457 : vector<1x32xf32>
    %459 = math.tanh %458 : vector<1x32xf32>
    %460 = arith.index_cast %c1_i32_117 : i32 to index
    %c0_121 = arith.constant 0 : index
    %461 = vector.load %arg17[%460, %c0_121] : memref<8x32xf32, #tpu.memory_space<vmem>>, vector<1x32xf32>
    tpu.vector_store %arg17[%460, %c0_121], %459 {strides = array<i32>} : memref<8x32xf32, #tpu.memory_space<vmem>>, vector<1x32xf32>,
    %c2_i32_122 = arith.constant 2 : i32
    %462 = arith.index_cast %c2_i32_122 : i32 to index
    %c0_123 = arith.constant 0 : index
    %463 = vector.load %arg20[%462, %c0_123] : memref<8x128xf32, #tpu.memory_space<vmem>>, vector<1x128xf32>
    %cst_124 = arith.constant dense<0.000000e+00> : vector<1x128xf32>
    %464 = tpu.matmul %458, %407, %cst_124 {dimension_numbers = #tpu.dot_dimension_numbers<[1], [0], [0], [1], [0, 0, 1, 1], [], []>} : vector<1x32xf32>, vector<32x128xf32>, vector<1x128xf32> -> vector<1x128xf32>
    %465 = arith.addf %463, %464 : vector<1x128xf32>
    %466 = math.tanh %465 : vector<1x128xf32>
    %467 = arith.negf %465 : vector<1x128xf32>
    %468 = math.exp %467 : vector<1x128xf32>
    %cst_125 = arith.constant 1.000000e+00 : f32
    %469 = vector.broadcast %cst_125 : f32 to vector<1x128xf32>
    %470 = arith.addf %469, %468 : vector<1x128xf32>
    %471 = arith.divf %469, %470 : vector<1x128xf32>
    %472 = arith.select %413, %466, %471 : vector<1x128xi1>, vector<1x128xf32>
    %473 = vector.extract_strided_slice %472 {offsets = [0, 0], sizes = [1, 32], strides = [1, 1]} : vector<1x128xf32> to vector<1x32xf32>
    %474 = vector.extract_strided_slice %472 {offsets = [0, 32], sizes = [1, 32], strides = [1, 1]} : vector<1x128xf32> to vector<1x32xf32>
    %475 = vector.extract_strided_slice %472 {offsets = [0, 64], sizes = [1, 32], strides = [1, 1]} : vector<1x128xf32> to vector<1x32xf32>
    %476 = vector.extract_strided_slice %472 {offsets = [0, 96], sizes = [1, 32], strides = [1, 1]} : vector<1x128xf32> to vector<1x32xf32>
    %477 = arith.mulf %474, %456 : vector<1x32xf32>
    %478 = arith.mulf %473, %475 : vector<1x32xf32>
    %479 = arith.addf %477, %478 : vector<1x32xf32>
    %480 = math.tanh %479 : vector<1x32xf32>
    %481 = arith.mulf %476, %480 : vector<1x32xf32>
    %482 = math.tanh %481 : vector<1x32xf32>
    %483 = arith.index_cast %c2_i32_122 : i32 to index
    %c0_126 = arith.constant 0 : index
    %484 = vector.load %arg17[%483, %c0_126] : memref<8x32xf32, #tpu.memory_space<vmem>>, vector<1x32xf32>
    tpu.vector_store %arg17[%483, %c0_126], %482 {strides = array<i32>} : memref<8x32xf32, #tpu.memory_space<vmem>>, vector<1x32xf32>,
    %c3_i32_127 = arith.constant 3 : i32
    %485 = arith.index_cast %c3_i32_127 : i32 to index
    %c0_128 = arith.constant 0 : index
    %486 = vector.load %arg20[%485, %c0_128] : memref<8x128xf32, #tpu.memory_space<vmem>>, vector<1x128xf32>
    %cst_129 = arith.constant dense<0.000000e+00> : vector<1x128xf32>
    %487 = tpu.matmul %481, %407, %cst_129 {dimension_numbers = #tpu.dot_dimension_numbers<[1], [0], [0], [1], [0, 0, 1, 1], [], []>} : vector<1x32xf32>, vector<32x128xf32>, vector<1x128xf32> -> vector<1x128xf32>
    %488 = arith.addf %486, %487 : vector<1x128xf32>
    %489 = math.tanh %488 : vector<1x128xf32>
    %490 = arith.negf %488 : vector<1x128xf32>
    %491 = math.exp %490 : vector<1x128xf32>
    %cst_130 = arith.constant 1.000000e+00 : f32
    %492 = vector.broadcast %cst_130 : f32 to vector<1x128xf32>
    %493 = arith.addf %492, %491 : vector<1x128xf32>
    %494 = arith.divf %492, %493 : vector<1x128xf32>
    %495 = arith.select %413, %489, %494 : vector<1x128xi1>, vector<1x128xf32>
    %496 = vector.extract_strided_slice %495 {offsets = [0, 0], sizes = [1, 32], strides = [1, 1]} : vector<1x128xf32> to vector<1x32xf32>
    %497 = vector.extract_strided_slice %495 {offsets = [0, 32], sizes = [1, 32], strides = [1, 1]} : vector<1x128xf32> to vector<1x32xf32>
    %498 = vector.extract_strided_slice %495 {offsets = [0, 64], sizes = [1, 32], strides = [1, 1]} : vector<1x128xf32> to vector<1x32xf32>
    %499 = vector.extract_strided_slice %495 {offsets = [0, 96], sizes = [1, 32], strides = [1, 1]} : vector<1x128xf32> to vector<1x32xf32>
    %500 = arith.mulf %497, %479 : vector<1x32xf32>
    %501 = arith.mulf %496, %498 : vector<1x32xf32>
    %502 = arith.addf %500, %501 : vector<1x32xf32>
    %503 = math.tanh %502 : vector<1x32xf32>
    %504 = arith.mulf %499, %503 : vector<1x32xf32>
    %505 = math.tanh %504 : vector<1x32xf32>
    %506 = arith.index_cast %c3_i32_127 : i32 to index
    %c0_131 = arith.constant 0 : index
    %507 = vector.load %arg17[%506, %c0_131] : memref<8x32xf32, #tpu.memory_space<vmem>>, vector<1x32xf32>
    tpu.vector_store %arg17[%506, %c0_131], %505 {strides = array<i32>} : memref<8x32xf32, #tpu.memory_space<vmem>>, vector<1x32xf32>,
    %c4_i32_132 = arith.constant 4 : i32
    %508 = arith.index_cast %c4_i32_132 : i32 to index
    %c0_133 = arith.constant 0 : index
    %509 = vector.load %arg20[%508, %c0_133] : memref<8x128xf32, #tpu.memory_space<vmem>>, vector<1x128xf32>
    %cst_134 = arith.constant dense<0.000000e+00> : vector<1x128xf32>
    %510 = tpu.matmul %504, %407, %cst_134 {dimension_numbers = #tpu.dot_dimension_numbers<[1], [0], [0], [1], [0, 0, 1, 1], [], []>} : vector<1x32xf32>, vector<32x128xf32>, vector<1x128xf32> -> vector<1x128xf32>
    %511 = arith.addf %509, %510 : vector<1x128xf32>
    %512 = math.tanh %511 : vector<1x128xf32>
    %513 = arith.negf %511 : vector<1x128xf32>
    %514 = math.exp %513 : vector<1x128xf32>
    %cst_135 = arith.constant 1.000000e+00 : f32
    %515 = vector.broadcast %cst_135 : f32 to vector<1x128xf32>
    %516 = arith.addf %515, %514 : vector<1x128xf32>
    %517 = arith.divf %515, %516 : vector<1x128xf32>
    %518 = arith.select %413, %512, %517 : vector<1x128xi1>, vector<1x128xf32>
    %519 = vector.extract_strided_slice %518 {offsets = [0, 0], sizes = [1, 32], strides = [1, 1]} : vector<1x128xf32> to vector<1x32xf32>
    %520 = vector.extract_strided_slice %518 {offsets = [0, 32], sizes = [1, 32], strides = [1, 1]} : vector<1x128xf32> to vector<1x32xf32>
    %521 = vector.extract_strided_slice %518 {offsets = [0, 64], sizes = [1, 32], strides = [1, 1]} : vector<1x128xf32> to vector<1x32xf32>
    %522 = vector.extract_strided_slice %518 {offsets = [0, 96], sizes = [1, 32], strides = [1, 1]} : vector<1x128xf32> to vector<1x32xf32>
    %523 = arith.mulf %520, %502 : vector<1x32xf32>
    %524 = arith.mulf %519, %521 : vector<1x32xf32>
    %525 = arith.addf %523, %524 : vector<1x32xf32>
    %526 = math.tanh %525 : vector<1x32xf32>
    %527 = arith.mulf %522, %526 : vector<1x32xf32>
    %528 = math.tanh %527 : vector<1x32xf32>
    %529 = arith.index_cast %c4_i32_132 : i32 to index
    %c0_136 = arith.constant 0 : index
    %530 = vector.load %arg17[%529, %c0_136] : memref<8x32xf32, #tpu.memory_space<vmem>>, vector<1x32xf32>
    tpu.vector_store %arg17[%529, %c0_136], %528 {strides = array<i32>} : memref<8x32xf32, #tpu.memory_space<vmem>>, vector<1x32xf32>,
    %c5_i32_137 = arith.constant 5 : i32
    %531 = arith.index_cast %c5_i32_137 : i32 to index
    %c0_138 = arith.constant 0 : index
    %532 = vector.load %arg20[%531, %c0_138] : memref<8x128xf32, #tpu.memory_space<vmem>>, vector<1x128xf32>
    %cst_139 = arith.constant dense<0.000000e+00> : vector<1x128xf32>
    %533 = tpu.matmul %527, %407, %cst_139 {dimension_numbers = #tpu.dot_dimension_numbers<[1], [0], [0], [1], [0, 0, 1, 1], [], []>} : vector<1x32xf32>, vector<32x128xf32>, vector<1x128xf32> -> vector<1x128xf32>
    %534 = arith.addf %532, %533 : vector<1x128xf32>
    %535 = math.tanh %534 : vector<1x128xf32>
    %536 = arith.negf %534 : vector<1x128xf32>
    %537 = math.exp %536 : vector<1x128xf32>
    %cst_140 = arith.constant 1.000000e+00 : f32
    %538 = vector.broadcast %cst_140 : f32 to vector<1x128xf32>
    %539 = arith.addf %538, %537 : vector<1x128xf32>
    %540 = arith.divf %538, %539 : vector<1x128xf32>
    %541 = arith.select %413, %535, %540 : vector<1x128xi1>, vector<1x128xf32>
    %542 = vector.extract_strided_slice %541 {offsets = [0, 0], sizes = [1, 32], strides = [1, 1]} : vector<1x128xf32> to vector<1x32xf32>
    %543 = vector.extract_strided_slice %541 {offsets = [0, 32], sizes = [1, 32], strides = [1, 1]} : vector<1x128xf32> to vector<1x32xf32>
    %544 = vector.extract_strided_slice %541 {offsets = [0, 64], sizes = [1, 32], strides = [1, 1]} : vector<1x128xf32> to vector<1x32xf32>
    %545 = vector.extract_strided_slice %541 {offsets = [0, 96], sizes = [1, 32], strides = [1, 1]} : vector<1x128xf32> to vector<1x32xf32>
    %546 = arith.mulf %543, %525 : vector<1x32xf32>
    %547 = arith.mulf %542, %544 : vector<1x32xf32>
    %548 = arith.addf %546, %547 : vector<1x32xf32>
    %549 = math.tanh %548 : vector<1x32xf32>
    %550 = arith.mulf %545, %549 : vector<1x32xf32>
    %551 = math.tanh %550 : vector<1x32xf32>
    %552 = arith.index_cast %c5_i32_137 : i32 to index
    %c0_141 = arith.constant 0 : index
    %553 = vector.load %arg17[%552, %c0_141] : memref<8x32xf32, #tpu.memory_space<vmem>>, vector<1x32xf32>
    tpu.vector_store %arg17[%552, %c0_141], %551 {strides = array<i32>} : memref<8x32xf32, #tpu.memory_space<vmem>>, vector<1x32xf32>,
    %c6_i32_142 = arith.constant 6 : i32
    %554 = arith.index_cast %c6_i32_142 : i32 to index
    %c0_143 = arith.constant 0 : index
    %555 = vector.load %arg20[%554, %c0_143] : memref<8x128xf32, #tpu.memory_space<vmem>>, vector<1x128xf32>
    %cst_144 = arith.constant dense<0.000000e+00> : vector<1x128xf32>
    %556 = tpu.matmul %550, %407, %cst_144 {dimension_numbers = #tpu.dot_dimension_numbers<[1], [0], [0], [1], [0, 0, 1, 1], [], []>} : vector<1x32xf32>, vector<32x128xf32>, vector<1x128xf32> -> vector<1x128xf32>
    %557 = arith.addf %555, %556 : vector<1x128xf32>
    %558 = math.tanh %557 : vector<1x128xf32>
    %559 = arith.negf %557 : vector<1x128xf32>
    %560 = math.exp %559 : vector<1x128xf32>
    %cst_145 = arith.constant 1.000000e+00 : f32
    %561 = vector.broadcast %cst_145 : f32 to vector<1x128xf32>
    %562 = arith.addf %561, %560 : vector<1x128xf32>
    %563 = arith.divf %561, %562 : vector<1x128xf32>
    %564 = arith.select %413, %558, %563 : vector<1x128xi1>, vector<1x128xf32>
    %565 = vector.extract_strided_slice %564 {offsets = [0, 0], sizes = [1, 32], strides = [1, 1]} : vector<1x128xf32> to vector<1x32xf32>
    %566 = vector.extract_strided_slice %564 {offsets = [0, 32], sizes = [1, 32], strides = [1, 1]} : vector<1x128xf32> to vector<1x32xf32>
    %567 = vector.extract_strided_slice %564 {offsets = [0, 64], sizes = [1, 32], strides = [1, 1]} : vector<1x128xf32> to vector<1x32xf32>
    %568 = vector.extract_strided_slice %564 {offsets = [0, 96], sizes = [1, 32], strides = [1, 1]} : vector<1x128xf32> to vector<1x32xf32>
    %569 = arith.mulf %566, %548 : vector<1x32xf32>
    %570 = arith.mulf %565, %567 : vector<1x32xf32>
    %571 = arith.addf %569, %570 : vector<1x32xf32>
    %572 = math.tanh %571 : vector<1x32xf32>
    %573 = arith.mulf %568, %572 : vector<1x32xf32>
    %574 = math.tanh %573 : vector<1x32xf32>
    %575 = arith.index_cast %c6_i32_142 : i32 to index
    %c0_146 = arith.constant 0 : index
    %576 = vector.load %arg17[%575, %c0_146] : memref<8x32xf32, #tpu.memory_space<vmem>>, vector<1x32xf32>
    tpu.vector_store %arg17[%575, %c0_146], %574 {strides = array<i32>} : memref<8x32xf32, #tpu.memory_space<vmem>>, vector<1x32xf32>,
    %c7_i32_147 = arith.constant 7 : i32
    %577 = arith.index_cast %c7_i32_147 : i32 to index
    %c0_148 = arith.constant 0 : index
    %578 = vector.load %arg20[%577, %c0_148] : memref<8x128xf32, #tpu.memory_space<vmem>>, vector<1x128xf32>
    %cst_149 = arith.constant dense<0.000000e+00> : vector<1x128xf32>
    %579 = tpu.matmul %573, %407, %cst_149 {dimension_numbers = #tpu.dot_dimension_numbers<[1], [0], [0], [1], [0, 0, 1, 1], [], []>} : vector<1x32xf32>, vector<32x128xf32>, vector<1x128xf32> -> vector<1x128xf32>
    %580 = arith.addf %578, %579 : vector<1x128xf32>
    %581 = math.tanh %580 : vector<1x128xf32>
    %582 = arith.negf %580 : vector<1x128xf32>
    %583 = math.exp %582 : vector<1x128xf32>
    %cst_150 = arith.constant 1.000000e+00 : f32
    %584 = vector.broadcast %cst_150 : f32 to vector<1x128xf32>
    %585 = arith.addf %584, %583 : vector<1x128xf32>
    %586 = arith.divf %584, %585 : vector<1x128xf32>
    %587 = arith.select %413, %581, %586 : vector<1x128xi1>, vector<1x128xf32>
    %588 = vector.extract_strided_slice %587 {offsets = [0, 0], sizes = [1, 32], strides = [1, 1]} : vector<1x128xf32> to vector<1x32xf32>
    %589 = vector.extract_strided_slice %587 {offsets = [0, 32], sizes = [1, 32], strides = [1, 1]} : vector<1x128xf32> to vector<1x32xf32>
    %590 = vector.extract_strided_slice %587 {offsets = [0, 64], sizes = [1, 32], strides = [1, 1]} : vector<1x128xf32> to vector<1x32xf32>
    %591 = vector.extract_strided_slice %587 {offsets = [0, 96], sizes = [1, 32], strides = [1, 1]} : vector<1x128xf32> to vector<1x32xf32>
    %592 = arith.mulf %589, %571 : vector<1x32xf32>
    %593 = arith.mulf %588, %590 : vector<1x32xf32>
    %594 = arith.addf %592, %593 : vector<1x32xf32>
    %595 = math.tanh %594 : vector<1x32xf32>
    %596 = arith.mulf %591, %595 : vector<1x32xf32>
    %597 = math.tanh %596 : vector<1x32xf32>
    %598 = arith.index_cast %c7_i32_147 : i32 to index
    %c0_151 = arith.constant 0 : index
    %599 = vector.load %arg17[%598, %c0_151] : memref<8x32xf32, #tpu.memory_space<vmem>>, vector<1x32xf32>
    tpu.vector_store %arg17[%598, %c0_151], %597 {strides = array<i32>} : memref<8x32xf32, #tpu.memory_space<vmem>>, vector<1x32xf32>,
    %c8_i32_152 = arith.constant 8 : i32
    %c0_153 = arith.constant 0 : index
    %c0_154 = arith.constant 0 : index
    %600 = vector.load %arg17[%c0_153, %c0_154] : memref<8x32xf32, #tpu.memory_space<vmem>>, vector<8x32xf32>
    %c0_155 = arith.constant 0 : index
    %c0_156 = arith.constant 0 : index
    %601 = vector.load %arg11[%c0_155, %c0_156] : memref<32x128xf32, #tpu.memory_space<vmem>>, vector<32x128xf32>
    %cst_157 = arith.constant dense<0.000000e+00> : vector<8x128xf32>
    %602 = tpu.matmul %600, %601, %cst_157 {dimension_numbers = #tpu.dot_dimension_numbers<[1], [0], [0], [1], [0, 0, 1, 1], [], []>} : vector<8x32xf32>, vector<32x128xf32>, vector<8x128xf32> -> vector<8x128xf32>
    %c0_158 = arith.constant 0 : index
    %c0_159 = arith.constant 0 : index
    %603 = vector.load %arg13[%c0_158, %c0_159] : memref<1x128xf32, #tpu.memory_space<vmem>>, vector<1x128xf32>
    %604 = vector.broadcast %603 : vector<1x128xf32> to vector<8x128xf32>
    %605 = arith.addf %602, %604 : vector<8x128xf32>
    %c0_160 = arith.constant 0 : index
    %c0_161 = arith.constant 0 : index
    %606 = vector.load %arg21[%c0_160, %c0_161] : memref<8x128xf32, #tpu.memory_space<vmem>>, vector<8x128xf32>
    tpu.vector_store %arg21[%c0_160, %c0_161], %605 {strides = array<i32>} : memref<8x128xf32, #tpu.memory_space<vmem>>, vector<8x128xf32>,
    %c0_162 = arith.constant 0 : index
    %c0_163 = arith.constant 0 : index
    %607 = vector.load %arg12[%c0_162, %c0_163] : memref<32x128xf32, #tpu.memory_space<vmem>>, vector<32x128xf32>
    %608 = tpu.iota {dimensions = array<i32: 1>} : vector<1x128xi32>
    %c64_i32_164 = arith.constant 64 : i32
    %609 = vector.broadcast %c64_i32_164 : i32 to vector<1x128xi32>
    %610 = arith.cmpi sge, %608, %609 : vector<1x128xi32>
    %c96_i32_165 = arith.constant 96 : i32
    %611 = vector.broadcast %c96_i32_165 : i32 to vector<1x128xi32>
    %612 = arith.cmpi slt, %608, %611 : vector<1x128xi32>
    %613 = arith.andi %610, %612 : vector<1x128xi1>
    %cst_166 = arith.constant 0.000000e+00 : f32
    %614 = vector.broadcast %cst_166 : f32 to vector<1x32xf32>
    %cst_167 = arith.constant 0.000000e+00 : f32
    %615 = vector.broadcast %cst_167 : f32 to vector<1x32xf32>
    %c0_i32_168 = arith.constant 0 : i32
    %616 = arith.index_cast %c0_i32_168 : i32 to index
    %c0_169 = arith.constant 0 : index
    %617 = vector.load %arg21[%616, %c0_169] : memref<8x128xf32, #tpu.memory_space<vmem>>, vector<1x128xf32>
    %cst_170 = arith.constant dense<0.000000e+00> : vector<1x128xf32>
    %618 = tpu.matmul %614, %607, %cst_170 {dimension_numbers = #tpu.dot_dimension_numbers<[1], [0], [0], [1], [0, 0, 1, 1], [], []>} : vector<1x32xf32>, vector<32x128xf32>, vector<1x128xf32> -> vector<1x128xf32>
    %619 = arith.addf %617, %618 : vector<1x128xf32>
    %620 = math.tanh %619 : vector<1x128xf32>
    %621 = arith.negf %619 : vector<1x128xf32>
    %622 = math.exp %621 : vector<1x128xf32>
    %cst_171 = arith.constant 1.000000e+00 : f32
    %623 = vector.broadcast %cst_171 : f32 to vector<1x128xf32>
    %624 = arith.addf %623, %622 : vector<1x128xf32>
    %625 = arith.divf %623, %624 : vector<1x128xf32>
    %626 = arith.select %613, %620, %625 : vector<1x128xi1>, vector<1x128xf32>
    %627 = vector.extract_strided_slice %626 {offsets = [0, 0], sizes = [1, 32], strides = [1, 1]} : vector<1x128xf32> to vector<1x32xf32>
    %628 = vector.extract_strided_slice %626 {offsets = [0, 32], sizes = [1, 32], strides = [1, 1]} : vector<1x128xf32> to vector<1x32xf32>
    %629 = vector.extract_strided_slice %626 {offsets = [0, 64], sizes = [1, 32], strides = [1, 1]} : vector<1x128xf32> to vector<1x32xf32>
    %630 = vector.extract_strided_slice %626 {offsets = [0, 96], sizes = [1, 32], strides = [1, 1]} : vector<1x128xf32> to vector<1x32xf32>
    %631 = arith.mulf %628, %615 : vector<1x32xf32>
    %632 = arith.mulf %627, %629 : vector<1x32xf32>
    %633 = arith.addf %631, %632 : vector<1x32xf32>
    %634 = math.tanh %633 : vector<1x32xf32>
    %635 = arith.mulf %630, %634 : vector<1x32xf32>
    %636 = arith.index_cast %c0_i32_168 : i32 to index
    %c0_172 = arith.constant 0 : index
    %637 = vector.load %arg14[%636, %c0_172] : memref<8x32xf32, #tpu.memory_space<vmem>>, vector<1x32xf32>
    tpu.vector_store %arg14[%636, %c0_172], %635 {strides = array<i32>} : memref<8x32xf32, #tpu.memory_space<vmem>>, vector<1x32xf32>,
    %c1_i32_173 = arith.constant 1 : i32
    %638 = arith.index_cast %c1_i32_173 : i32 to index
    %c0_174 = arith.constant 0 : index
    %639 = vector.load %arg21[%638, %c0_174] : memref<8x128xf32, #tpu.memory_space<vmem>>, vector<1x128xf32>
    %cst_175 = arith.constant dense<0.000000e+00> : vector<1x128xf32>
    %640 = tpu.matmul %635, %607, %cst_175 {dimension_numbers = #tpu.dot_dimension_numbers<[1], [0], [0], [1], [0, 0, 1, 1], [], []>} : vector<1x32xf32>, vector<32x128xf32>, vector<1x128xf32> -> vector<1x128xf32>
    %641 = arith.addf %639, %640 : vector<1x128xf32>
    %642 = math.tanh %641 : vector<1x128xf32>
    %643 = arith.negf %641 : vector<1x128xf32>
    %644 = math.exp %643 : vector<1x128xf32>
    %cst_176 = arith.constant 1.000000e+00 : f32
    %645 = vector.broadcast %cst_176 : f32 to vector<1x128xf32>
    %646 = arith.addf %645, %644 : vector<1x128xf32>
    %647 = arith.divf %645, %646 : vector<1x128xf32>
    %648 = arith.select %613, %642, %647 : vector<1x128xi1>, vector<1x128xf32>
    %649 = vector.extract_strided_slice %648 {offsets = [0, 0], sizes = [1, 32], strides = [1, 1]} : vector<1x128xf32> to vector<1x32xf32>
    %650 = vector.extract_strided_slice %648 {offsets = [0, 32], sizes = [1, 32], strides = [1, 1]} : vector<1x128xf32> to vector<1x32xf32>
    %651 = vector.extract_strided_slice %648 {offsets = [0, 64], sizes = [1, 32], strides = [1, 1]} : vector<1x128xf32> to vector<1x32xf32>
    %652 = vector.extract_strided_slice %648 {offsets = [0, 96], sizes = [1, 32], strides = [1, 1]} : vector<1x128xf32> to vector<1x32xf32>
    %653 = arith.mulf %650, %633 : vector<1x32xf32>
    %654 = arith.mulf %649, %651 : vector<1x32xf32>
    %655 = arith.addf %653, %654 : vector<1x32xf32>
    %656 = math.tanh %655 : vector<1x32xf32>
    %657 = arith.mulf %652, %656 : vector<1x32xf32>
    %658 = arith.index_cast %c1_i32_173 : i32 to index
    %c0_177 = arith.constant 0 : index
    %659 = vector.load %arg14[%658, %c0_177] : memref<8x32xf32, #tpu.memory_space<vmem>>, vector<1x32xf32>
    tpu.vector_store %arg14[%658, %c0_177], %657 {strides = array<i32>} : memref<8x32xf32, #tpu.memory_space<vmem>>, vector<1x32xf32>,
    %c2_i32_178 = arith.constant 2 : i32
    %660 = arith.index_cast %c2_i32_178 : i32 to index
    %c0_179 = arith.constant 0 : index
    %661 = vector.load %arg21[%660, %c0_179] : memref<8x128xf32, #tpu.memory_space<vmem>>, vector<1x128xf32>
    %cst_180 = arith.constant dense<0.000000e+00> : vector<1x128xf32>
    %662 = tpu.matmul %657, %607, %cst_180 {dimension_numbers = #tpu.dot_dimension_numbers<[1], [0], [0], [1], [0, 0, 1, 1], [], []>} : vector<1x32xf32>, vector<32x128xf32>, vector<1x128xf32> -> vector<1x128xf32>
    %663 = arith.addf %661, %662 : vector<1x128xf32>
    %664 = math.tanh %663 : vector<1x128xf32>
    %665 = arith.negf %663 : vector<1x128xf32>
    %666 = math.exp %665 : vector<1x128xf32>
    %cst_181 = arith.constant 1.000000e+00 : f32
    %667 = vector.broadcast %cst_181 : f32 to vector<1x128xf32>
    %668 = arith.addf %667, %666 : vector<1x128xf32>
    %669 = arith.divf %667, %668 : vector<1x128xf32>
    %670 = arith.select %613, %664, %669 : vector<1x128xi1>, vector<1x128xf32>
    %671 = vector.extract_strided_slice %670 {offsets = [0, 0], sizes = [1, 32], strides = [1, 1]} : vector<1x128xf32> to vector<1x32xf32>
    %672 = vector.extract_strided_slice %670 {offsets = [0, 32], sizes = [1, 32], strides = [1, 1]} : vector<1x128xf32> to vector<1x32xf32>
    %673 = vector.extract_strided_slice %670 {offsets = [0, 64], sizes = [1, 32], strides = [1, 1]} : vector<1x128xf32> to vector<1x32xf32>
    %674 = vector.extract_strided_slice %670 {offsets = [0, 96], sizes = [1, 32], strides = [1, 1]} : vector<1x128xf32> to vector<1x32xf32>
    %675 = arith.mulf %672, %655 : vector<1x32xf32>
    %676 = arith.mulf %671, %673 : vector<1x32xf32>
    %677 = arith.addf %675, %676 : vector<1x32xf32>
    %678 = math.tanh %677 : vector<1x32xf32>
    %679 = arith.mulf %674, %678 : vector<1x32xf32>
    %680 = arith.index_cast %c2_i32_178 : i32 to index
    %c0_182 = arith.constant 0 : index
    %681 = vector.load %arg14[%680, %c0_182] : memref<8x32xf32, #tpu.memory_space<vmem>>, vector<1x32xf32>
    tpu.vector_store %arg14[%680, %c0_182], %679 {strides = array<i32>} : memref<8x32xf32, #tpu.memory_space<vmem>>, vector<1x32xf32>,
    %c3_i32_183 = arith.constant 3 : i32
    %682 = arith.index_cast %c3_i32_183 : i32 to index
    %c0_184 = arith.constant 0 : index
    %683 = vector.load %arg21[%682, %c0_184] : memref<8x128xf32, #tpu.memory_space<vmem>>, vector<1x128xf32>
    %cst_185 = arith.constant dense<0.000000e+00> : vector<1x128xf32>
    %684 = tpu.matmul %679, %607, %cst_185 {dimension_numbers = #tpu.dot_dimension_numbers<[1], [0], [0], [1], [0, 0, 1, 1], [], []>} : vector<1x32xf32>, vector<32x128xf32>, vector<1x128xf32> -> vector<1x128xf32>
    %685 = arith.addf %683, %684 : vector<1x128xf32>
    %686 = math.tanh %685 : vector<1x128xf32>
    %687 = arith.negf %685 : vector<1x128xf32>
    %688 = math.exp %687 : vector<1x128xf32>
    %cst_186 = arith.constant 1.000000e+00 : f32
    %689 = vector.broadcast %cst_186 : f32 to vector<1x128xf32>
    %690 = arith.addf %689, %688 : vector<1x128xf32>
    %691 = arith.divf %689, %690 : vector<1x128xf32>
    %692 = arith.select %613, %686, %691 : vector<1x128xi1>, vector<1x128xf32>
    %693 = vector.extract_strided_slice %692 {offsets = [0, 0], sizes = [1, 32], strides = [1, 1]} : vector<1x128xf32> to vector<1x32xf32>
    %694 = vector.extract_strided_slice %692 {offsets = [0, 32], sizes = [1, 32], strides = [1, 1]} : vector<1x128xf32> to vector<1x32xf32>
    %695 = vector.extract_strided_slice %692 {offsets = [0, 64], sizes = [1, 32], strides = [1, 1]} : vector<1x128xf32> to vector<1x32xf32>
    %696 = vector.extract_strided_slice %692 {offsets = [0, 96], sizes = [1, 32], strides = [1, 1]} : vector<1x128xf32> to vector<1x32xf32>
    %697 = arith.mulf %694, %677 : vector<1x32xf32>
    %698 = arith.mulf %693, %695 : vector<1x32xf32>
    %699 = arith.addf %697, %698 : vector<1x32xf32>
    %700 = math.tanh %699 : vector<1x32xf32>
    %701 = arith.mulf %696, %700 : vector<1x32xf32>
    %702 = arith.index_cast %c3_i32_183 : i32 to index
    %c0_187 = arith.constant 0 : index
    %703 = vector.load %arg14[%702, %c0_187] : memref<8x32xf32, #tpu.memory_space<vmem>>, vector<1x32xf32>
    tpu.vector_store %arg14[%702, %c0_187], %701 {strides = array<i32>} : memref<8x32xf32, #tpu.memory_space<vmem>>, vector<1x32xf32>,
    %c4_i32_188 = arith.constant 4 : i32
    %704 = arith.index_cast %c4_i32_188 : i32 to index
    %c0_189 = arith.constant 0 : index
    %705 = vector.load %arg21[%704, %c0_189] : memref<8x128xf32, #tpu.memory_space<vmem>>, vector<1x128xf32>
    %cst_190 = arith.constant dense<0.000000e+00> : vector<1x128xf32>
    %706 = tpu.matmul %701, %607, %cst_190 {dimension_numbers = #tpu.dot_dimension_numbers<[1], [0], [0], [1], [0, 0, 1, 1], [], []>} : vector<1x32xf32>, vector<32x128xf32>, vector<1x128xf32> -> vector<1x128xf32>
    %707 = arith.addf %705, %706 : vector<1x128xf32>
    %708 = math.tanh %707 : vector<1x128xf32>
    %709 = arith.negf %707 : vector<1x128xf32>
    %710 = math.exp %709 : vector<1x128xf32>
    %cst_191 = arith.constant 1.000000e+00 : f32
    %711 = vector.broadcast %cst_191 : f32 to vector<1x128xf32>
    %712 = arith.addf %711, %710 : vector<1x128xf32>
    %713 = arith.divf %711, %712 : vector<1x128xf32>
    %714 = arith.select %613, %708, %713 : vector<1x128xi1>, vector<1x128xf32>
    %715 = vector.extract_strided_slice %714 {offsets = [0, 0], sizes = [1, 32], strides = [1, 1]} : vector<1x128xf32> to vector<1x32xf32>
    %716 = vector.extract_strided_slice %714 {offsets = [0, 32], sizes = [1, 32], strides = [1, 1]} : vector<1x128xf32> to vector<1x32xf32>
    %717 = vector.extract_strided_slice %714 {offsets = [0, 64], sizes = [1, 32], strides = [1, 1]} : vector<1x128xf32> to vector<1x32xf32>
    %718 = vector.extract_strided_slice %714 {offsets = [0, 96], sizes = [1, 32], strides = [1, 1]} : vector<1x128xf32> to vector<1x32xf32>
    %719 = arith.mulf %716, %699 : vector<1x32xf32>
    %720 = arith.mulf %715, %717 : vector<1x32xf32>
    %721 = arith.addf %719, %720 : vector<1x32xf32>
    %722 = math.tanh %721 : vector<1x32xf32>
    %723 = arith.mulf %718, %722 : vector<1x32xf32>
    %724 = arith.index_cast %c4_i32_188 : i32 to index
    %c0_192 = arith.constant 0 : index
    %725 = vector.load %arg14[%724, %c0_192] : memref<8x32xf32, #tpu.memory_space<vmem>>, vector<1x32xf32>
    tpu.vector_store %arg14[%724, %c0_192], %723 {strides = array<i32>} : memref<8x32xf32, #tpu.memory_space<vmem>>, vector<1x32xf32>,
    %c5_i32_193 = arith.constant 5 : i32
    %726 = arith.index_cast %c5_i32_193 : i32 to index
    %c0_194 = arith.constant 0 : index
    %727 = vector.load %arg21[%726, %c0_194] : memref<8x128xf32, #tpu.memory_space<vmem>>, vector<1x128xf32>
    %cst_195 = arith.constant dense<0.000000e+00> : vector<1x128xf32>
    %728 = tpu.matmul %723, %607, %cst_195 {dimension_numbers = #tpu.dot_dimension_numbers<[1], [0], [0], [1], [0, 0, 1, 1], [], []>} : vector<1x32xf32>, vector<32x128xf32>, vector<1x128xf32> -> vector<1x128xf32>
    %729 = arith.addf %727, %728 : vector<1x128xf32>
    %730 = math.tanh %729 : vector<1x128xf32>
    %731 = arith.negf %729 : vector<1x128xf32>
    %732 = math.exp %731 : vector<1x128xf32>
    %cst_196 = arith.constant 1.000000e+00 : f32
    %733 = vector.broadcast %cst_196 : f32 to vector<1x128xf32>
    %734 = arith.addf %733, %732 : vector<1x128xf32>
    %735 = arith.divf %733, %734 : vector<1x128xf32>
    %736 = arith.select %613, %730, %735 : vector<1x128xi1>, vector<1x128xf32>
    %737 = vector.extract_strided_slice %736 {offsets = [0, 0], sizes = [1, 32], strides = [1, 1]} : vector<1x128xf32> to vector<1x32xf32>
    %738 = vector.extract_strided_slice %736 {offsets = [0, 32], sizes = [1, 32], strides = [1, 1]} : vector<1x128xf32> to vector<1x32xf32>
    %739 = vector.extract_strided_slice %736 {offsets = [0, 64], sizes = [1, 32], strides = [1, 1]} : vector<1x128xf32> to vector<1x32xf32>
    %740 = vector.extract_strided_slice %736 {offsets = [0, 96], sizes = [1, 32], strides = [1, 1]} : vector<1x128xf32> to vector<1x32xf32>
    %741 = arith.mulf %738, %721 : vector<1x32xf32>
    %742 = arith.mulf %737, %739 : vector<1x32xf32>
    %743 = arith.addf %741, %742 : vector<1x32xf32>
    %744 = math.tanh %743 : vector<1x32xf32>
    %745 = arith.mulf %740, %744 : vector<1x32xf32>
    %746 = arith.index_cast %c5_i32_193 : i32 to index
    %c0_197 = arith.constant 0 : index
    %747 = vector.load %arg14[%746, %c0_197] : memref<8x32xf32, #tpu.memory_space<vmem>>, vector<1x32xf32>
    tpu.vector_store %arg14[%746, %c0_197], %745 {strides = array<i32>} : memref<8x32xf32, #tpu.memory_space<vmem>>, vector<1x32xf32>,
    %c6_i32_198 = arith.constant 6 : i32
    %748 = arith.index_cast %c6_i32_198 : i32 to index
    %c0_199 = arith.constant 0 : index
    %749 = vector.load %arg21[%748, %c0_199] : memref<8x128xf32, #tpu.memory_space<vmem>>, vector<1x128xf32>
    %cst_200 = arith.constant dense<0.000000e+00> : vector<1x128xf32>
    %750 = tpu.matmul %745, %607, %cst_200 {dimension_numbers = #tpu.dot_dimension_numbers<[1], [0], [0], [1], [0, 0, 1, 1], [], []>} : vector<1x32xf32>, vector<32x128xf32>, vector<1x128xf32> -> vector<1x128xf32>
    %751 = arith.addf %749, %750 : vector<1x128xf32>
    %752 = math.tanh %751 : vector<1x128xf32>
    %753 = arith.negf %751 : vector<1x128xf32>
    %754 = math.exp %753 : vector<1x128xf32>
    %cst_201 = arith.constant 1.000000e+00 : f32
    %755 = vector.broadcast %cst_201 : f32 to vector<1x128xf32>
    %756 = arith.addf %755, %754 : vector<1x128xf32>
    %757 = arith.divf %755, %756 : vector<1x128xf32>
    %758 = arith.select %613, %752, %757 : vector<1x128xi1>, vector<1x128xf32>
    %759 = vector.extract_strided_slice %758 {offsets = [0, 0], sizes = [1, 32], strides = [1, 1]} : vector<1x128xf32> to vector<1x32xf32>
    %760 = vector.extract_strided_slice %758 {offsets = [0, 32], sizes = [1, 32], strides = [1, 1]} : vector<1x128xf32> to vector<1x32xf32>
    %761 = vector.extract_strided_slice %758 {offsets = [0, 64], sizes = [1, 32], strides = [1, 1]} : vector<1x128xf32> to vector<1x32xf32>
    %762 = vector.extract_strided_slice %758 {offsets = [0, 96], sizes = [1, 32], strides = [1, 1]} : vector<1x128xf32> to vector<1x32xf32>
    %763 = arith.mulf %760, %743 : vector<1x32xf32>
    %764 = arith.mulf %759, %761 : vector<1x32xf32>
    %765 = arith.addf %763, %764 : vector<1x32xf32>
    %766 = math.tanh %765 : vector<1x32xf32>
    %767 = arith.mulf %762, %766 : vector<1x32xf32>
    %768 = arith.index_cast %c6_i32_198 : i32 to index
    %c0_202 = arith.constant 0 : index
    %769 = vector.load %arg14[%768, %c0_202] : memref<8x32xf32, #tpu.memory_space<vmem>>, vector<1x32xf32>
    tpu.vector_store %arg14[%768, %c0_202], %767 {strides = array<i32>} : memref<8x32xf32, #tpu.memory_space<vmem>>, vector<1x32xf32>,
    %c7_i32_203 = arith.constant 7 : i32
    %770 = arith.index_cast %c7_i32_203 : i32 to index
    %c0_204 = arith.constant 0 : index
    %771 = vector.load %arg21[%770, %c0_204] : memref<8x128xf32, #tpu.memory_space<vmem>>, vector<1x128xf32>
    %cst_205 = arith.constant dense<0.000000e+00> : vector<1x128xf32>
    %772 = tpu.matmul %767, %607, %cst_205 {dimension_numbers = #tpu.dot_dimension_numbers<[1], [0], [0], [1], [0, 0, 1, 1], [], []>} : vector<1x32xf32>, vector<32x128xf32>, vector<1x128xf32> -> vector<1x128xf32>
    %773 = arith.addf %771, %772 : vector<1x128xf32>
    %774 = math.tanh %773 : vector<1x128xf32>
    %775 = arith.negf %773 : vector<1x128xf32>
    %776 = math.exp %775 : vector<1x128xf32>
    %cst_206 = arith.constant 1.000000e+00 : f32
    %777 = vector.broadcast %cst_206 : f32 to vector<1x128xf32>
    %778 = arith.addf %777, %776 : vector<1x128xf32>
    %779 = arith.divf %777, %778 : vector<1x128xf32>
    %780 = arith.select %613, %774, %779 : vector<1x128xi1>, vector<1x128xf32>
    %781 = vector.extract_strided_slice %780 {offsets = [0, 0], sizes = [1, 32], strides = [1, 1]} : vector<1x128xf32> to vector<1x32xf32>
    %782 = vector.extract_strided_slice %780 {offsets = [0, 32], sizes = [1, 32], strides = [1, 1]} : vector<1x128xf32> to vector<1x32xf32>
    %783 = vector.extract_strided_slice %780 {offsets = [0, 64], sizes = [1, 32], strides = [1, 1]} : vector<1x128xf32> to vector<1x32xf32>
    %784 = vector.extract_strided_slice %780 {offsets = [0, 96], sizes = [1, 32], strides = [1, 1]} : vector<1x128xf32> to vector<1x32xf32>
    %785 = arith.mulf %782, %765 : vector<1x32xf32>
    %786 = arith.mulf %781, %783 : vector<1x32xf32>
    %787 = arith.addf %785, %786 : vector<1x32xf32>
    %788 = math.tanh %787 : vector<1x32xf32>
    %789 = arith.mulf %784, %788 : vector<1x32xf32>
    %790 = arith.index_cast %c7_i32_203 : i32 to index
    %c0_207 = arith.constant 0 : index
    %791 = vector.load %arg14[%790, %c0_207] : memref<8x32xf32, #tpu.memory_space<vmem>>, vector<1x32xf32>
    tpu.vector_store %arg14[%790, %c0_207], %789 {strides = array<i32>} : memref<8x32xf32, #tpu.memory_space<vmem>>, vector<1x32xf32>,
    %c8_i32_208 = arith.constant 8 : i32
    return
  }
  func.func @transform_0(%arg0: i32) -> (i32, i32) {
    %c0_i32 = arith.constant 0 : i32
    %c0_i32_0 = arith.constant 0 : i32
    %c0_i32_1 = arith.constant 0 : i32
    return %c0_i32, %c0_i32_0 : i32, i32
  }
  func.func @transform_1(%arg0: i32) -> (i32, i32) {
    %c0_i32 = arith.constant 0 : i32
    %c0_i32_0 = arith.constant 0 : i32
    %c0_i32_1 = arith.constant 0 : i32
    return %c0_i32, %c0_i32_0 : i32, i32
  }
  func.func @transform_2(%arg0: i32) -> (i32, i32) {
    %c0_i32 = arith.constant 0 : i32
    %c0_i32_0 = arith.constant 0 : i32
    %c0_i32_1 = arith.constant 0 : i32
    return %c0_i32, %c0_i32_0 : i32, i32
  }
  func.func @transform_3(%arg0: i32) -> (i32, i32) {
    %c0_i32 = arith.constant 0 : i32
    %c0_i32_0 = arith.constant 0 : i32
    %c0_i32_1 = arith.constant 0 : i32
    return %c0_i32, %c0_i32_0 : i32, i32
  }
  func.func @transform_4(%arg0: i32) -> (i32, i32) {
    %c0_i32 = arith.constant 0 : i32
    %c0_i32_0 = arith.constant 0 : i32
    %c0_i32_1 = arith.constant 0 : i32
    return %c0_i32, %c0_i32_0 : i32, i32
  }
  func.func @transform_5(%arg0: i32) -> (i32, i32) {
    %c0_i32 = arith.constant 0 : i32
    %c0_i32_0 = arith.constant 0 : i32
    %c0_i32_1 = arith.constant 0 : i32
    return %c0_i32, %c0_i32_0 : i32, i32
  }
  func.func @transform_6(%arg0: i32) -> (i32, i32) {
    %c0_i32 = arith.constant 0 : i32
    %c0_i32_0 = arith.constant 0 : i32
    %c0_i32_1 = arith.constant 0 : i32
    return %c0_i32, %c0_i32_0 : i32, i32
  }
  func.func @transform_7(%arg0: i32) -> (i32, i32) {
    %c0_i32 = arith.constant 0 : i32
    %c0_i32_0 = arith.constant 0 : i32
    %c0_i32_1 = arith.constant 0 : i32
    return %c0_i32, %c0_i32_0 : i32, i32
  }
  func.func @transform_8(%arg0: i32) -> (i32, i32) {
    %c0_i32 = arith.constant 0 : i32
    %c0_i32_0 = arith.constant 0 : i32
    %c0_i32_1 = arith.constant 0 : i32
    return %c0_i32, %c0_i32_0 : i32, i32
  }
  func.func @transform_9(%arg0: i32) -> (i32, i32) {
    %c0_i32 = arith.constant 0 : i32
    %c0_i32_0 = arith.constant 0 : i32
    %c0_i32_1 = arith.constant 0 : i32
    return %c0_i32, %c0_i32_0 : i32, i32
  }
  func.func @transform_10(%arg0: i32) -> (i32, i32) {
    %c0_i32 = arith.constant 0 : i32
    %c0_i32_0 = arith.constant 0 : i32
    %c0_i32_1 = arith.constant 0 : i32
    return %c0_i32, %c0_i32_0 : i32, i32
  }
  func.func @transform_11(%arg0: i32) -> (i32, i32) {
    %c0_i32 = arith.constant 0 : i32
    %c0_i32_0 = arith.constant 0 : i32
    %c0_i32_1 = arith.constant 0 : i32
    return %c0_i32, %c0_i32_0 : i32, i32
  }
  func.func @transform_12(%arg0: i32) -> (i32, i32) {
    %c0_i32 = arith.constant 0 : i32
    %c0_i32_0 = arith.constant 0 : i32
    %c0_i32_1 = arith.constant 0 : i32
    return %c0_i32, %c0_i32_0 : i32, i32
  }
  func.func @transform_13(%arg0: i32) -> (i32, i32) {
    %c0_i32 = arith.constant 0 : i32
    %c0_i32_0 = arith.constant 0 : i32
    %c0_i32_1 = arith.constant 0 : i32
    return %c0_i32, %c0_i32_0 : i32, i32
  }
}

</mosaic_0001>

<bundles_post_ra>
// kernel: lstm_ae_forward.1
= control target key start
LH: loop header
LB: loop body
LE: loop exit
PB: predicated region body
PF: predicated region fallthrough
CT: control target
= control target key end

     0   :  { %18 = vsyncpa [#allocation10], 0  ;;  %s3738_s0 = inlined_call_operand.vmem [shape: f32[8,16], index: 0, kind: input, shape index: {}]   ;;  %s3739_s1 = inlined_call_operand.hbm [shape: f32[16,128], index: 1, kind: input, shape index: {}]   ;;  %s3740_s2 = inlined_call_operand.hbm [shape: f32[32,128], index: 2, kind: input, shape index: {}]   ;;  %s3741_s3 = inlined_call_operand.vmem [shape: f32[1,128], index: 3, kind: input, shape index: {}]   ;;  %s3742_s4 = inlined_call_operand.hbm [shape: f32[32,32], index: 4, kind: input, shape index: {}]   ;;  %s3743_s5 = inlined_call_operand.hbm [shape: f32[8,32], index: 5, kind: input, shape index: {}]   ;;  %s3744_s6 = inlined_call_operand.vmem [shape: f32[1,32], index: 6, kind: input, shape index: {}]   ;;  %s3745_s7 = inlined_call_operand.hbm [shape: f32[8,128], index: 7, kind: input, shape index: {}]   ;;  %s3746_s8 = inlined_call_operand.hbm [shape: f32[32,128], index: 8, kind: input, shape index: {}]   ;;  %s3747_s9 = inlined_call_operand.vmem [shape: f32[1,128], index: 9, kind: input, shape index: {}]   ;;  %s3748_s10 = inlined_call_operand.hbm [shape: f32[32,128], index: 10, kind: input, shape index: {}]   ;;  %s3749_s11 = inlined_call_operand.hbm [shape: f32[32,128], index: 11, kind: input, shape index: {}]   ;;  %s3750_s12 = inlined_call_operand.hbm [shape: f32[1,128], index: 12, kind: input, shape index: {}]   ;;  %s3751_s13 = inlined_call_operand.hbm [shape: f32[8,32], index: 13, kind: output, shape index: {}]  }
   0x1   :  { %19 = vsyncpa [#allocation13], 0 }
   0x2   :  { %20 = vsyncpa [#allocation16], 0 }
   0x3   :  { %21 = vsyncpa [#allocation19], 0 }
   0x4   :  { %22 = vsyncpa [#allocation22], 0 }
   0x5   :  { %23 = vsyncpa [#allocation11], 0  ;;  %s43_s27 = sshll.u32 %s3740_s2, 4  ;;  %s3223_s28 = smov [#allocation12]   ;;  %s44_s27 = int_to_ptr.hbm [resolvable:$true] %s43_s27 }
   0x6   :  { %s45_s29 = sshll.u32 %s3223_s28, 4  ;;  %s72_s15 = sshll.u32 %s3743_s5, 4  ;;  %s46_s29 = int_to_ptr.vmem [resolvable:$true] %s45_s29  ;;  %s73_s15 = int_to_ptr.hbm [resolvable:$true] %s72_s15 }
   0x7   :  { %s3224_s16 = smov 128   ;;  %s3225_s17 = smov 8  }
   0x8   :  { %51 = dma.hbm_to_vmem [thread:$0]  %s44_s27, 512, %s46_s29, [#allocation13], %s3224_s16, %s3224_s16, %s3225_s17  }
   0x9   :  { %s3226_s18 = smov [#allocation15]   ;;  %s95_s2 = sshll.u32 %s3746_s8, 4  ;;  %s96_s2 = int_to_ptr.hbm [resolvable:$true] %s95_s2 }
   0xa   :  { %s74_s19 = sshll.u32 %s3226_s18, 4  ;;  %s123_s5 = sshll.u32 %s3749_s11, 4  ;;  %s75_s19 = int_to_ptr.vmem [resolvable:$true] %s74_s19  ;;  %s124_s5 = int_to_ptr.hbm [resolvable:$true] %s123_s5 }
   0xb   :  { %77 = dma.hbm_to_vmem [thread:$0]  %s73_s15, 128, %s75_s19, [#allocation16]  }
   0xc   :  { %s3227_s24 = smov [#allocation18]   ;;  %s3228_s26 = smov [#allocation21]  }
   0xd   :  { %s97_s25 = sshll.u32 %s3227_s24, 4  ;;  %s125_s27 = sshll.u32 %s3228_s26, 4  ;;  %s98_s25 = int_to_ptr.vmem [resolvable:$true] %s97_s25  ;;  %s126_s27 = int_to_ptr.vmem [resolvable:$true] %s125_s27 }
   0xe   :  { %103 = dma.hbm_to_vmem [thread:$0]  %s96_s2, 512, %s98_s25, [#allocation19], %s3224_s16, %s3224_s16, %s3225_s17  }
   0xf   :  { %s30_s8 = sshll.u32 %s3739_s1, 4  ;;  %s58_s14 = sshll.u32 %s3742_s4, 4  ;;  %s31_s8 = int_to_ptr.hbm [resolvable:$true] %s30_s8  ;;  %s59_s14 = int_to_ptr.hbm [resolvable:$true] %s58_s14 }
  0x10   :  { %131 = dma.hbm_to_vmem [thread:$0]  %s124_s5, 512, %s126_s27, [#allocation22], %s3224_s16, %s3224_s16, %s3225_s17  }
  0x11   :  { %s3229_s15 = smov [#allocation9]   ;;  %s3230_s19 = smov [#allocation14]  }
  0x12   :  { %s32_s18 = sshll.u32 %s3229_s15, 4  ;;  %s60_s1 = sshll.u32 %s3230_s19, 4  ;;  %s33_s18 = int_to_ptr.vmem [resolvable:$true] %s32_s18  ;;  %s61_s1 = int_to_ptr.vmem [resolvable:$true] %s60_s1 }
  0x13   :  { %38 = dma.hbm_to_vmem [thread:$0]  %s31_s8, 256, %s33_s18, [#allocation10], %s3224_s16, %s3224_s16, %s3225_s17  }
  0x14   :  { %s85_s2 = sshll.u32 %s3745_s7, 4  ;;  %s110_s23 = sshll.u32 %s3748_s10, 4  ;;  %s86_s2 = int_to_ptr.hbm [resolvable:$true] %s85_s2  ;;  %s111_s23 = int_to_ptr.hbm [resolvable:$true] %s110_s23 }
  0x15   :  { %66 = dma.hbm_to_vmem [thread:$0]  %s59_s14, 512, %s61_s1, [#allocation13], %s3224_s16, %s3224_s16, %s3225_s17  }
  0x16   :  { %s3231_s5 = smov [#allocation17]   ;;  %s3232_s25 = smov [#allocation20]  }
  0x17   :  { %s87_s24 = sshll.u32 %s3231_s5, 4  ;;  %s112_s26 = sshll.u32 %s3232_s25, 4  ;;  %s88_s24 = int_to_ptr.vmem [resolvable:$true] %s87_s24  ;;  %s113_s26 = int_to_ptr.vmem [resolvable:$true] %s112_s26 }
  0x18   :  { %90 = dma.hbm_to_vmem [thread:$0]  %s86_s2, 128, %s88_s24, [#allocation16]  }
  0x19   :  { %s137_s7 = sshll.u32 %s3750_s12, 4  ;;  %s3233_s29 = smov [#allocation23]   ;;  %s138_s7 = int_to_ptr.hbm [resolvable:$true] %s137_s7 }
  0x1a   :  { %118 = dma.hbm_to_vmem [thread:$0]  %s111_s23, 512, %s113_s26, [#allocation19], %s3224_s16, %s3224_s16, %s3225_s17  }
  0x1b   :  { %s139_s8 = sshll.u32 %s3233_s29, 4  ;;  %s140_s8 = int_to_ptr.vmem [resolvable:$true] %s139_s8 }
  0x1c   :  { %142 = dma.hbm_to_vmem [thread:$0]  %s138_s7, 16, %s140_s8, [#allocation22]  }
  0x1d   :  { %3211 = dma.done.wait [#allocation10], 256  }
  0x1e   :  { %3212 = vsyncadd [#allocation10], 4294967040 }
  0x1f   :  { %3213 = dma.done.wait [#allocation13], 1024  }
  0x20   :  { %3214 = vsyncadd [#allocation13], 4294966272 }
  0x21   :  { %3215 = dma.done.wait [#allocation16], 256  }
  0x22   :  { %3216 = vsyncadd [#allocation16], 4294967040 }
  0x23   :  { %3217 = dma.done.wait [#allocation19], 1024  }
  0x24   :  { %3218 = vsyncadd [#allocation19], 4294966272 }
  0x25   :  { %3219 = dma.done.wait [#allocation22], 528  }
  0x26   :  { %3220 = vsyncadd [#allocation22], 4294966768  ;;  %v181_v0 = vld [vmem:[#allocation9 + $0x8] sm:$0xff]  ;;  %v180_v1 = vld [vmem:[#allocation9] sm:$0xff]  ;;  %vm186_vm0 = vcmask 130048   ;;  %v3234_v7 = vmov 0.0   ;;  %v215_v17 = vlaneseq }
  0x27   :  { %204 = vmatpush.msra.mxu0 %v181_v0  ;;  %v179_v2 = vld [vmem:[%s3738_s0] sm:$0xff]  ;;  %v213_v4 = vld [vmem:[#allocation12 + $0x10] sm:$0xff]  ;;  %v212_v5 = vld [vmem:[#allocation12 + $0x8] sm:$0xff]  ;;  %s3236_s11 = smov 32   ;;  %vm221_vm8 = vcmask 261120   ;;  %s3238_s15 = smov 16  }
  0x28   :  { %v214_v3 = vld [vmem:[#allocation12 + $0x18] sm:$0xff]  ;;  %v211_v6 = vld [vmem:[#allocation12] sm:$0xff]  ;;  %v3363_v19 = vand.u32 127, %v215_v17  ;;  %s3239_s18 = smov 104   ;;  %s2567_s2 = sshll.u32 %s3751_s13, 4  ;;  %s2568_s2 = int_to_ptr.hbm [resolvable:$true] %s2567_s2 }
  0x29   :  { %237 = vmatpush.msra.mxu1 %v214_v3  ;;  %309 = vmatpush.msra.mxu2 %v214_v3  ;;  %v2663_v8 = vld [vmem:[%s3741_s3] ss:$0 sm:$0xff]  ;;  %s3235_s3 = smov 64  }
  0x2a   :  { %205 = vmatpush.msra.mxu0 %v180_v1  ;;  %380 = vmatpush.msra.mxu3 %v214_v3  ;;  %vm217_vm1 = vcmp.ge.s32.totalorder %v3363_v19, 64  ;;  %vm218_vm2 = vcmp.lt.s32.totalorder %v3363_v19, 96 }
  0x2b   :  { %2581 = vmatmul.msk.f32.vlgmr.msra.gmra.mxu0 %vm186_vm0, %v179_v2  ;;  %238 = vmatpush.msra.mxu1 %v213_v4  ;;  %vm3367_vm4 = vmand %vm217_vm1, %vm218_vm2 }
  0x2c   :  { %310 = vmatpush.msra.mxu2 %v213_v4  ;;  %381 = vmatpush.msra.mxu3 %v213_v4 }
  0x2d   :  { %239 = vmatpush.msra.mxu1 %v212_v5  ;;  %451 = vmatpush.msrb.mxu0 %v214_v3 }
  0x2e   :  { %311 = vmatpush.msra.mxu2 %v212_v5  ;;  %382 = vmatpush.msra.mxu3 %v212_v5 }
  0x2f   :  { %240 = vmatpush.msra.mxu1 %v211_v6  ;;  %452 = vmatpush.msrb.mxu0 %v213_v4 }
  0x30   :  { %241 = vmatmul.f32.vlgmr.msra.gmra.mxu1 %v3234_v7  ;;  %312 = vmatpush.msra.mxu2 %v211_v6 }
  0x31   :  { %383 = vmatpush.msra.mxu3 %v211_v6  ;;  %453 = vmatpush.msrb.mxu0 %v212_v5 }
  0x32   :  { %522 = vmatpush.msrb.mxu1 %v214_v3  ;;  %593 = vmatpush.msrb.mxu2 %v214_v3 }
  0x33   :  { %454 = vmatpush.msrb.mxu0 %v211_v6  ;;  %664 = vmatpush.msrb.mxu3 %v214_v3 }
  0x34   :  { %523 = vmatpush.msrb.mxu1 %v213_v4  ;;  %594 = vmatpush.msrb.mxu2 %v213_v4 }
  0x35   :  { %665 = vmatpush.msrb.mxu3 %v213_v4  ;;  %735 = vmatpush.msra.mxu0 %v214_v3 }
  0x36   :  { %524 = vmatpush.msrb.mxu1 %v212_v5  ;;  %595 = vmatpush.msrb.mxu2 %v212_v5 }
  0x37   :  { %666 = vmatpush.msrb.mxu3 %v212_v5  ;;  %736 = vmatpush.msra.mxu0 %v213_v4 }
  0x38   :  { %525 = vmatpush.msrb.mxu1 %v211_v6  ;;  %596 = vmatpush.msrb.mxu2 %v211_v6 }
  0x39   :  { %667 = vmatpush.msrb.mxu3 %v211_v6  ;;  %737 = vmatpush.msra.mxu0 %v212_v5 }
  0x3b   :  { %738 = vmatpush.msra.mxu0 %v211_v6 }
  0xa8   :  { %v207_v9 = vpop.f32.mrf.mxu0 }
  0xa9   :  { %v208_v10 = vadd.f32 %v2663_v8, %v207_v9 }
  0xab   :  { %210 = vst [vmem:[#allocation5] sm:$0xff] %v208_v10 }
  0xad   :  { %v242_v11 = vpop.f32.mrf.mxu1 }
  0xb2   :  { %v220_v12 = vld [vmem:[#allocation5] sm:$0x1]  ;;  %v291_v41 = vld [vmem:[#allocation5 + $0x1] sm:$0x1]  ;;  %v362_v4 = vld [vmem:[#allocation5 + $0x2] sm:$0x1] }
  0xb3   :  { %v245_v13 = vadd.f32 %v242_v11, %v220_v12 }
  0xb5   :  { %v2582_v14 = vmul.f32 -1.442695, %v245_v13 }
  0xb7   :  { %2667 = vpow2.f32 %v2582_v14 }
  0xbd   :  { %v2668_v15 = vpop.eup %2667 }
  0xbe   :  { %v250_v16 = vadd.f32 1.0, %v2668_v15 }
  0xc0   :  { %2669 = vrcp.f32 %v250_v16  ;;  %v262_v22 = vand.u32 2147483648, %v250_v16  ;;  %v260_v24 = vand.u32 2147483647, %v250_v16  ;;  %vm256_vm5 = vweird.f32 %v250_v16 }
  0xc1   :  { %2671 = vtanh.f32 %v245_v13 }
  0xc2   :  { %v263_v27 = vor.u32 1.1754944e-38, %v262_v22  ;;  %vm261_vm7 = vcmp.eq.f32.partialorder %v260_v24, 8.507059e+37 }
  0xc6   :  { %v2670_v18 = vpop.eup %2669 }
  0xc7   :  { %v252_v20 = vmul.f32 %v2670_v18, %v250_v16  ;;  %vm257_vm3 = vweird.f32 %v2670_v18  ;;  %v2672_v29 = vpop.eup %2671 }
  0xc8   :  { %vm258_vm6 = vmor %vm256_vm5, %vm257_vm3 }
  0xc9   :  { %v253_v21 = vsub.f32 1.0, %v252_v20 }
  0xcb   :  { %v254_v23 = vmul.f32 %v2670_v18, %v253_v21 }
  0xcd   :  { %v255_v26 = vadd.f32 %v2670_v18, %v254_v23 }
  0xcf   :  { %v259_v28 = vsel %vm258_vm6, %v2670_v18, %v255_v26 }
  0xd0   :  { %v264_v30 = vsel %vm261_vm7, %v263_v27, %v259_v28 }
  0xd1   :  { %v266_v31 = vsel %vm3367_vm4, %v2672_v29, %v264_v30 }
  0xd2   :  { %269 = vrot.lane.b32.xlu0 %v266_v31, %s3235_s3  ;;  %v267_v34 = vmul.f32 0.0, %v266_v31 }
 0x144   :  { %v270_v32 = vpop.permute.xlu0 %269 }
 0x145   :  { %v272_v33 = vmul.f32 %v270_v32, %v266_v31 }
 0x147   :  { %274 = vrot.lane.b32.xlu0 %v272_v33, %s3236_s11 }
 0x1b9   :  { %v275_v35 = vpop.permute.xlu0 %274 }
 0x1ba   :  { %v277_v36 = vadd.f32 %v275_v35, %v267_v34  ;;  %v433_v34 = vld [vmem:[#allocation5 + $0x3] sm:$0x1] }
 0x1bc   :  { %2673 = vtanh.f32 %v277_v36 }
 0x1c2   :  { %v2674_v37 = vpop.eup %2673 }
 0x1c3   :  { %280 = vrot.lane.b32.xlu1 %v2674_v37, %s3235_s3 }
 0x235   :  { %v281_v38 = vpop.permute.xlu1 %280 }
 0x236   :  { %v3376_v39 = vmul.f32 %v281_v38, %v266_v31 }
 0x238   :  { %293 = vrot.lane.b32.xlu1 %v3376_v39, %s3236_s11 }
 0x2aa   :  { %v294_v40 = vpop.permute.xlu1 %293 }
 0x2ab   :  { %2583 = vmatmul.msk.f32.vlgmr.msra.gmra.mxu2 %vm221_vm8, %v294_v40 }
 0x32e   :  { %v314_v42 = vpop.f32.mrf.mxu2 }
 0x32f   :  { %v317_v43 = vadd.f32 %v314_v42, %v291_v41 }
 0x331   :  { %v2584_v44 = vmul.f32 -1.442695, %v317_v43 }
 0x333   :  { %2675 = vpow2.f32 %v2584_v44 }
 0x339   :  { %v2676_v45 = vpop.eup %2675 }
 0x33a   :  { %v322_v46 = vadd.f32 1.0, %v2676_v45 }
 0x33c   :  { %2677 = vrcp.f32 %v322_v46  ;;  %v334_v50 = vand.u32 2147483648, %v322_v46  ;;  %v332_v52 = vand.u32 2147483647, %v322_v46  ;;  %vm328_vm10 = vweird.f32 %v322_v46 }
 0x33d   :  { %2679 = vtanh.f32 %v317_v43 }
 0x33e   :  { %v335_v54 = vor.u32 1.1754944e-38, %v334_v50  ;;  %vm333_vm12 = vcmp.eq.f32.partialorder %v332_v52, 8.507059e+37 }
 0x342   :  { %v2678_v47 = vpop.eup %2677 }
 0x343   :  { %v324_v48 = vmul.f32 %v2678_v47, %v322_v46  ;;  %vm329_vm9 = vweird.f32 %v2678_v47  ;;  %v2680_v56 = vpop.eup %2679 }
 0x344   :  { %vm330_vm11 = vmor %vm328_vm10, %vm329_vm9 }
 0x345   :  { %v325_v49 = vsub.f32 1.0, %v324_v48 }
 0x347   :  { %v326_v51 = vmul.f32 %v2678_v47, %v325_v49 }
 0x349   :  { %v327_v53 = vadd.f32 %v2678_v47, %v326_v51 }
 0x34b   :  { %v331_v55 = vsel %vm330_vm11, %v2678_v47, %v327_v53 }
 0x34c   :  { %v336_v57 = vsel %vm333_vm12, %v335_v54, %v331_v55 }
 0x34d   :  { %v338_v58 = vsel %vm3367_vm4, %v2680_v56, %v336_v57 }
 0x34e   :  { %341 = vrot.lane.b32.xlu2 %v338_v58, %s3235_s3  ;;  %v339_v61 = vmul.f32 %v338_v58, %v277_v36 }
 0x3a8   :  { %v342_v59 = vpop.permute.xlu2 %341 }
 0x3a9   :  { %v344_v60 = vmul.f32 %v342_v59, %v338_v58 }
 0x3ab   :  { %346 = vrot.lane.b32.xlu2 %v344_v60, %s3236_s11 }
 0x405   :  { %v347_v62 = vpop.permute.xlu2 %346 }
 0x406   :  { %v349_v63 = vadd.f32 %v347_v62, %v339_v61  ;;  %v504_v62 = vld [vmem:[#allocation5 + $0x4] sm:$0x1] }
 0x408   :  { %2681 = vtanh.f32 %v349_v63 }
 0x40e   :  { %v2682_v0 = vpop.eup %2681 }
 0x40f   :  { %352 = vrot.lane.b32.xlu0 %v2682_v0, %s3235_s3 }
 0x481   :  { %v353_v1 = vpop.permute.xlu0 %352 }
 0x482   :  { %v3386_v2 = vmul.f32 %v353_v1, %v338_v58 }
 0x484   :  { %364 = vrot.lane.b32.xlu1 %v3386_v2, %s3236_s11 }
 0x4f6   :  { %v365_v3 = vpop.permute.xlu1 %364 }
 0x4f7   :  { %2585 = vmatmul.msk.f32.vlgmr.msra.gmra.mxu3 %vm221_vm8, %v365_v3 }
 0x57a   :  { %v385_v5 = vpop.f32.mrf.mxu3 }
 0x57b   :  { %v388_v6 = vadd.f32 %v385_v5, %v362_v4 }
 0x57d   :  { %v2586_v8 = vmul.f32 -1.442695, %v388_v6 }
 0x57f   :  { %2683 = vpow2.f32 %v2586_v8 }
 0x585   :  { %v2684_v9 = vpop.eup %2683 }
 0x586   :  { %v393_v10 = vadd.f32 1.0, %v2684_v9 }
 0x588   :  { %2685 = vrcp.f32 %v393_v10  ;;  %v405_v14 = vand.u32 2147483648, %v393_v10  ;;  %v403_v16 = vand.u32 2147483647, %v393_v10  ;;  %vm399_vm14 = vweird.f32 %v393_v10 }
 0x589   :  { %2687 = vtanh.f32 %v388_v6 }
 0x58a   :  { %v406_v18 = vor.u32 1.1754944e-38, %v405_v14  ;;  %vm404_vm0 = vcmp.eq.f32.partialorder %v403_v16, 8.507059e+37 }
 0x58e   :  { %v2686_v11 = vpop.eup %2685 }
 0x58f   :  { %v395_v12 = vmul.f32 %v2686_v11, %v393_v10  ;;  %vm400_vm13 = vweird.f32 %v2686_v11  ;;  %v2688_v21 = vpop.eup %2687 }
 0x590   :  { %vm401_vm15 = vmor %vm399_vm14, %vm400_vm13 }
 0x591   :  { %v396_v13 = vsub.f32 1.0, %v395_v12 }
 0x593   :  { %v397_v15 = vmul.f32 %v2686_v11, %v396_v13 }
 0x595   :  { %v398_v17 = vadd.f32 %v2686_v11, %v397_v15 }
 0x597   :  { %v402_v20 = vsel %vm401_vm15, %v2686_v11, %v398_v17 }
 0x598   :  { %v407_v22 = vsel %vm404_vm0, %v406_v18, %v402_v20 }
 0x599   :  { %v409_v23 = vsel %vm3367_vm4, %v2688_v21, %v407_v22 }
 0x59a   :  { %412 = vrot.lane.b32.xlu2 %v409_v23, %s3235_s3  ;;  %v410_v27 = vmul.f32 %v409_v23, %v349_v63 }
 0x5f4   :  { %v413_v24 = vpop.permute.xlu2 %412 }
 0x5f5   :  { %v415_v26 = vmul.f32 %v413_v24, %v409_v23 }
 0x5f7   :  { %417 = vrot.lane.b32.xlu0 %v415_v26, %s3236_s11 }
 0x669   :  { %v418_v28 = vpop.permute.xlu0 %417 }
 0x66a   :  { %v420_v29 = vadd.f32 %v418_v28, %v410_v27 }
 0x66c   :  { %2689 = vtanh.f32 %v420_v29 }
 0x672   :  { %v2690_v30 = vpop.eup %2689 }
 0x673   :  { %423 = vrot.lane.b32.xlu1 %v2690_v30, %s3235_s3 }
 0x6e5   :  { %v424_v31 = vpop.permute.xlu1 %423 }
 0x6e6   :  { %v3396_v32 = vmul.f32 %v424_v31, %v409_v23 }
 0x6e8   :  { %435 = vrot.lane.b32.xlu2 %v3396_v32, %s3236_s11 }
 0x742   :  { %v436_v33 = vpop.permute.xlu2 %435 }
 0x743   :  { %2587 = vmatmul.msk.f32.vlgmr.msrb.gmra.mxu0 %vm221_vm8, %v436_v33 }
 0x7c0   :  { %v456_v35 = vpop.f32.mrf.mxu0 }
 0x7c1   :  { %v459_v36 = vadd.f32 %v456_v35, %v433_v34 }
 0x7c3   :  { %v2588_v37 = vmul.f32 -1.442695, %v459_v36 }
 0x7c5   :  { %2691 = vpow2.f32 %v2588_v37 }
 0x7cb   :  { %v2692_v38 = vpop.eup %2691 }
 0x7cc   :  { %v464_v40 = vadd.f32 1.0, %v2692_v38 }
 0x7ce   :  { %2693 = vrcp.f32 %v464_v40  ;;  %v476_v44 = vand.u32 2147483648, %v464_v40  ;;  %v474_v46 = vand.u32 2147483647, %v464_v40  ;;  %vm470_vm2 = vweird.f32 %v464_v40 }
 0x7cf   :  { %2695 = vtanh.f32 %v459_v36 }
 0x7d0   :  { %v477_v48 = vor.u32 1.1754944e-38, %v476_v44  ;;  %vm475_vm5 = vcmp.eq.f32.partialorder %v474_v46, 8.507059e+37 }
 0x7d4   :  { %v2694_v41 = vpop.eup %2693 }
 0x7d5   :  { %v466_v42 = vmul.f32 %v2694_v41, %v464_v40  ;;  %vm471_vm1 = vweird.f32 %v2694_v41  ;;  %v2696_v50 = vpop.eup %2695 }
 0x7d6   :  { %vm472_vm3 = vmor %vm470_vm2, %vm471_vm1 }
 0x7d7   :  { %v467_v43 = vsub.f32 1.0, %v466_v42 }
 0x7d9   :  { %v468_v45 = vmul.f32 %v2694_v41, %v467_v43 }
 0x7db   :  { %v469_v47 = vadd.f32 %v2694_v41, %v468_v45 }
 0x7dd   :  { %v473_v49 = vsel %vm472_vm3, %v2694_v41, %v469_v47 }
 0x7de   :  { %v478_v51 = vsel %vm475_vm5, %v477_v48, %v473_v49 }
 0x7df   :  { %v480_v52 = vsel %vm3367_vm4, %v2696_v50, %v478_v51 }
 0x7e0   :  { %483 = vrot.lane.b32.xlu0 %v480_v52, %s3235_s3  ;;  %v481_v55 = vmul.f32 %v480_v52, %v420_v29  ;;  %v575_v29 = vld [vmem:[#allocation5 + $0x5] sm:$0x1] }
 0x852   :  { %v484_v53 = vpop.permute.xlu0 %483 }
 0x853   :  { %v486_v54 = vmul.f32 %v484_v53, %v480_v52 }
 0x855   :  { %488 = vrot.lane.b32.xlu1 %v486_v54, %s3236_s11 }
 0x8c7   :  { %v489_v56 = vpop.permute.xlu1 %488 }
 0x8c8   :  { %v491_v57 = vadd.f32 %v489_v56, %v481_v55 }
 0x8ca   :  { %2697 = vtanh.f32 %v491_v57 }
 0x8d0   :  { %v2698_v58 = vpop.eup %2697 }
 0x8d1   :  { %494 = vrot.lane.b32.xlu2 %v2698_v58, %s3235_s3  ;;  %v646_v58 = vld [vmem:[#allocation5 + $0x6] sm:$0x1] }
 0x92b   :  { %v495_v59 = vpop.permute.xlu2 %494 }
 0x92c   :  { %v3406_v60 = vmul.f32 %v495_v59, %v480_v52 }
 0x92e   :  { %506 = vrot.lane.b32.xlu0 %v3406_v60, %s3236_s11 }
 0x9a0   :  { %v507_v61 = vpop.permute.xlu0 %506 }
 0x9a1   :  { %2589 = vmatmul.msk.f32.vlgmr.msrb.gmra.mxu1 %vm221_vm8, %v507_v61 }
 0xa1e   :  { %v527_v63 = vpop.f32.mrf.mxu1 }
 0xa1f   :  { %v530_v0 = vadd.f32 %v527_v63, %v504_v62 }
 0xa21   :  { %v2590_v1 = vmul.f32 -1.442695, %v530_v0 }
 0xa23   :  { %2699 = vpow2.f32 %v2590_v1 }
 0xa29   :  { %v2700_v3 = vpop.eup %2699 }
 0xa2a   :  { %v535_v4 = vadd.f32 1.0, %v2700_v3 }
 0xa2c   :  { %2701 = vrcp.f32 %v535_v4  ;;  %v547_v9 = vand.u32 2147483648, %v535_v4  ;;  %v545_v11 = vand.u32 2147483647, %v535_v4  ;;  %vm541_vm7 = vweird.f32 %v535_v4 }
 0xa2d   :  { %2703 = vtanh.f32 %v530_v0 }
 0xa2e   :  { %v548_v13 = vor.u32 1.1754944e-38, %v547_v9  ;;  %vm546_vm10 = vcmp.eq.f32.partialorder %v545_v11, 8.507059e+37 }
 0xa32   :  { %v2702_v5 = vpop.eup %2701 }
 0xa33   :  { %v537_v6 = vmul.f32 %v2702_v5, %v535_v4  ;;  %vm542_vm6 = vweird.f32 %v2702_v5  ;;  %v2704_v15 = vpop.eup %2703 }
 0xa34   :  { %vm543_vm9 = vmor %vm541_vm7, %vm542_vm6 }
 0xa35   :  { %v538_v8 = vsub.f32 1.0, %v537_v6 }
 0xa37   :  { %v539_v10 = vmul.f32 %v2702_v5, %v538_v8 }
 0xa39   :  { %v540_v12 = vadd.f32 %v2702_v5, %v539_v10 }
 0xa3b   :  { %v544_v14 = vsel %vm543_vm9, %v2702_v5, %v540_v12  ;;  %vm289_vm9 = vcmask 253952  }
 0xa3c   :  { %v549_v16 = vsel %vm546_vm10, %v548_v13, %v544_v14  ;;  %vm822_vm10 = vcmp.ge.s32.totalorder %v3363_v19, 16 }
 0xa3d   :  { %v551_v17 = vsel %vm3367_vm4, %v2704_v15, %v549_v16 }
 0xa3e   :  { %554 = vrot.lane.b32.xlu1 %v551_v17, %s3235_s3  ;;  %v552_v21 = vmul.f32 %v551_v17, %v491_v57 }
 0xab0   :  { %v555_v18 = vpop.permute.xlu1 %554 }
 0xab1   :  { %v557_v20 = vmul.f32 %v555_v18, %v551_v17 }
 0xab3   :  { %559 = vrot.lane.b32.xlu2 %v557_v20, %s3236_s11 }
 0xb0d   :  { %v560_v22 = vpop.permute.xlu2 %559 }
 0xb0e   :  { %v562_v23 = vadd.f32 %v560_v22, %v552_v21 }
 0xb10   :  { %2705 = vtanh.f32 %v562_v23 }
 0xb16   :  { %v2706_v24 = vpop.eup %2705 }
 0xb17   :  { %565 = vrot.lane.b32.xlu0 %v2706_v24, %s3235_s3 }
 0xb89   :  { %v566_v26 = vpop.permute.xlu0 %565 }
 0xb8a   :  { %v3416_v27 = vmul.f32 %v566_v26, %v551_v17  ;;  %v717_v26 = vld [vmem:[#allocation5 + $0x7] sm:$0x1] }
 0xb8c   :  { %577 = vrot.lane.b32.xlu1 %v3416_v27, %s3236_s11 }
 0xbfe   :  { %v578_v28 = vpop.permute.xlu1 %577 }
 0xbff   :  { %2591 = vmatmul.msk.f32.vlgmr.msrb.gmra.mxu2 %vm221_vm8, %v578_v28 }
 0xc82   :  { %v598_v30 = vpop.f32.mrf.mxu2 }
 0xc83   :  { %v601_v31 = vadd.f32 %v598_v30, %v575_v29 }
 0xc85   :  { %v2592_v33 = vmul.f32 -1.442695, %v601_v31 }
 0xc87   :  { %2707 = vpow2.f32 %v2592_v33 }
 0xc8d   :  { %v2708_v34 = vpop.eup %2707 }
 0xc8e   :  { %v606_v35 = vadd.f32 1.0, %v2708_v34 }
 0xc90   :  { %2709 = vrcp.f32 %v606_v35  ;;  %v618_v40 = vand.u32 2147483648, %v606_v35  ;;  %v616_v42 = vand.u32 2147483647, %v606_v35  ;;  %vm612_vm12 = vweird.f32 %v606_v35 }
 0xc91   :  { %2711 = vtanh.f32 %v601_v31 }
 0xc92   :  { %v619_v44 = vor.u32 1.1754944e-38, %v618_v40  ;;  %vm617_vm14 = vcmp.eq.f32.partialorder %v616_v42, 8.507059e+37 }
 0xc96   :  { %v2710_v36 = vpop.eup %2709 }
 0xc97   :  { %v608_v37 = vmul.f32 %v2710_v36, %v606_v35  ;;  %vm613_vm11 = vweird.f32 %v2710_v36  ;;  %v2712_v46 = vpop.eup %2711 }
 0xc98   :  { %vm614_vm13 = vmor %vm612_vm12, %vm613_vm11  ;;  %vm823_vm11 = vcmp.lt.s32.totalorder %v3363_v19, 24 }
 0xc99   :  { %v609_v38 = vsub.f32 1.0, %v608_v37 }
 0xc9b   :  { %v610_v41 = vmul.f32 %v2710_v36, %v609_v38 }
 0xc9d   :  { %v611_v43 = vadd.f32 %v2710_v36, %v610_v41 }
 0xc9f   :  { %v615_v45 = vsel %vm614_vm13, %v2710_v36, %v611_v43  ;;  %vm3473_vm13 = vmand %vm822_vm10, %vm823_vm11 }
 0xca0   :  { %v620_v47 = vsel %vm617_vm14, %v619_v44, %v615_v45 }
 0xca1   :  { %v622_v48 = vsel %vm3367_vm4, %v2712_v46, %v620_v47 }
 0xca2   :  { %625 = vrot.lane.b32.xlu2 %v622_v48, %s3235_s3  ;;  %v623_v51 = vmul.f32 %v622_v48, %v562_v23 }
 0xcfc   :  { %v626_v49 = vpop.permute.xlu2 %625 }
 0xcfd   :  { %v628_v50 = vmul.f32 %v626_v49, %v622_v48 }
 0xcff   :  { %630 = vrot.lane.b32.xlu0 %v628_v50, %s3236_s11 }
 0xd71   :  { %v631_v52 = vpop.permute.xlu0 %630 }
 0xd72   :  { %v633_v53 = vadd.f32 %v631_v52, %v623_v51 }
 0xd74   :  { %2713 = vtanh.f32 %v633_v53 }
 0xd7a   :  { %v2714_v54 = vpop.eup %2713 }
 0xd7b   :  { %636 = vrot.lane.b32.xlu1 %v2714_v54, %s3235_s3 }
 0xded   :  { %v637_v55 = vpop.permute.xlu1 %636 }
 0xdee   :  { %v3426_v56 = vmul.f32 %v637_v55, %v622_v48 }
 0xdf0   :  { %648 = vrot.lane.b32.xlu2 %v3426_v56, %s3236_s11 }
 0xe4a   :  { %v649_v57 = vpop.permute.xlu2 %648 }
 0xe4b   :  { %2593 = vmatmul.msk.f32.vlgmr.msrb.gmra.mxu3 %vm221_vm8, %v649_v57 }
 0xece   :  { %v669_v59 = vpop.f32.mrf.mxu3 }
 0xecf   :  { %v672_v61 = vadd.f32 %v669_v59, %v646_v58 }
 0xed1   :  { %v2594_v62 = vmul.f32 -1.442695, %v672_v61 }
 0xed3   :  { %2715 = vpow2.f32 %v2594_v62 }
 0xed9   :  { %v2716_v63 = vpop.eup %2715 }
 0xeda   :  { %v677_v0 = vadd.f32 1.0, %v2716_v63 }
 0xedc   :  { %2717 = vrcp.f32 %v677_v0  ;;  %v689_v5 = vand.u32 2147483648, %v677_v0  ;;  %v687_v8 = vand.u32 2147483647, %v677_v0  ;;  %vm683_vm0 = vweird.f32 %v677_v0 }
 0xedd   :  { %2719 = vtanh.f32 %v672_v61 }
 0xede   :  { %v690_v10 = vor.u32 1.1754944e-38, %v689_v5  ;;  %vm688_vm2 = vcmp.eq.f32.partialorder %v687_v8, 8.507059e+37  ;;  %v791_v5 = vld [vmem:[#allocation14 + $0x10] sm:$0xff]  ;;  %v789_v8 = vld [vmem:[#allocation14] sm:$0xff] }
 0xee2   :  { %v2718_v1 = vpop.eup %2717 }
 0xee3   :  { %v679_v3 = vmul.f32 %v2718_v1, %v677_v0  ;;  %vm684_vm15 = vweird.f32 %v2718_v1  ;;  %v2720_v12 = vpop.eup %2719 }
 0xee4   :  { %vm685_vm1 = vmor %vm683_vm0, %vm684_vm15 }
 0xee5   :  { %v680_v4 = vsub.f32 1.0, %v679_v3 }
 0xee7   :  { %v681_v6 = vmul.f32 %v2718_v1, %v680_v4  ;;  %v792_v4 = vld [vmem:[#allocation14 + $0x18] sm:$0xff] }
 0xee8   :  { %812 = vmatpush.msra.mxu1 %v792_v4 }
 0xee9   :  { %v682_v9 = vadd.f32 %v2718_v1, %v681_v6  ;;  %v821_v6 = vld [vmem:[#allocation15] sm:$0xff] }
 0xeea   :  { %844 = vmatpush.msra.mxu2 %v821_v6  ;;  %916 = vmatpush.msra.mxu3 %v821_v6 }
 0xeeb   :  { %v686_v11 = vsel %vm685_vm1, %v2718_v1, %v682_v9  ;;  %813 = vmatpush.msra.mxu1 %v791_v5  ;;  %845 = vmatmul.f32.vlgmr.msra.gmra.mxu2 %v3234_v7  ;;  %vm826_vm1 = vcmask 64512  }
 0xeec   :  { %v691_v13 = vsel %vm688_vm2, %v690_v10, %v686_v11  ;;  %987 = vmatpush.msrb.mxu0 %v821_v6  ;;  %1129 = vmatpush.msrb.mxu2 %v821_v6  ;;  %v2664_v11 = vld [vmem:[%s3744_s6] ss:$0 sm:$0xff]  ;;  %s3237_s6 = smov 112  }
 0xeed   :  { %v693_v14 = vsel %vm3367_vm4, %v2720_v12, %v691_v13  ;;  %1200 = vmatpush.msrb.mxu3 %v821_v6 }
 0xeee   :  { %696 = vrot.lane.b32.xlu0 %v693_v14, %s3235_s3  ;;  %v694_v17 = vmul.f32 %v693_v14, %v633_v53 }
 0xf60   :  { %v697_v15 = vpop.permute.xlu0 %696 }
 0xf61   :  { %v699_v16 = vmul.f32 %v697_v15, %v693_v14 }
 0xf63   :  { %701 = vrot.lane.b32.xlu1 %v699_v16, %s3236_s11 }
 0xfd5   :  { %v702_v18 = vpop.permute.xlu1 %701 }
 0xfd6   :  { %v704_v20 = vadd.f32 %v702_v18, %v694_v17 }
 0xfd8   :  { %2721 = vtanh.f32 %v704_v20 }
 0xfde   :  { %v2722_v21 = vpop.eup %2721 }
 0xfdf   :  { %707 = vrot.lane.b32.xlu2 %v2722_v21, %s3235_s3 }
0x1039   :  { %v708_v22 = vpop.permute.xlu2 %707 }
0x103a   :  { %v710_v23 = vmul.f32 %v708_v22, %v693_v14  ;;  %v846_v14 = vpop.f32.mrf.mxu2 }
0x103c   :  { %719 = vrot.lane.b32.xlu0 %v710_v23, %s3236_s11 }
0x10ae   :  { %v720_v24 = vpop.permute.xlu0 %719 }
0x10af   :  { %2595 = vmatmul.msk.f32.vlgmr.msra.gmra.mxu0 %vm221_vm8, %v720_v24 }
0x10b0   :  { %1271 = vmatpush.msra.mxu0 %v821_v6 }
0x112c   :  { %v740_v28 = vpop.f32.mrf.mxu0 }
0x112d   :  { %v743_v29 = vadd.f32 %v740_v28, %v717_v26 }
0x112f   :  { %v2596_v30 = vmul.f32 -1.442695, %v743_v29 }
0x1131   :  { %2723 = vpow2.f32 %v2596_v30 }
0x1137   :  { %v2724_v31 = vpop.eup %2723 }
0x1138   :  { %v748_v33 = vadd.f32 1.0, %v2724_v31 }
0x113a   :  { %2725 = vrcp.f32 %v748_v33  ;;  %v760_v37 = vand.u32 2147483648, %v748_v33  ;;  %v758_v40 = vand.u32 2147483647, %v748_v33  ;;  %vm754_vm5 = vweird.f32 %v748_v33 }
0x113b   :  { %2727 = vtanh.f32 %v743_v29 }
0x113c   :  { %v761_v42 = vor.u32 1.1754944e-38, %v760_v37  ;;  %vm759_vm7 = vcmp.eq.f32.partialorder %v758_v40, 8.507059e+37  ;;  %2729 = vtanh.f32 %v3376_v39 }
0x113d   :  { %2731 = vtanh.f32 %v3406_v60 }
0x113e   :  { %2733 = vtanh.f32 %v710_v23 }
0x113f   :  { %2735 = vtanh.f32 %v3386_v2 }
0x1140   :  { %v2726_v34 = vpop.eup %2725  ;;  %2737 = vtanh.f32 %v3416_v27 }
0x1141   :  { %v750_v35 = vmul.f32 %v2726_v34, %v748_v33  ;;  %vm755_vm3 = vweird.f32 %v2726_v34  ;;  %v2728_v44 = vpop.eup %2727 }
0x1142   :  { %vm756_vm6 = vmor %vm754_vm5, %vm755_vm3  ;;  %v2730_v47 = vpop.eup %2729 }
0x1143   :  { %v751_v36 = vsub.f32 1.0, %v750_v35  ;;  %v2732_v48 = vpop.eup %2731 }
0x1144   :  { %v2734_v49 = vpop.eup %2733 }
0x1145   :  { %v752_v38 = vmul.f32 %v2726_v34, %v751_v36  ;;  %v2736_v52 = vpop.eup %2735 }
0x1146   :  { %v2738_v53 = vpop.eup %2737 }
0x1147   :  { %v753_v41 = vadd.f32 %v2726_v34, %v752_v38 }
0x1149   :  { %v757_v43 = vsel %vm756_vm6, %v2726_v34, %v753_v41 }
0x114a   :  { %v762_v45 = vsel %vm759_vm7, %v761_v42, %v757_v43 }
0x114b   :  { %v764_v46 = vsel %vm3367_vm4, %v2728_v44, %v762_v45 }
0x114c   :  { %767 = vrot.lane.b32.xlu1 %v764_v46, %s3235_s3  ;;  %v765_v55 = vmul.f32 %v764_v46, %v704_v20 }
0x1154   :  { %286 = vrot.lane.b32.xlu1 %v2730_v47, %s3236_s11 }
0x115c   :  { %500 = vrot.lane.b32.xlu1 %v2732_v48, %s3236_s11 }
0x1164   :  { %713 = vrot.lane.b32.xlu1 %v2734_v49, %s3236_s11 }
0x11be   :  { %v768_v50 = vpop.permute.xlu1 %767 }
0x11bf   :  { %v770_v51 = vmul.f32 %v768_v50, %v764_v46 }
0x11c1   :  { %772 = vrot.lane.b32.xlu2 %v770_v51, %s3236_s11 }
0x11c6   :  { %v287_v39 = vpop.permute.xlu1 %286 }
0x11c7   :  { %290 = vst.msk [vmem:[#allocation2] sm:$0x1] %vm289_vm9, %v287_v39 }
0x11c9   :  { %358 = vrot.lane.b32.xlu2 %v2736_v52, %s3236_s11 }
0x11ce   :  { %v501_v60 = vpop.permute.xlu1 %500 }
0x11cf   :  { %503 = vst.msk [vmem:[#allocation2 + $0x3] sm:$0x1] %vm289_vm9, %v501_v60 }
0x11d1   :  { %571 = vrot.lane.b32.xlu2 %v2738_v53, %s3236_s11 }
0x11d6   :  { %v714_v54 = vpop.permute.xlu1 %713 }
0x11d7   :  { %716 = vst.msk [vmem:[#allocation2 + $0x6] sm:$0x1] %vm289_vm9, %v714_v54 }
0x121b   :  { %v773_v2 = vpop.permute.xlu2 %772 }
0x121c   :  { %v775_v57 = vadd.f32 %v773_v2, %v765_v55 }
0x121e   :  { %2739 = vtanh.f32 %v775_v57 }
0x121f   :  { %2741 = vtanh.f32 %v3396_v32 }
0x1220   :  { %2743 = vtanh.f32 %v3426_v56  ;;  %v790_v56 = vld [vmem:[#allocation14 + $0x8] sm:$0xff] }
0x1221   :  { %814 = vmatpush.msra.mxu1 %v790_v56 }
0x1223   :  { %v359_v58 = vpop.permute.xlu2 %358  ;;  %815 = vmatpush.msra.mxu1 %v789_v8 }
0x1224   :  { %v2740_v59 = vpop.eup %2739  ;;  %361 = vst.msk [vmem:[#allocation2 + $0x1] sm:$0x1] %vm289_vm9, %v359_v58 }
0x1225   :  { %778 = vrot.lane.b32.xlu0 %v2740_v59, %s3235_s3  ;;  %v2742_v61 = vpop.eup %2741  ;;  %1058 = vmatpush.msrb.mxu1 %v821_v6 }
0x1226   :  { %v2744_v62 = vpop.eup %2743 }
0x122b   :  { %v572_v27 = vpop.permute.xlu2 %571 }
0x122c   :  { %574 = vst.msk [vmem:[#allocation2 + $0x4] sm:$0x1] %vm289_vm9, %v572_v27 }
0x122d   :  { %429 = vrot.lane.b32.xlu0 %v2742_v61, %s3236_s11 }
0x1235   :  { %642 = vrot.lane.b32.xlu0 %v2744_v62, %s3236_s11 }
0x1297   :  { %v779_v63 = vpop.permute.xlu0 %778 }
0x1298   :  { %v781_v0 = vmul.f32 %v779_v63, %v764_v46 }
0x129a   :  { %2745 = vtanh.f32 %v781_v0 }
0x129f   :  { %v430_v1 = vpop.permute.xlu0 %429 }
0x12a0   :  { %v2746_v3 = vpop.eup %2745  ;;  %432 = vst.msk [vmem:[#allocation2 + $0x2] sm:$0x1] %vm289_vm9, %v430_v1 }
0x12a1   :  { %784 = vrot.lane.b32.xlu2 %v2746_v3, %s3236_s11 }
0x12a7   :  { %v643_v32 = vpop.permute.xlu0 %642 }
0x12a8   :  { %645 = vst.msk [vmem:[#allocation2 + $0x5] sm:$0x1] %vm289_vm9, %v643_v32 }
0x12fb   :  { %v785_v9 = vpop.permute.xlu2 %784 }
0x12fc   :  { %787 = vst.msk [vmem:[#allocation2 + $0x7] sm:$0x1] %vm289_vm9, %v785_v9 }
0x1303   :  { %v788_v10 = vld [vmem:[#allocation2] sm:$0xff] }
0x1304   :  { %2597 = vmatmul.msk.f32.vlgmr.msra.gmra.mxu1 %vm221_vm8, %v788_v10 }
0x1305   :  { %1342 = vmatpush.msra.mxu1 %v821_v6 }
0x1381   :  { %v817_v12 = vpop.f32.mrf.mxu1 }
0x1382   :  { %v818_v13 = vadd.f32 %v2664_v11, %v817_v12 }
0x1384   :  { %820 = vst.msk [vmem:[#allocation6] sm:$0xff] %vm221_vm8, %v818_v13 }
0x138b   :  { %v825_v15 = vld [vmem:[#allocation6] sm:$0x1]  ;;  %v895_v46 = vld [vmem:[#allocation6 + $0x1] sm:$0x1]  ;;  %v966_v56 = vld [vmem:[#allocation6 + $0x2] sm:$0x1] }
0x138c   :  { %v849_v16 = vadd.f32 %v846_v14, %v825_v15 }
0x138e   :  { %v2598_v17 = vmul.f32 -1.442695, %v849_v16 }
0x1390   :  { %2747 = vpow2.f32 %v2598_v17 }
0x1396   :  { %v2748_v18 = vpop.eup %2747 }
0x1397   :  { %v854_v20 = vadd.f32 1.0, %v2748_v18 }
0x1399   :  { %2749 = vrcp.f32 %v854_v20  ;;  %v866_v24 = vand.u32 2147483648, %v854_v20  ;;  %v864_v28 = vand.u32 2147483647, %v854_v20  ;;  %vm860_vm14 = vweird.f32 %v854_v20 }
0x139a   :  { %2751 = vtanh.f32 %v849_v16 }
0x139b   :  { %v867_v31 = vor.u32 1.1754944e-38, %v866_v24  ;;  %vm865_vm0 = vcmp.eq.f32.partialorder %v864_v28, 8.507059e+37 }
0x139f   :  { %v2750_v21 = vpop.eup %2749 }
0x13a0   :  { %v856_v22 = vmul.f32 %v2750_v21, %v854_v20  ;;  %vm861_vm12 = vweird.f32 %v2750_v21  ;;  %v2752_v34 = vpop.eup %2751 }
0x13a1   :  { %vm862_vm15 = vmor %vm860_vm14, %vm861_vm12 }
0x13a2   :  { %v857_v23 = vsub.f32 1.0, %v856_v22 }
0x13a4   :  { %v858_v26 = vmul.f32 %v2750_v21, %v857_v23 }
0x13a6   :  { %v859_v30 = vadd.f32 %v2750_v21, %v858_v26 }
0x13a8   :  { %v863_v33 = vsel %vm862_vm15, %v2750_v21, %v859_v30 }
0x13a9   :  { %v868_v35 = vsel %vm865_vm0, %v867_v31, %v863_v33 }
0x13aa   :  { %v870_v36 = vsel %vm3473_vm13, %v2752_v34, %v868_v35 }
0x13ab   :  { %873 = vrot.lane.b32.xlu0 %v870_v36, %s3237_s6  ;;  %v871_v38 = vmul.f32 0.0, %v870_v36 }
0x141d   :  { %v874_v19 = vpop.permute.xlu0 %873 }
0x141e   :  { %v876_v37 = vmul.f32 %v874_v19, %v870_v36 }
0x1420   :  { %878 = vrot.lane.b32.xlu1 %v876_v37, %s3225_s17 }
0x1492   :  { %v879_v40 = vpop.permute.xlu1 %878 }
0x1493   :  { %v881_v41 = vadd.f32 %v879_v40, %v871_v38  ;;  %v1037_v38 = vld [vmem:[#allocation6 + $0x3] sm:$0x1] }
0x1495   :  { %2753 = vtanh.f32 %v881_v41 }
0x149b   :  { %v2754_v42 = vpop.eup %2753 }
0x149c   :  { %884 = vrot.lane.b32.xlu2 %v2754_v42, %s3238_s15 }
0x14f6   :  { %v885_v43 = vpop.permute.xlu2 %884 }
0x14f7   :  { %v3482_v44 = vmul.f32 %v885_v43, %v870_v36 }
0x14f9   :  { %897 = vrot.lane.b32.xlu0 %v3482_v44, %s3239_s18 }
0x156b   :  { %v898_v45 = vpop.permute.xlu0 %897 }
0x156c   :  { %2599 = vmatmul.msk.f32.vlgmr.msra.gmra.mxu3 %vm826_vm1, %v898_v45 }
0x15ef   :  { %v918_v47 = vpop.f32.mrf.mxu3 }
0x15f0   :  { %v921_v48 = vadd.f32 %v918_v47, %v895_v46 }
0x15f2   :  { %v2600_v49 = vmul.f32 -1.442695, %v921_v48 }
0x15f4   :  { %2755 = vpow2.f32 %v2600_v49 }
0x15fa   :  { %v2756_v50 = vpop.eup %2755 }
0x15fb   :  { %v926_v51 = vadd.f32 1.0, %v2756_v50 }
0x15fd   :  { %2757 = vrcp.f32 %v926_v51  ;;  %v938_v53 = vand.u32 2147483648, %v926_v51  ;;  %v936_v55 = vand.u32 2147483647, %v926_v51  ;;  %vm932_vm3 = vweird.f32 %v926_v51 }
0x15fe   :  { %2759 = vtanh.f32 %v921_v48 }
0x15ff   :  { %v939_v57 = vor.u32 1.1754944e-38, %v938_v53  ;;  %vm937_vm6 = vcmp.eq.f32.partialorder %v936_v55, 8.507059e+37 }
0x1603   :  { %v2758_v39 = vpop.eup %2757 }
0x1604   :  { %v928_v52 = vmul.f32 %v2758_v39, %v926_v51  ;;  %vm933_vm2 = vweird.f32 %v2758_v39  ;;  %v2760_v59 = vpop.eup %2759 }
0x1605   :  { %vm934_vm5 = vmor %vm932_vm3, %vm933_vm2 }
0x1606   :  { %v929_v60 = vsub.f32 1.0, %v928_v52 }
0x1608   :  { %v930_v54 = vmul.f32 %v2758_v39, %v929_v60 }
0x160a   :  { %v931_v2 = vadd.f32 %v2758_v39, %v930_v54 }
0x160c   :  { %v935_v58 = vsel %vm934_vm5, %v2758_v39, %v931_v2 }
0x160d   :  { %v940_v27 = vsel %vm937_vm6, %v939_v57, %v935_v58 }
0x160e   :  { %v942_v61 = vsel %vm3473_vm13, %v2760_v59, %v940_v27 }
0x160f   :  { %945 = vrot.lane.b32.xlu1 %v942_v61, %s3237_s6  ;;  %v943_v0 = vmul.f32 %v942_v61, %v881_v41 }
0x1681   :  { %v946_v62 = vpop.permute.xlu1 %945 }
0x1682   :  { %v948_v63 = vmul.f32 %v946_v62, %v942_v61 }
0x1684   :  { %950 = vrot.lane.b32.xlu2 %v948_v63, %s3225_s17 }
0x16de   :  { %v951_v1 = vpop.permute.xlu2 %950 }
0x16df   :  { %v953_v3 = vadd.f32 %v951_v1, %v943_v0  ;;  %v1108_v1 = vld [vmem:[#allocation6 + $0x4] sm:$0x1] }
0x16e1   :  { %2761 = vtanh.f32 %v953_v3 }
0x16e7   :  { %v2762_v32 = vpop.eup %2761 }
0x16e8   :  { %956 = vrot.lane.b32.xlu0 %v2762_v32, %s3238_s15 }
0x175a   :  { %v957_v4 = vpop.permute.xlu0 %956 }
0x175b   :  { %v3492_v5 = vmul.f32 %v957_v4, %v942_v61 }
0x175d   :  { %968 = vrot.lane.b32.xlu1 %v3492_v5, %s3239_s18 }
0x17cf   :  { %v969_v6 = vpop.permute.xlu1 %968 }
0x17d0   :  { %2601 = vmatmul.msk.f32.vlgmr.msrb.gmra.mxu0 %vm826_vm1, %v969_v6 }
0x184d   :  { %v989_v8 = vpop.f32.mrf.mxu0 }
0x184e   :  { %v992_v9 = vadd.f32 %v989_v8, %v966_v56 }
0x1850   :  { %v2602_v10 = vmul.f32 -1.442695, %v992_v9 }
0x1852   :  { %2763 = vpow2.f32 %v2602_v10 }
0x1858   :  { %v2764_v11 = vpop.eup %2763 }
0x1859   :  { %v997_v12 = vadd.f32 1.0, %v2764_v11 }
0x185b   :  { %2765 = vrcp.f32 %v997_v12  ;;  %v1009_v16 = vand.u32 2147483648, %v997_v12  ;;  %v1007_v18 = vand.u32 2147483647, %v997_v12  ;;  %vm1003_vm10 = vweird.f32 %v997_v12 }
0x185c   :  { %2767 = vtanh.f32 %v992_v9 }
0x185d   :  { %v1010_v21 = vor.u32 1.1754944e-38, %v1009_v16  ;;  %vm1008_vm12 = vcmp.eq.f32.partialorder %v1007_v18, 8.507059e+37 }
0x1861   :  { %v2766_v13 = vpop.eup %2765 }
0x1862   :  { %v999_v14 = vmul.f32 %v2766_v13, %v997_v12  ;;  %vm1004_vm7 = vweird.f32 %v2766_v13  ;;  %v2768_v23 = vpop.eup %2767 }
0x1863   :  { %vm1005_vm11 = vmor %vm1003_vm10, %vm1004_vm7 }
0x1864   :  { %v1000_v15 = vsub.f32 1.0, %v999_v14 }
0x1866   :  { %v1001_v17 = vmul.f32 %v2766_v13, %v1000_v15 }
0x1868   :  { %v1002_v20 = vadd.f32 %v2766_v13, %v1001_v17 }
0x186a   :  { %v1006_v22 = vsel %vm1005_vm11, %v2766_v13, %v1002_v20 }
0x186b   :  { %v1011_v24 = vsel %vm1008_vm12, %v1010_v21, %v1006_v22 }
0x186c   :  { %v1013_v26 = vsel %vm3473_vm13, %v2768_v23, %v1011_v24 }
0x186d   :  { %1016 = vrot.lane.b32.xlu2 %v1013_v26, %s3237_s6  ;;  %v1014_v31 = vmul.f32 %v1013_v26, %v953_v3 }
0x18c7   :  { %v1017_v28 = vpop.permute.xlu2 %1016 }
0x18c8   :  { %v1019_v30 = vmul.f32 %v1017_v28, %v1013_v26 }
0x18ca   :  { %1021 = vrot.lane.b32.xlu0 %v1019_v30, %s3225_s17 }
0x193c   :  { %v1022_v33 = vpop.permute.xlu0 %1021 }
0x193d   :  { %v1024_v34 = vadd.f32 %v1022_v33, %v1014_v31 }
0x193f   :  { %2769 = vtanh.f32 %v1024_v34 }
0x1945   :  { %v2770_v35 = vpop.eup %2769 }
0x1946   :  { %1027 = vrot.lane.b32.xlu1 %v2770_v35, %s3238_s15 }
0x19b8   :  { %v1028_v36 = vpop.permute.xlu1 %1027 }
0x19b9   :  { %v3502_v19 = vmul.f32 %v1028_v36, %v1013_v26 }
0x19bb   :  { %1039 = vrot.lane.b32.xlu2 %v3502_v19, %s3239_s18 }
0x1a15   :  { %v1040_v37 = vpop.permute.xlu2 %1039 }
0x1a16   :  { %2603 = vmatmul.msk.f32.vlgmr.msrb.gmra.mxu1 %vm826_vm1, %v1040_v37 }
0x1a93   :  { %v1060_v40 = vpop.f32.mrf.mxu1 }
0x1a94   :  { %v1063_v41 = vadd.f32 %v1060_v40, %v1037_v38 }
0x1a96   :  { %v2604_v42 = vmul.f32 -1.442695, %v1063_v41 }
0x1a98   :  { %2771 = vpow2.f32 %v2604_v42 }
0x1a9e   :  { %v2772_v43 = vpop.eup %2771 }
0x1a9f   :  { %v1068_v45 = vadd.f32 1.0, %v2772_v43 }
0x1aa1   :  { %2773 = vrcp.f32 %v1068_v45  ;;  %v1080_v49 = vand.u32 2147483648, %v1068_v45  ;;  %v1078_v51 = vand.u32 2147483647, %v1068_v45  ;;  %vm1074_vm15 = vweird.f32 %v1068_v45 }
0x1aa2   :  { %2775 = vtanh.f32 %v1063_v41 }
0x1aa3   :  { %v1081_v52 = vor.u32 1.1754944e-38, %v1080_v49  ;;  %vm1079_vm2 = vcmp.eq.f32.partialorder %v1078_v51, 8.507059e+37 }
0x1aa7   :  { %v2774_v46 = vpop.eup %2773 }
0x1aa8   :  { %v1070_v47 = vmul.f32 %v2774_v46, %v1068_v45  ;;  %vm1075_vm14 = vweird.f32 %v2774_v46  ;;  %v2776_v53 = vpop.eup %2775 }
0x1aa9   :  { %vm1076_vm0 = vmor %vm1074_vm15, %vm1075_vm14 }
0x1aaa   :  { %v1071_v48 = vsub.f32 1.0, %v1070_v47 }
0x1aac   :  { %v1072_v50 = vmul.f32 %v2774_v46, %v1071_v48 }
0x1aae   :  { %v1073_v39 = vadd.f32 %v2774_v46, %v1072_v50 }
0x1ab0   :  { %v1077_v60 = vsel %vm1076_vm0, %v2774_v46, %v1073_v39 }
0x1ab1   :  { %v1082_v54 = vsel %vm1079_vm2, %v1081_v52, %v1077_v60 }
0x1ab2   :  { %v1084_v55 = vsel %vm3473_vm13, %v2776_v53, %v1082_v54 }
0x1ab3   :  { %1087 = vrot.lane.b32.xlu0 %v1084_v55, %s3237_s6  ;;  %v1085_v58 = vmul.f32 %v1084_v55, %v1024_v34  ;;  %v1179_v34 = vld [vmem:[#allocation6 + $0x5] sm:$0x1] }
0x1b25   :  { %v1088_v2 = vpop.permute.xlu0 %1087 }
0x1b26   :  { %v1090_v57 = vmul.f32 %v1088_v2, %v1084_v55 }
0x1b28   :  { %1092 = vrot.lane.b32.xlu1 %v1090_v57, %s3225_s17 }
0x1b9a   :  { %v1093_v59 = vpop.permute.xlu1 %1092 }
0x1b9b   :  { %v1095_v27 = vadd.f32 %v1093_v59, %v1085_v58 }
0x1b9d   :  { %2777 = vtanh.f32 %v1095_v27 }
0x1ba3   :  { %v2778_v61 = vpop.eup %2777 }
0x1ba4   :  { %1098 = vrot.lane.b32.xlu2 %v2778_v61, %s3238_s15  ;;  %v1250_v61 = vld [vmem:[#allocation6 + $0x6] sm:$0x1] }
0x1bfe   :  { %v1099_v62 = vpop.permute.xlu2 %1098 }
0x1bff   :  { %v3512_v63 = vmul.f32 %v1099_v62, %v1084_v55 }
0x1c01   :  { %1110 = vrot.lane.b32.xlu0 %v3512_v63, %s3239_s18 }
0x1c73   :  { %v1111_v0 = vpop.permute.xlu0 %1110 }
0x1c74   :  { %2605 = vmatmul.msk.f32.vlgmr.msrb.gmra.mxu2 %vm826_vm1, %v1111_v0 }
0x1cf7   :  { %v1131_v3 = vpop.f32.mrf.mxu2 }
0x1cf8   :  { %v1134_v32 = vadd.f32 %v1131_v3, %v1108_v1 }
0x1cfa   :  { %v2606_v4 = vmul.f32 -1.442695, %v1134_v32 }
0x1cfc   :  { %2779 = vpow2.f32 %v2606_v4 }
0x1d02   :  { %v2780_v6 = vpop.eup %2779 }
0x1d03   :  { %v1139_v56 = vadd.f32 1.0, %v2780_v6 }
0x1d05   :  { %2781 = vrcp.f32 %v1139_v56  ;;  %v1151_v11 = vand.u32 2147483648, %v1139_v56  ;;  %v1149_v13 = vand.u32 2147483647, %v1139_v56  ;;  %vm1145_vm5 = vweird.f32 %v1139_v56 }
0x1d06   :  { %2783 = vtanh.f32 %v1134_v32 }
0x1d07   :  { %v1152_v15 = vor.u32 1.1754944e-38, %v1151_v11  ;;  %vm1150_vm7 = vcmp.eq.f32.partialorder %v1149_v13, 8.507059e+37 }
0x1d0b   :  { %v2782_v8 = vpop.eup %2781 }
0x1d0c   :  { %v1141_v9 = vmul.f32 %v2782_v8, %v1139_v56  ;;  %vm1146_vm3 = vweird.f32 %v2782_v8  ;;  %v2784_v17 = vpop.eup %2783 }
0x1d0d   :  { %vm1147_vm6 = vmor %vm1145_vm5, %vm1146_vm3 }
0x1d0e   :  { %v1142_v10 = vsub.f32 1.0, %v1141_v9 }
0x1d10   :  { %v1143_v12 = vmul.f32 %v2782_v8, %v1142_v10 }
0x1d12   :  { %v1144_v14 = vadd.f32 %v2782_v8, %v1143_v12 }
0x1d14   :  { %v1148_v16 = vsel %vm1147_vm6, %v2782_v8, %v1144_v14 }
0x1d15   :  { %v1153_v18 = vsel %vm1150_vm7, %v1152_v15, %v1148_v16 }
0x1d16   :  { %v1155_v20 = vsel %vm3473_vm13, %v2784_v17, %v1153_v18 }
0x1d17   :  { %1158 = vrot.lane.b32.xlu1 %v1155_v20, %s3237_s6  ;;  %v1156_v23 = vmul.f32 %v1155_v20, %v1095_v27 }
0x1d89   :  { %v1159_v21 = vpop.permute.xlu1 %1158 }
0x1d8a   :  { %v1161_v22 = vmul.f32 %v1159_v21, %v1155_v20 }
0x1d8c   :  { %1163 = vrot.lane.b32.xlu2 %v1161_v22, %s3225_s17 }
0x1de6   :  { %v1164_v24 = vpop.permute.xlu2 %1163 }
0x1de7   :  { %v1166_v26 = vadd.f32 %v1164_v24, %v1156_v23 }
0x1de9   :  { %2785 = vtanh.f32 %v1166_v26 }
0x1def   :  { %v2786_v28 = vpop.eup %2785 }
0x1df0   :  { %1169 = vrot.lane.b32.xlu0 %v2786_v28, %s3238_s15 }
0x1e62   :  { %v1170_v30 = vpop.permute.xlu0 %1169 }
0x1e63   :  { %v3522_v31 = vmul.f32 %v1170_v30, %v1155_v20  ;;  %v1321_v30 = vld [vmem:[#allocation6 + $0x7] sm:$0x1] }
0x1e65   :  { %1181 = vrot.lane.b32.xlu1 %v3522_v31, %s3239_s18 }
0x1ed7   :  { %v1182_v33 = vpop.permute.xlu1 %1181 }
0x1ed8   :  { %2607 = vmatmul.msk.f32.vlgmr.msrb.gmra.mxu3 %vm826_vm1, %v1182_v33 }
0x1f5b   :  { %v1202_v35 = vpop.f32.mrf.mxu3 }
0x1f5c   :  { %v1205_v36 = vadd.f32 %v1202_v35, %v1179_v34 }
0x1f5e   :  { %v2608_v37 = vmul.f32 -1.442695, %v1205_v36 }
0x1f60   :  { %2787 = vpow2.f32 %v2608_v37 }
0x1f66   :  { %v2788_v38 = vpop.eup %2787 }
0x1f67   :  { %v1210_v40 = vadd.f32 1.0, %v2788_v38 }
0x1f69   :  { %2789 = vrcp.f32 %v1210_v40  ;;  %v1222_v45 = vand.u32 2147483648, %v1210_v40  ;;  %v1220_v47 = vand.u32 2147483647, %v1210_v40  ;;  %vm1216_vm11 = vweird.f32 %v1210_v40 }
0x1f6a   :  { %2791 = vtanh.f32 %v1205_v36 }
0x1f6b   :  { %v1223_v49 = vor.u32 1.1754944e-38, %v1222_v45  ;;  %vm1221_vm14 = vcmp.eq.f32.partialorder %v1220_v47, 8.507059e+37 }
0x1f6f   :  { %v2790_v41 = vpop.eup %2789 }
0x1f70   :  { %v1212_v42 = vmul.f32 %v2790_v41, %v1210_v40  ;;  %vm1217_vm10 = vweird.f32 %v2790_v41  ;;  %v2792_v51 = vpop.eup %2791 }
0x1f71   :  { %vm1218_vm12 = vmor %vm1216_vm11, %vm1217_vm10 }
0x1f72   :  { %v1213_v43 = vsub.f32 1.0, %v1212_v42 }
0x1f74   :  { %v1214_v46 = vmul.f32 %v2790_v41, %v1213_v43 }
0x1f76   :  { %v1215_v48 = vadd.f32 %v2790_v41, %v1214_v46 }
0x1f78   :  { %v1219_v50 = vsel %vm1218_vm12, %v2790_v41, %v1215_v48 }
0x1f79   :  { %v1224_v39 = vsel %vm1221_vm14, %v1223_v49, %v1219_v50 }
0x1f7a   :  { %v1226_v52 = vsel %vm3473_vm13, %v2792_v51, %v1224_v39 }
0x1f7b   :  { %1229 = vrot.lane.b32.xlu2 %v1226_v52, %s3237_s6  ;;  %v1227_v54 = vmul.f32 %v1226_v52, %v1166_v26 }
0x1fd5   :  { %v1230_v60 = vpop.permute.xlu2 %1229 }
0x1fd6   :  { %v1232_v53 = vmul.f32 %v1230_v60, %v1226_v52 }
0x1fd8   :  { %1234 = vrot.lane.b32.xlu0 %v1232_v53, %s3225_s17 }
0x204a   :  { %v1235_v55 = vpop.permute.xlu0 %1234 }
0x204b   :  { %v1237_v2 = vadd.f32 %v1235_v55, %v1227_v54 }
0x204d   :  { %2793 = vtanh.f32 %v1237_v2 }
0x2053   :  { %v2794_v57 = vpop.eup %2793 }
0x2054   :  { %1240 = vrot.lane.b32.xlu1 %v2794_v57, %s3238_s15 }
0x20c6   :  { %v1241_v58 = vpop.permute.xlu1 %1240 }
0x20c7   :  { %v3532_v59 = vmul.f32 %v1241_v58, %v1226_v52 }
0x20c9   :  { %1252 = vrot.lane.b32.xlu2 %v3532_v59, %s3239_s18 }
0x2123   :  { %v1253_v27 = vpop.permute.xlu2 %1252 }
0x2124   :  { %2609 = vmatmul.msk.f32.vlgmr.msra.gmra.mxu0 %vm826_vm1, %v1253_v27 }
0x21a1   :  { %v1273_v62 = vpop.f32.mrf.mxu0 }
0x21a2   :  { %v1276_v0 = vadd.f32 %v1273_v62, %v1250_v61 }
0x21a4   :  { %v2610_v1 = vmul.f32 -1.442695, %v1276_v0 }
0x21a6   :  { %2795 = vpow2.f32 %v2610_v1 }
0x21ac   :  { %v2796_v3 = vpop.eup %2795 }
0x21ad   :  { %v1281_v32 = vadd.f32 1.0, %v2796_v3 }
0x21af   :  { %2797 = vrcp.f32 %v1281_v32  ;;  %v1293_v8 = vand.u32 2147483648, %v1281_v32  ;;  %v1291_v10 = vand.u32 2147483647, %v1281_v32  ;;  %vm1287_vm0 = vweird.f32 %v1281_v32 }
0x21b0   :  { %2799 = vtanh.f32 %v1276_v0 }
0x21b1   :  { %v1294_v12 = vor.u32 1.1754944e-38, %v1293_v8  ;;  %vm1292_vm3 = vcmp.eq.f32.partialorder %v1291_v10, 8.507059e+37  ;;  %v1424_v8 = vld [vmem:[#allocation18 + $0x10] sm:$0xff] }
0x21b5   :  { %v2798_v4 = vpop.eup %2797 }
0x21b6   :  { %v1283_v6 = vmul.f32 %v2798_v4, %v1281_v32  ;;  %vm1288_vm15 = vweird.f32 %v2798_v4  ;;  %v2800_v14 = vpop.eup %2799 }
0x21b7   :  { %vm1289_vm2 = vmor %vm1287_vm0, %vm1288_vm15 }
0x21b8   :  { %v1284_v56 = vsub.f32 1.0, %v1283_v6  ;;  %v1393_v6 = vld [vmem:[#allocation17] sm:$0xff] }
0x21b9   :  { %1416 = vmatpush.msra.mxu2 %v1393_v6 }
0x21ba   :  { %v1285_v9 = vmul.f32 %v2798_v4, %v1284_v56  ;;  %v1425_v56 = vld [vmem:[#allocation18 + $0x18] sm:$0xff] }
0x21bb   :  { %1439 = vmatpush.msra.mxu3 %v1425_v56  ;;  %1510 = vmatpush.msrb.mxu0 %v1425_v56 }
0x21bc   :  { %v1286_v11 = vadd.f32 %v2798_v4, %v1285_v9  ;;  %1581 = vmatpush.msrb.mxu1 %v1425_v56  ;;  %1652 = vmatpush.msrb.mxu2 %v1425_v56  ;;  %v1422_v9 = vld [vmem:[#allocation18] sm:$0xff] }
0x21bd   :  { %1440 = vmatpush.msra.mxu3 %v1424_v8  ;;  %1511 = vmatpush.msrb.mxu0 %v1424_v8 }
0x21be   :  { %v1290_v13 = vsel %vm1289_vm2, %v2798_v4, %v1286_v11  ;;  %1582 = vmatpush.msrb.mxu1 %v1424_v8  ;;  %1653 = vmatpush.msrb.mxu2 %v1424_v8 }
0x21bf   :  { %v1295_v15 = vsel %vm1292_vm3, %v1294_v12, %v1290_v13  ;;  %v2665_v12 = vld [vmem:[%s3747_s9] ss:$0 sm:$0xff]  ;;  %s3240_s9 = smov [#allocation24]  }
0x21c0   :  { %v1297_v16 = vsel %vm3473_vm13, %v2800_v14, %v1295_v15  ;;  %s2565_s1 = sshll.u32 %s3240_s9, 4  ;;  %s2566_s1 = int_to_ptr.vmem [resolvable:$true] %s2565_s1 }
0x21c1   :  { %1300 = vrot.lane.b32.xlu0 %v1297_v16, %s3237_s6  ;;  %v1298_v20 = vmul.f32 %v1297_v16, %v1237_v2 }
0x2233   :  { %v1301_v17 = vpop.permute.xlu0 %1300 }
0x2234   :  { %v1303_v18 = vmul.f32 %v1301_v17, %v1297_v16 }
0x2236   :  { %1305 = vrot.lane.b32.xlu1 %v1303_v18, %s3225_s17 }
0x22a8   :  { %v1306_v21 = vpop.permute.xlu1 %1305 }
0x22a9   :  { %v1308_v22 = vadd.f32 %v1306_v21, %v1298_v20 }
0x22ab   :  { %2801 = vtanh.f32 %v1308_v22 }
0x22b1   :  { %v2802_v23 = vpop.eup %2801 }
0x22b2   :  { %1311 = vrot.lane.b32.xlu2 %v2802_v23, %s3238_s15 }
0x230c   :  { %v1312_v24 = vpop.permute.xlu2 %1311 }
0x230d   :  { %v1314_v26 = vmul.f32 %v1312_v24, %v1297_v16 }
0x230f   :  { %1323 = vrot.lane.b32.xlu0 %v1314_v26, %s3239_s18 }
0x2381   :  { %v1324_v28 = vpop.permute.xlu0 %1323 }
0x2382   :  { %2611 = vmatmul.msk.f32.vlgmr.msra.gmra.mxu1 %vm826_vm1, %v1324_v28 }
0x23ff   :  { %v1344_v33 = vpop.f32.mrf.mxu1 }
0x2400   :  { %v1347_v34 = vadd.f32 %v1344_v33, %v1321_v30 }
0x2402   :  { %v2612_v35 = vmul.f32 -1.442695, %v1347_v34 }
0x2404   :  { %2803 = vpow2.f32 %v2612_v35 }
0x240a   :  { %v2804_v36 = vpop.eup %2803 }
0x240b   :  { %v1352_v37 = vadd.f32 1.0, %v2804_v36 }
0x240d   :  { %2805 = vrcp.f32 %v1352_v37  ;;  %v1364_v42 = vand.u32 2147483648, %v1352_v37  ;;  %v1362_v45 = vand.u32 2147483647, %v1352_v37  ;;  %vm1358_vm6 = vweird.f32 %v1352_v37 }
0x240e   :  { %2807 = vtanh.f32 %v1347_v34 }
0x240f   :  { %v1365_v47 = vor.u32 1.1754944e-38, %v1364_v42  ;;  %vm1363_vm10 = vcmp.eq.f32.partialorder %v1362_v45, 8.507059e+37  ;;  %2809 = vtanh.f32 %v3482_v44 }
0x2410   :  { %2811 = vtanh.f32 %v3512_v63 }
0x2411   :  { %2813 = vtanh.f32 %v1314_v26 }
0x2412   :  { %2815 = vtanh.f32 %v3492_v5 }
0x2413   :  { %v2806_v38 = vpop.eup %2805  ;;  %2817 = vtanh.f32 %v3522_v31 }
0x2414   :  { %v1354_v40 = vmul.f32 %v2806_v38, %v1352_v37  ;;  %vm1359_vm5 = vweird.f32 %v2806_v38  ;;  %v2808_v49 = vpop.eup %2807 }
0x2415   :  { %vm1360_vm7 = vmor %vm1358_vm6, %vm1359_vm5  ;;  %v2810_v39 = vpop.eup %2809 }
0x2416   :  { %v1355_v41 = vsub.f32 1.0, %v1354_v40  ;;  %v2812_v52 = vpop.eup %2811 }
0x2417   :  { %v2814_v60 = vpop.eup %2813 }
0x2418   :  { %v1356_v43 = vmul.f32 %v2806_v38, %v1355_v41  ;;  %v2816_v44 = vpop.eup %2815 }
0x2419   :  { %v2818_v55 = vpop.eup %2817 }
0x241a   :  { %v1357_v46 = vadd.f32 %v2806_v38, %v1356_v43 }
0x241c   :  { %v1361_v48 = vsel %vm1360_vm7, %v2806_v38, %v1357_v46 }
0x241d   :  { %v1366_v50 = vsel %vm1363_vm10, %v1365_v47, %v1361_v48 }
0x241e   :  { %v1368_v51 = vsel %vm3473_vm13, %v2808_v49, %v1366_v50  ;;  %vm893_vm13 = vcmask 57344  }
0x241f   :  { %1371 = vrot.lane.b32.xlu1 %v1368_v51, %s3237_s6  ;;  %v1369_v57 = vmul.f32 %v1368_v51, %v1308_v22 }
0x2427   :  { %890 = vrot.lane.b32.xlu1 %v2810_v39, %s3239_s18 }
0x242f   :  { %1104 = vrot.lane.b32.xlu1 %v2812_v52, %s3239_s18 }
0x2437   :  { %1317 = vrot.lane.b32.xlu1 %v2814_v60, %s3239_s18 }
0x2491   :  { %v1372_v53 = vpop.permute.xlu1 %1371 }
0x2492   :  { %v1374_v54 = vmul.f32 %v1372_v53, %v1368_v51 }
0x2494   :  { %1376 = vrot.lane.b32.xlu2 %v1374_v54, %s3225_s17 }
0x2499   :  { %v891_v29 = vpop.permute.xlu1 %890 }
0x249a   :  { %894 = vst.msk [vmem:[#allocation3] sm:$0x1] %vm893_vm13, %v891_v29 }
0x249c   :  { %962 = vrot.lane.b32.xlu2 %v2816_v44, %s3239_s18 }
0x24a1   :  { %v1105_v63 = vpop.permute.xlu1 %1104 }
0x24a2   :  { %1107 = vst.msk [vmem:[#allocation3 + $0x3] sm:$0x1] %vm893_vm13, %v1105_v63 }
0x24a4   :  { %1175 = vrot.lane.b32.xlu2 %v2818_v55, %s3239_s18 }
0x24a9   :  { %v1318_v2 = vpop.permute.xlu1 %1317 }
0x24aa   :  { %1320 = vst.msk [vmem:[#allocation3 + $0x6] sm:$0x1] %vm893_vm13, %v1318_v2 }
0x24ee   :  { %v1377_v5 = vpop.permute.xlu2 %1376 }
0x24ef   :  { %v1379_v58 = vadd.f32 %v1377_v5, %v1369_v57 }
0x24f1   :  { %2819 = vtanh.f32 %v1379_v58 }
0x24f2   :  { %2821 = vtanh.f32 %v3502_v19 }
0x24f3   :  { %2823 = vtanh.f32 %v3532_v59  ;;  %v1423_v59 = vld [vmem:[#allocation18 + $0x8] sm:$0xff] }
0x24f4   :  { %1441 = vmatpush.msra.mxu3 %v1423_v59  ;;  %1512 = vmatpush.msrb.mxu0 %v1423_v59 }
0x24f5   :  { %1583 = vmatpush.msrb.mxu1 %v1423_v59  ;;  %1654 = vmatpush.msrb.mxu2 %v1423_v59 }
0x24f6   :  { %v963_v27 = vpop.permute.xlu2 %962  ;;  %1442 = vmatpush.msra.mxu3 %v1422_v9  ;;  %1513 = vmatpush.msrb.mxu0 %v1422_v9 }
0x24f7   :  { %v2820_v61 = vpop.eup %2819  ;;  %965 = vst.msk [vmem:[#allocation3 + $0x1] sm:$0x1] %vm893_vm13, %v963_v27  ;;  %1443 = vmatmul.f32.vlgmr.msra.gmra.mxu3 %v3234_v7  ;;  %1584 = vmatpush.msrb.mxu1 %v1422_v9 }
0x24f8   :  { %1382 = vrot.lane.b32.xlu0 %v2820_v61, %s3238_s15  ;;  %v2822_v62 = vpop.eup %2821  ;;  %1655 = vmatpush.msrb.mxu2 %v1422_v9 }
0x24f9   :  { %v2824_v0 = vpop.eup %2823  ;;  %1723 = vmatpush.msrb.mxu3 %v1425_v56  ;;  %1794 = vmatpush.msra.mxu0 %v1425_v56 }
0x24fa   :  { %1865 = vmatpush.msra.mxu1 %v1425_v56 }
0x24fb   :  { %1724 = vmatpush.msrb.mxu3 %v1424_v8  ;;  %1795 = vmatpush.msra.mxu0 %v1424_v8 }
0x24fc   :  { %1866 = vmatpush.msra.mxu1 %v1424_v8 }
0x24fd   :  { %1725 = vmatpush.msrb.mxu3 %v1423_v59  ;;  %1796 = vmatpush.msra.mxu0 %v1423_v59 }
0x24fe   :  { %v1176_v31 = vpop.permute.xlu2 %1175  ;;  %1867 = vmatpush.msra.mxu1 %v1423_v59 }
0x24ff   :  { %1178 = vst.msk [vmem:[#allocation3 + $0x4] sm:$0x1] %vm893_vm13, %v1176_v31  ;;  %1726 = vmatpush.msrb.mxu3 %v1422_v9  ;;  %1797 = vmatpush.msra.mxu0 %v1422_v9 }
0x2500   :  { %1033 = vrot.lane.b32.xlu0 %v2822_v62, %s3239_s18  ;;  %1868 = vmatpush.msra.mxu1 %v1422_v9 }
0x2508   :  { %1246 = vrot.lane.b32.xlu0 %v2824_v0, %s3239_s18 }
0x256a   :  { %v1383_v1 = vpop.permute.xlu0 %1382 }
0x256b   :  { %v1385_v3 = vmul.f32 %v1383_v1, %v1368_v51 }
0x256d   :  { %2825 = vtanh.f32 %v1385_v3 }
0x2572   :  { %v1034_v32 = vpop.permute.xlu0 %1033 }
0x2573   :  { %v2826_v4 = vpop.eup %2825  ;;  %1036 = vst.msk [vmem:[#allocation3 + $0x2] sm:$0x1] %vm893_vm13, %v1034_v32 }
0x2574   :  { %1388 = vrot.lane.b32.xlu2 %v2826_v4, %s3239_s18 }
0x257a   :  { %v1247_v19 = vpop.permute.xlu0 %1246  ;;  %v1444_v15 = vpop.f32.mrf.mxu3 }
0x257b   :  { %1249 = vst.msk [vmem:[#allocation3 + $0x5] sm:$0x1] %vm893_vm13, %v1247_v19 }
0x25ce   :  { %v1389_v10 = vpop.permute.xlu2 %1388 }
0x25cf   :  { %1391 = vst.msk [vmem:[#allocation3 + $0x7] sm:$0x1] %vm893_vm13, %v1389_v10 }
0x25d6   :  { %v1392_v11 = vld [vmem:[#allocation3] sm:$0xff] }
0x25d7   :  { %2613 = vmatmul.msk.f32.vlgmr.msra.gmra.mxu2 %vm826_vm1, %v1392_v11 }
0x25d8   :  { %1936 = vmatpush.msra.mxu2 %v1425_v56 }
0x25da   :  { %1937 = vmatpush.msra.mxu2 %v1424_v8 }
0x25dc   :  { %1938 = vmatpush.msra.mxu2 %v1423_v59 }
0x25de   :  { %1939 = vmatpush.msra.mxu2 %v1422_v9 }
0x265a   :  { %v1418_v13 = vpop.f32.mrf.mxu2 }
0x265b   :  { %v1419_v14 = vadd.f32 %v2665_v12, %v1418_v13 }
0x265d   :  { %1421 = vst [vmem:[#allocation7] sm:$0xff] %v1419_v14 }
0x2664   :  { %v1426_v16 = vld [vmem:[#allocation7] sm:$0x1]  ;;  %v1492_v50 = vld [vmem:[#allocation7 + $0x1] sm:$0x1]  ;;  %v1563_v8 = vld [vmem:[#allocation7 + $0x2] sm:$0x1] }
0x2665   :  { %v1447_v17 = vadd.f32 %v1444_v15, %v1426_v16 }
0x2667   :  { %v2614_v18 = vmul.f32 -1.442695, %v1447_v17 }
0x2669   :  { %2827 = vpow2.f32 %v2614_v18 }
0x266f   :  { %v2828_v20 = vpop.eup %2827 }
0x2670   :  { %v1452_v21 = vadd.f32 1.0, %v2828_v20 }
0x2672   :  { %2829 = vrcp.f32 %v1452_v21  ;;  %v1464_v26 = vand.u32 2147483648, %v1452_v21  ;;  %v1462_v30 = vand.u32 2147483647, %v1452_v21  ;;  %vm1458_vm11 = vweird.f32 %v1452_v21 }
0x2673   :  { %2831 = vtanh.f32 %v1447_v17 }
0x2674   :  { %v1465_v34 = vor.u32 1.1754944e-38, %v1464_v26  ;;  %vm1463_vm14 = vcmp.eq.f32.partialorder %v1462_v30, 8.507059e+37 }
0x2678   :  { %v2830_v22 = vpop.eup %2829 }
0x2679   :  { %v1454_v23 = vmul.f32 %v2830_v22, %v1452_v21  ;;  %vm1459_vm1 = vweird.f32 %v2830_v22  ;;  %v2832_v36 = vpop.eup %2831 }
0x267a   :  { %vm1460_vm12 = vmor %vm1458_vm11, %vm1459_vm1 }
0x267b   :  { %v1455_v24 = vsub.f32 1.0, %v1454_v23 }
0x267d   :  { %v1456_v28 = vmul.f32 %v2830_v22, %v1455_v24 }
0x267f   :  { %v1457_v33 = vadd.f32 %v2830_v22, %v1456_v28 }
0x2681   :  { %v1461_v35 = vsel %vm1460_vm12, %v2830_v22, %v1457_v33 }
0x2682   :  { %v1466_v37 = vsel %vm1463_vm14, %v1465_v34, %v1461_v35 }
0x2683   :  { %v1468_v38 = vsel %vm3367_vm4, %v2832_v36, %v1466_v37 }
0x2684   :  { %1471 = vrot.lane.b32.xlu0 %v1468_v38, %s3235_s3  ;;  %v1469_v42 = vmul.f32 0.0, %v1468_v38 }
0x26f6   :  { %v1472_v40 = vpop.permute.xlu0 %1471 }
0x26f7   :  { %v1474_v41 = vmul.f32 %v1472_v40, %v1468_v38 }
0x26f9   :  { %1476 = vrot.lane.b32.xlu1 %v1474_v41, %s3236_s11  ;;  %v1634_v41 = vld [vmem:[#allocation7 + $0x3] sm:$0x1] }
0x276b   :  { %v1477_v43 = vpop.permute.xlu1 %1476 }
0x276c   :  { %v1479_v45 = vadd.f32 %v1477_v43, %v1469_v42 }
0x276e   :  { %2833 = vtanh.f32 %v1479_v45 }
0x2774   :  { %v2834_v46 = vpop.eup %2833 }
0x2775   :  { %1482 = vrot.lane.b32.xlu2 %v2834_v46, %s3235_s3 }
0x27cf   :  { %v1483_v47 = vpop.permute.xlu2 %1482 }
0x27d0   :  { %v3581_v48 = vmul.f32 %v1483_v47, %v1468_v38 }
0x27d2   :  { %1494 = vrot.lane.b32.xlu0 %v3581_v48, %s3236_s11 }
0x2844   :  { %v1495_v49 = vpop.permute.xlu0 %1494 }
0x2845   :  { %2615 = vmatmul.msk.f32.vlgmr.msrb.gmra.mxu0 %vm221_vm8, %v1495_v49 }
0x28c2   :  { %v1515_v51 = vpop.f32.mrf.mxu0 }
0x28c3   :  { %v1518_v39 = vadd.f32 %v1515_v51, %v1492_v50 }
0x28c5   :  { %v2616_v52 = vmul.f32 -1.442695, %v1518_v39 }
0x28c7   :  { %2835 = vpow2.f32 %v2616_v52 }
0x28cd   :  { %v2836_v60 = vpop.eup %2835 }
0x28ce   :  { %v1523_v53 = vadd.f32 1.0, %v2836_v60 }
0x28d0   :  { %2837 = vrcp.f32 %v1523_v53  ;;  %v1535_v63 = vand.u32 2147483648, %v1523_v53  ;;  %v1533_v2 = vand.u32 2147483647, %v1523_v53  ;;  %vm1529_vm0 = vweird.f32 %v1523_v53 }
0x28d1   :  { %2839 = vtanh.f32 %v1518_v39 }
0x28d2   :  { %v1536_v5 = vor.u32 1.1754944e-38, %v1535_v63  ;;  %vm1534_vm3 = vcmp.eq.f32.partialorder %v1533_v2, 8.507059e+37 }
0x28d6   :  { %v2838_v54 = vpop.eup %2837 }
0x28d7   :  { %v1525_v29 = vmul.f32 %v2838_v54, %v1523_v53  ;;  %vm1530_vm15 = vweird.f32 %v2838_v54  ;;  %v2840_v27 = vpop.eup %2839 }
0x28d8   :  { %vm1531_vm2 = vmor %vm1529_vm0, %vm1530_vm15 }
0x28d9   :  { %v1526_v44 = vsub.f32 1.0, %v1525_v29 }
0x28db   :  { %v1527_v55 = vmul.f32 %v2838_v54, %v1526_v44 }
0x28dd   :  { %v1528_v57 = vadd.f32 %v2838_v54, %v1527_v55 }
0x28df   :  { %v1532_v58 = vsel %vm1531_vm2, %v2838_v54, %v1528_v57 }
0x28e0   :  { %v1537_v61 = vsel %vm1534_vm3, %v1536_v5, %v1532_v58 }
0x28e1   :  { %v1539_v31 = vsel %vm3367_vm4, %v2840_v27, %v1537_v61 }
0x28e2   :  { %1542 = vrot.lane.b32.xlu1 %v1539_v31, %s3235_s3  ;;  %v1540_v1 = vmul.f32 %v1539_v31, %v1479_v45 }
0x2954   :  { %v1543_v62 = vpop.permute.xlu1 %1542 }
0x2955   :  { %v1545_v0 = vmul.f32 %v1543_v62, %v1539_v31 }
0x2957   :  { %1547 = vrot.lane.b32.xlu2 %v1545_v0, %s3236_s11 }
0x29b1   :  { %v1548_v3 = vpop.permute.xlu2 %1547 }
0x29b2   :  { %v1550_v32 = vadd.f32 %v1548_v3, %v1540_v1  ;;  %v1705_v1 = vld [vmem:[#allocation7 + $0x4] sm:$0x1] }
0x29b4   :  { %2841 = vtanh.f32 %v1550_v32 }
0x29ba   :  { %v2842_v4 = vpop.eup %2841 }
0x29bb   :  { %1553 = vrot.lane.b32.xlu0 %v2842_v4, %s3235_s3 }
0x2a2d   :  { %v1554_v19 = vpop.permute.xlu0 %1553 }
0x2a2e   :  { %v3591_v6 = vmul.f32 %v1554_v19, %v1539_v31 }
0x2a30   :  { %1565 = vrot.lane.b32.xlu1 %v3591_v6, %s3236_s11 }
0x2aa2   :  { %v1566_v56 = vpop.permute.xlu1 %1565 }
0x2aa3   :  { %2617 = vmatmul.msk.f32.vlgmr.msrb.gmra.mxu1 %vm221_vm8, %v1566_v56 }
0x2b20   :  { %v1586_v59 = vpop.f32.mrf.mxu1 }
0x2b21   :  { %v1589_v9 = vadd.f32 %v1586_v59, %v1563_v8 }
0x2b23   :  { %v2618_v10 = vmul.f32 -1.442695, %v1589_v9 }
0x2b25   :  { %2843 = vpow2.f32 %v2618_v10 }
0x2b2b   :  { %v2844_v11 = vpop.eup %2843 }
0x2b2c   :  { %v1594_v12 = vadd.f32 1.0, %v2844_v11 }
0x2b2e   :  { %2845 = vrcp.f32 %v1594_v12  ;;  %v1606_v16 = vand.u32 2147483648, %v1594_v12  ;;  %v1604_v18 = vand.u32 2147483647, %v1594_v12  ;;  %vm1600_vm6 = vweird.f32 %v1594_v12 }
0x2b2f   :  { %2847 = vtanh.f32 %v1589_v9 }
0x2b30   :  { %v1607_v21 = vor.u32 1.1754944e-38, %v1606_v16  ;;  %vm1605_vm10 = vcmp.eq.f32.partialorder %v1604_v18, 8.507059e+37 }
0x2b34   :  { %v2846_v13 = vpop.eup %2845 }
0x2b35   :  { %v1596_v14 = vmul.f32 %v2846_v13, %v1594_v12  ;;  %vm1601_vm5 = vweird.f32 %v2846_v13  ;;  %v2848_v23 = vpop.eup %2847 }
0x2b36   :  { %vm1602_vm7 = vmor %vm1600_vm6, %vm1601_vm5 }
0x2b37   :  { %v1597_v15 = vsub.f32 1.0, %v1596_v14 }
0x2b39   :  { %v1598_v17 = vmul.f32 %v2846_v13, %v1597_v15 }
0x2b3b   :  { %v1599_v20 = vadd.f32 %v2846_v13, %v1598_v17 }
0x2b3d   :  { %v1603_v22 = vsel %vm1602_vm7, %v2846_v13, %v1599_v20 }
0x2b3e   :  { %v1608_v24 = vsel %vm1605_vm10, %v1607_v21, %v1603_v22 }
0x2b3f   :  { %v1610_v26 = vsel %vm3367_vm4, %v2848_v23, %v1608_v24 }
0x2b40   :  { %1613 = vrot.lane.b32.xlu2 %v1610_v26, %s3235_s3  ;;  %v1611_v33 = vmul.f32 %v1610_v26, %v1550_v32 }
0x2b9a   :  { %v1614_v28 = vpop.permute.xlu2 %1613 }
0x2b9b   :  { %v1616_v30 = vmul.f32 %v1614_v28, %v1610_v26 }
0x2b9d   :  { %1618 = vrot.lane.b32.xlu0 %v1616_v30, %s3236_s11 }
0x2c0f   :  { %v1619_v34 = vpop.permute.xlu0 %1618 }
0x2c10   :  { %v1621_v35 = vadd.f32 %v1619_v34, %v1611_v33  ;;  %v1776_v34 = vld [vmem:[#allocation7 + $0x5] sm:$0x1] }
0x2c12   :  { %2849 = vtanh.f32 %v1621_v35 }
0x2c18   :  { %v2850_v36 = vpop.eup %2849 }
0x2c19   :  { %1624 = vrot.lane.b32.xlu1 %v2850_v36, %s3235_s3 }
0x2c8b   :  { %v1625_v37 = vpop.permute.xlu1 %1624 }
0x2c8c   :  { %v3601_v38 = vmul.f32 %v1625_v37, %v1610_v26 }
0x2c8e   :  { %1636 = vrot.lane.b32.xlu2 %v3601_v38, %s3236_s11 }
0x2ce8   :  { %v1637_v40 = vpop.permute.xlu2 %1636 }
0x2ce9   :  { %2619 = vmatmul.msk.f32.vlgmr.msrb.gmra.mxu2 %vm221_vm8, %v1637_v40 }
0x2d6c   :  { %v1657_v42 = vpop.f32.mrf.mxu2 }
0x2d6d   :  { %v1660_v43 = vadd.f32 %v1657_v42, %v1634_v41 }
0x2d6f   :  { %v2620_v45 = vmul.f32 -1.442695, %v1660_v43 }
0x2d71   :  { %2851 = vpow2.f32 %v2620_v45 }
0x2d77   :  { %v2852_v46 = vpop.eup %2851 }
0x2d78   :  { %v1665_v47 = vadd.f32 1.0, %v2852_v46 }
0x2d7a   :  { %2853 = vrcp.f32 %v1665_v47  ;;  %v1677_v39 = vand.u32 2147483648, %v1665_v47  ;;  %v1675_v60 = vand.u32 2147483647, %v1665_v47  ;;  %vm1671_vm1 = vweird.f32 %v1665_v47 }
0x2d7b   :  { %2855 = vtanh.f32 %v1660_v43 }
0x2d7c   :  { %v1678_v54 = vor.u32 1.1754944e-38, %v1677_v39  ;;  %vm1676_vm12 = vcmp.eq.f32.partialorder %v1675_v60, 8.507059e+37 }
0x2d80   :  { %v2854_v49 = vpop.eup %2853 }
0x2d81   :  { %v1667_v50 = vmul.f32 %v2854_v49, %v1665_v47  ;;  %vm1672_vm13 = vweird.f32 %v2854_v49  ;;  %v2856_v44 = vpop.eup %2855 }
0x2d82   :  { %vm1673_vm11 = vmor %vm1671_vm1, %vm1672_vm13 }
0x2d83   :  { %v1668_v51 = vsub.f32 1.0, %v1667_v50 }
0x2d85   :  { %v1669_v52 = vmul.f32 %v2854_v49, %v1668_v51 }
0x2d87   :  { %v1670_v53 = vadd.f32 %v2854_v49, %v1669_v52 }
0x2d89   :  { %v1674_v29 = vsel %vm1673_vm11, %v2854_v49, %v1670_v53 }
0x2d8a   :  { %v1679_v63 = vsel %vm1676_vm12, %v1678_v54, %v1674_v29 }
0x2d8b   :  { %v1681_v55 = vsel %vm3367_vm4, %v2856_v44, %v1679_v63 }
0x2d8c   :  { %1684 = vrot.lane.b32.xlu0 %v1681_v55, %s3235_s3  ;;  %v1682_v5 = vmul.f32 %v1681_v55, %v1621_v35 }
0x2dfe   :  { %v1685_v2 = vpop.permute.xlu0 %1684 }
0x2dff   :  { %v1687_v57 = vmul.f32 %v1685_v2, %v1681_v55 }
0x2e01   :  { %1689 = vrot.lane.b32.xlu1 %v1687_v57, %s3236_s11 }
0x2e73   :  { %v1690_v58 = vpop.permute.xlu1 %1689 }
0x2e74   :  { %v1692_v27 = vadd.f32 %v1690_v58, %v1682_v5 }
0x2e76   :  { %2857 = vtanh.f32 %v1692_v27 }
0x2e7c   :  { %v2858_v61 = vpop.eup %2857 }
0x2e7d   :  { %1695 = vrot.lane.b32.xlu2 %v2858_v61, %s3235_s3 }
0x2ed7   :  { %v1696_v31 = vpop.permute.xlu2 %1695 }
0x2ed8   :  { %v3611_v62 = vmul.f32 %v1696_v31, %v1681_v55 }
0x2eda   :  { %1707 = vrot.lane.b32.xlu0 %v3611_v62, %s3236_s11 }
0x2f4c   :  { %v1708_v0 = vpop.permute.xlu0 %1707 }
0x2f4d   :  { %2621 = vmatmul.msk.f32.vlgmr.msrb.gmra.mxu3 %vm221_vm8, %v1708_v0 }
0x2fd0   :  { %v1728_v3 = vpop.f32.mrf.mxu3 }
0x2fd1   :  { %v1731_v32 = vadd.f32 %v1728_v3, %v1705_v1 }
0x2fd3   :  { %v2622_v4 = vmul.f32 -1.442695, %v1731_v32 }
0x2fd5   :  { %2859 = vpow2.f32 %v2622_v4 }
0x2fdb   :  { %v2860_v19 = vpop.eup %2859 }
0x2fdc   :  { %v1736_v56 = vadd.f32 1.0, %v2860_v19 }
0x2fde   :  { %2861 = vrcp.f32 %v1736_v56  ;;  %v1748_v10 = vand.u32 2147483648, %v1736_v56  ;;  %v1746_v12 = vand.u32 2147483647, %v1736_v56  ;;  %vm1742_vm15 = vweird.f32 %v1736_v56 }
0x2fdf   :  { %2863 = vtanh.f32 %v1731_v32 }
0x2fe0   :  { %v1749_v14 = vor.u32 1.1754944e-38, %v1748_v10  ;;  %vm1747_vm2 = vcmp.eq.f32.partialorder %v1746_v12, 8.507059e+37 }
0x2fe4   :  { %v2862_v8 = vpop.eup %2861 }
0x2fe5   :  { %v1738_v59 = vmul.f32 %v2862_v8, %v1736_v56  ;;  %vm1743_vm14 = vweird.f32 %v2862_v8  ;;  %v2864_v16 = vpop.eup %2863 }
0x2fe6   :  { %vm1744_vm0 = vmor %vm1742_vm15, %vm1743_vm14 }
0x2fe7   :  { %v1739_v9 = vsub.f32 1.0, %v1738_v59 }
0x2fe9   :  { %v1740_v11 = vmul.f32 %v2862_v8, %v1739_v9 }
0x2feb   :  { %v1741_v13 = vadd.f32 %v2862_v8, %v1740_v11 }
0x2fed   :  { %v1745_v15 = vsel %vm1744_vm0, %v2862_v8, %v1741_v13 }
0x2fee   :  { %v1750_v17 = vsel %vm1747_vm2, %v1749_v14, %v1745_v15 }
0x2fef   :  { %v1752_v18 = vsel %vm3367_vm4, %v2864_v16, %v1750_v17 }
0x2ff0   :  { %1755 = vrot.lane.b32.xlu1 %v1752_v18, %s3235_s3  ;;  %v1753_v22 = vmul.f32 %v1752_v18, %v1692_v27  ;;  %v1847_v27 = vld [vmem:[#allocation7 + $0x6] sm:$0x1] }
0x3062   :  { %v1756_v20 = vpop.permute.xlu1 %1755 }
0x3063   :  { %v1758_v21 = vmul.f32 %v1756_v20, %v1752_v18 }
0x3065   :  { %1760 = vrot.lane.b32.xlu2 %v1758_v21, %s3236_s11 }
0x30bf   :  { %v1761_v23 = vpop.permute.xlu2 %1760 }
0x30c0   :  { %v1763_v24 = vadd.f32 %v1761_v23, %v1753_v22 }
0x30c2   :  { %2865 = vtanh.f32 %v1763_v24 }
0x30c8   :  { %v2866_v26 = vpop.eup %2865 }
0x30c9   :  { %1766 = vrot.lane.b32.xlu0 %v2866_v26, %s3235_s3  ;;  %v1918_v26 = vld [vmem:[#allocation7 + $0x7] sm:$0x1] }
0x313b   :  { %v1767_v28 = vpop.permute.xlu0 %1766 }
0x313c   :  { %v3621_v30 = vmul.f32 %v1767_v28, %v1752_v18 }
0x313e   :  { %1778 = vrot.lane.b32.xlu1 %v3621_v30, %s3236_s11 }
0x31b0   :  { %v1779_v33 = vpop.permute.xlu1 %1778 }
0x31b1   :  { %2623 = vmatmul.msk.f32.vlgmr.msra.gmra.mxu0 %vm221_vm8, %v1779_v33 }
0x322e   :  { %v1799_v35 = vpop.f32.mrf.mxu0 }
0x322f   :  { %v1802_v36 = vadd.f32 %v1799_v35, %v1776_v34 }
0x3231   :  { %v2624_v37 = vmul.f32 -1.442695, %v1802_v36 }
0x3233   :  { %2867 = vpow2.f32 %v2624_v37 }
0x3239   :  { %v2868_v40 = vpop.eup %2867 }
0x323a   :  { %v1807_v41 = vadd.f32 1.0, %v2868_v40 }
0x323c   :  { %2869 = vrcp.f32 %v1807_v41  ;;  %v1819_v46 = vand.u32 2147483648, %v1807_v41  ;;  %v1817_v49 = vand.u32 2147483647, %v1807_v41  ;;  %vm1813_vm5 = vweird.f32 %v1807_v41 }
0x323d   :  { %2871 = vtanh.f32 %v1802_v36 }
0x323e   :  { %v1820_v51 = vor.u32 1.1754944e-38, %v1819_v46  ;;  %vm1818_vm7 = vcmp.eq.f32.partialorder %v1817_v49, 8.507059e+37 }
0x3242   :  { %v2870_v42 = vpop.eup %2869 }
0x3243   :  { %v1809_v43 = vmul.f32 %v2870_v42, %v1807_v41  ;;  %vm1814_vm3 = vweird.f32 %v2870_v42  ;;  %v2872_v52 = vpop.eup %2871 }
0x3244   :  { %vm1815_vm6 = vmor %vm1813_vm5, %vm1814_vm3 }
0x3245   :  { %v1810_v45 = vsub.f32 1.0, %v1809_v43 }
0x3247   :  { %v1811_v47 = vmul.f32 %v2870_v42, %v1810_v45 }
0x3249   :  { %v1812_v50 = vadd.f32 %v2870_v42, %v1811_v47 }
0x324b   :  { %v1816_v39 = vsel %vm1815_vm6, %v2870_v42, %v1812_v50 }
0x324c   :  { %v1821_v60 = vsel %vm1818_vm7, %v1820_v51, %v1816_v39 }
0x324d   :  { %v1823_v53 = vsel %vm3367_vm4, %v2872_v52, %v1821_v60 }
0x324e   :  { %1826 = vrot.lane.b32.xlu2 %v1823_v53, %s3235_s3  ;;  %v1824_v44 = vmul.f32 %v1823_v53, %v1763_v24 }
0x32a8   :  { %v1827_v54 = vpop.permute.xlu2 %1826 }
0x32a9   :  { %v1829_v29 = vmul.f32 %v1827_v54, %v1823_v53 }
0x32ab   :  { %1831 = vrot.lane.b32.xlu0 %v1829_v29, %s3236_s11 }
0x331d   :  { %v1832_v63 = vpop.permute.xlu0 %1831 }
0x331e   :  { %v1834_v55 = vadd.f32 %v1832_v63, %v1824_v44 }
0x3320   :  { %2873 = vtanh.f32 %v1834_v55 }
0x3326   :  { %v2874_v2 = vpop.eup %2873 }
0x3327   :  { %1837 = vrot.lane.b32.xlu1 %v2874_v2, %s3235_s3 }
0x3399   :  { %v1838_v57 = vpop.permute.xlu1 %1837 }
0x339a   :  { %v3631_v5 = vmul.f32 %v1838_v57, %v1823_v53 }
0x339c   :  { %1849 = vrot.lane.b32.xlu2 %v3631_v5, %s3236_s11 }
0x33f6   :  { %v1850_v58 = vpop.permute.xlu2 %1849 }
0x33f7   :  { %2625 = vmatmul.msk.f32.vlgmr.msra.gmra.mxu1 %vm221_vm8, %v1850_v58 }
0x3474   :  { %v1870_v61 = vpop.f32.mrf.mxu1 }
0x3475   :  { %v1873_v31 = vadd.f32 %v1870_v61, %v1847_v27 }
0x3477   :  { %v2626_v0 = vmul.f32 -1.442695, %v1873_v31 }
0x3479   :  { %2875 = vpow2.f32 %v2626_v0 }
0x347f   :  { %v2876_v1 = vpop.eup %2875 }
0x3480   :  { %v1878_v3 = vadd.f32 1.0, %v2876_v1 }
0x3482   :  { %2877 = vrcp.f32 %v1878_v3  ;;  %v1890_v56 = vand.u32 2147483648, %v1878_v3  ;;  %v1888_v59 = vand.u32 2147483647, %v1878_v3  ;;  %vm1884_vm13 = vweird.f32 %v1878_v3 }
0x3483   :  { %2879 = vtanh.f32 %v1873_v31 }
0x3484   :  { %v1891_v10 = vor.u32 1.1754944e-38, %v1890_v56  ;;  %vm1889_vm11 = vcmp.eq.f32.partialorder %v1888_v59, 8.507059e+37  ;;  %v1991_v56 = vld [vmem:[#allocation20 + $0x8] sm:$0xff]  ;;  %v2024_v59 = vld [vmem:[#allocation21 + $0x10] sm:$0xff] }
0x3488   :  { %v2878_v32 = vpop.eup %2877 }
0x3489   :  { %v1880_v4 = vmul.f32 %v2878_v32, %v1878_v3  ;;  %vm1885_vm10 = vweird.f32 %v2878_v32  ;;  %v2880_v12 = vpop.eup %2879 }
0x348a   :  { %vm1886_vm1 = vmor %vm1884_vm13, %vm1885_vm10 }
0x348b   :  { %v1881_v19 = vsub.f32 1.0, %v1880_v4  ;;  %v1993_v4 = vld [vmem:[#allocation20 + $0x18] sm:$0xff] }
0x348c   :  { %2013 = vmatpush.msra.mxu3 %v1993_v4 }
0x348d   :  { %v1882_v8 = vmul.f32 %v2878_v32, %v1881_v19  ;;  %v1992_v19 = vld [vmem:[#allocation20 + $0x10] sm:$0xff] }
0x348e   :  { %2014 = vmatpush.msra.mxu3 %v1992_v19 }
0x348f   :  { %v1883_v9 = vadd.f32 %v2878_v32, %v1882_v8  ;;  %v2025_v8 = vld [vmem:[#allocation21 + $0x18] sm:$0xff] }
0x3490   :  { %2015 = vmatpush.msra.mxu3 %v1991_v56  ;;  %2039 = vmatpush.msrb.mxu0 %v2025_v8 }
0x3491   :  { %v1887_v11 = vsel %vm1886_vm1, %v2878_v32, %v1883_v9  ;;  %2106 = vmatpush.msrb.mxu1 %v2025_v8  ;;  %v2023_v9 = vld [vmem:[#allocation21 + $0x8] sm:$0xff]  ;;  %2173 = vmatpush.msrb.mxu2 %v2025_v8 }
0x3492   :  { %v1892_v13 = vsel %vm1889_vm11, %v1891_v10, %v1887_v11  ;;  %2040 = vmatpush.msrb.mxu0 %v2024_v59  ;;  %v2022_v10 = vld [vmem:[#allocation21] sm:$0xff] }
0x3493   :  { %v1894_v14 = vsel %vm3367_vm4, %v2880_v12, %v1892_v13  ;;  %2107 = vmatpush.msrb.mxu1 %v2024_v59  ;;  %2174 = vmatpush.msrb.mxu2 %v2024_v59 }
0x3494   :  { %1897 = vrot.lane.b32.xlu0 %v1894_v14, %s3235_s3  ;;  %v1895_v17 = vmul.f32 %v1894_v14, %v1834_v55  ;;  %2041 = vmatpush.msrb.mxu0 %v2023_v9 }
0x3495   :  { %2108 = vmatpush.msrb.mxu1 %v2023_v9  ;;  %2175 = vmatpush.msrb.mxu2 %v2023_v9 }
0x3496   :  { %2042 = vmatpush.msrb.mxu0 %v2022_v10 }
0x3497   :  { %2109 = vmatpush.msrb.mxu1 %v2022_v10  ;;  %2043 = vmatmul.f32.vlgmr.msrb.gmra.mxu0 %v3234_v7  ;;  %v2666_v7 = vld [vmem:[#allocation23] ss:$0 sm:$0xff] }
0x3498   :  { %2176 = vmatpush.msrb.mxu2 %v2022_v10  ;;  %2307 = vmatpush.msra.mxu0 %v2025_v8 }
0x3499   :  { %2374 = vmatpush.msra.mxu1 %v2025_v8 }
0x349a   :  { %2308 = vmatpush.msra.mxu0 %v2024_v59 }
0x349b   :  { %2375 = vmatpush.msra.mxu1 %v2024_v59 }
0x349c   :  { %2309 = vmatpush.msra.mxu0 %v2023_v9 }
0x349d   :  { %2376 = vmatpush.msra.mxu1 %v2023_v9 }
0x349e   :  { %2310 = vmatpush.msra.mxu0 %v2022_v10 }
0x349f   :  { %2377 = vmatpush.msra.mxu1 %v2022_v10 }
0x3506   :  { %v1898_v15 = vpop.permute.xlu0 %1897 }
0x3507   :  { %v1900_v16 = vmul.f32 %v1898_v15, %v1894_v14 }
0x3509   :  { %1902 = vrot.lane.b32.xlu1 %v1900_v16, %s3236_s11 }
0x3514   :  { %v2044_v15 = vpop.f32.mrf.mxu0 }
0x357b   :  { %v1903_v18 = vpop.permute.xlu1 %1902 }
0x357c   :  { %v1905_v20 = vadd.f32 %v1903_v18, %v1895_v17 }
0x357e   :  { %2881 = vtanh.f32 %v1905_v20 }
0x3584   :  { %v2882_v21 = vpop.eup %2881 }
0x3585   :  { %1908 = vrot.lane.b32.xlu2 %v2882_v21, %s3235_s3 }
0x35df   :  { %v1909_v22 = vpop.permute.xlu2 %1908 }
0x35e0   :  { %v1911_v23 = vmul.f32 %v1909_v22, %v1894_v14 }
0x35e2   :  { %1920 = vrot.lane.b32.xlu0 %v1911_v23, %s3236_s11 }
0x3654   :  { %v1921_v24 = vpop.permute.xlu0 %1920 }
0x3655   :  { %2627 = vmatmul.msk.f32.vlgmr.msra.gmra.mxu2 %vm221_vm8, %v1921_v24 }
0x3656   :  { %2441 = vmatpush.msra.mxu2 %v2025_v8 }
0x3658   :  { %2442 = vmatpush.msra.mxu2 %v2024_v59 }
0x365a   :  { %2443 = vmatpush.msra.mxu2 %v2023_v9 }
0x365c   :  { %2444 = vmatpush.msra.mxu2 %v2022_v10 }
0x36d8   :  { %v1941_v28 = vpop.f32.mrf.mxu2 }
0x36d9   :  { %v1944_v33 = vadd.f32 %v1941_v28, %v1918_v26 }
0x36db   :  { %v2628_v34 = vmul.f32 -1.442695, %v1944_v33 }
0x36dd   :  { %2883 = vpow2.f32 %v2628_v34 }
0x36e3   :  { %v2884_v35 = vpop.eup %2883 }
0x36e4   :  { %v1949_v36 = vadd.f32 1.0, %v2884_v35 }
0x36e6   :  { %2885 = vrcp.f32 %v1949_v36  ;;  %v1961_v42 = vand.u32 2147483648, %v1949_v36  ;;  %v1959_v45 = vand.u32 2147483647, %v1949_v36  ;;  %vm1955_vm14 = vweird.f32 %v1949_v36 }
0x36e7   :  { %2887 = vtanh.f32 %v1944_v33 }
0x36e8   :  { %v1962_v47 = vor.u32 1.1754944e-38, %v1961_v42  ;;  %vm1960_vm0 = vcmp.eq.f32.partialorder %v1959_v45, 8.507059e+37  ;;  %2889 = vtanh.f32 %v3581_v48 }
0x36e9   :  { %2891 = vtanh.f32 %v3611_v62 }
0x36ea   :  { %2893 = vtanh.f32 %v1911_v23 }
0x36eb   :  { %2895 = vtanh.f32 %v3591_v6 }
0x36ec   :  { %v2886_v37 = vpop.eup %2885  ;;  %2897 = vtanh.f32 %v3621_v30 }
0x36ed   :  { %v1951_v40 = vmul.f32 %v2886_v37, %v1949_v36  ;;  %vm1956_vm12 = vweird.f32 %v2886_v37  ;;  %v2888_v50 = vpop.eup %2887 }
0x36ee   :  { %vm1957_vm15 = vmor %vm1955_vm14, %vm1956_vm12  ;;  %v2890_v52 = vpop.eup %2889 }
0x36ef   :  { %v1952_v41 = vsub.f32 1.0, %v1951_v40  ;;  %v2892_v60 = vpop.eup %2891 }
0x36f0   :  { %v2894_v53 = vpop.eup %2893 }
0x36f1   :  { %v1953_v43 = vmul.f32 %v2886_v37, %v1952_v41  ;;  %v2896_v48 = vpop.eup %2895 }
0x36f2   :  { %v2898_v63 = vpop.eup %2897 }
0x36f3   :  { %v1954_v46 = vadd.f32 %v2886_v37, %v1953_v43 }
0x36f5   :  { %v1958_v49 = vsel %vm1957_vm15, %v2886_v37, %v1954_v46 }
0x36f6   :  { %v1963_v51 = vsel %vm1960_vm0, %v1962_v47, %v1958_v49 }
0x36f7   :  { %v1965_v39 = vsel %vm3367_vm4, %v2888_v50, %v1963_v51 }
0x36f8   :  { %1968 = vrot.lane.b32.xlu1 %v1965_v39, %s3235_s3  ;;  %v1966_v2 = vmul.f32 %v1965_v39, %v1905_v20 }
0x3700   :  { %1488 = vrot.lane.b32.xlu1 %v2890_v52, %s3236_s11 }
0x3708   :  { %1701 = vrot.lane.b32.xlu1 %v2892_v60, %s3236_s11 }
0x3710   :  { %1914 = vrot.lane.b32.xlu1 %v2894_v53, %s3236_s11 }
0x376a   :  { %v1969_v54 = vpop.permute.xlu1 %1968 }
0x376b   :  { %v1971_v29 = vmul.f32 %v1969_v54, %v1965_v39 }
0x376d   :  { %1973 = vrot.lane.b32.xlu2 %v1971_v29, %s3236_s11 }
0x3772   :  { %v1489_v44 = vpop.permute.xlu1 %1488 }
0x3773   :  { %1491 = vst.msk [vmem:[#allocation4] sm:$0x1] %vm289_vm9, %v1489_v44 }
0x3775   :  { %1559 = vrot.lane.b32.xlu2 %v2896_v48, %s3236_s11 }
0x377a   :  { %v1702_v62 = vpop.permute.xlu1 %1701 }
0x377b   :  { %1704 = vst.msk [vmem:[#allocation4 + $0x3] sm:$0x1] %vm289_vm9, %v1702_v62 }
0x377d   :  { %1772 = vrot.lane.b32.xlu2 %v2898_v63, %s3236_s11 }
0x3782   :  { %v1915_v55 = vpop.permute.xlu1 %1914 }
0x3783   :  { %1917 = vst.msk [vmem:[#allocation4 + $0x6] sm:$0x1] %vm289_vm9, %v1915_v55 }
0x37c7   :  { %v1974_v57 = vpop.permute.xlu2 %1973 }
0x37c8   :  { %v1976_v6 = vadd.f32 %v1974_v57, %v1966_v2 }
0x37ca   :  { %2899 = vtanh.f32 %v1976_v6 }
0x37cb   :  { %2901 = vtanh.f32 %v3601_v38 }
0x37cc   :  { %2903 = vtanh.f32 %v3631_v5  ;;  %v1990_v5 = vld [vmem:[#allocation20] sm:$0xff] }
0x37cd   :  { %2016 = vmatpush.msra.mxu3 %v1990_v5 }
0x37cf   :  { %v1560_v58 = vpop.permute.xlu2 %1559  ;;  %2240 = vmatpush.msrb.mxu3 %v2025_v8 }
0x37d0   :  { %v2900_v27 = vpop.eup %2899  ;;  %1562 = vst.msk [vmem:[#allocation4 + $0x1] sm:$0x1] %vm289_vm9, %v1560_v58 }
0x37d1   :  { %1979 = vrot.lane.b32.xlu0 %v2900_v27, %s3235_s3  ;;  %v2902_v61 = vpop.eup %2901  ;;  %2241 = vmatpush.msrb.mxu3 %v2024_v59 }
0x37d2   :  { %v2904_v31 = vpop.eup %2903 }
0x37d3   :  { %2242 = vmatpush.msrb.mxu3 %v2023_v9 }
0x37d5   :  { %2243 = vmatpush.msrb.mxu3 %v2022_v10 }
0x37d7   :  { %v1773_v30 = vpop.permute.xlu2 %1772 }
0x37d8   :  { %1775 = vst.msk [vmem:[#allocation4 + $0x4] sm:$0x1] %vm289_vm9, %v1773_v30 }
0x37d9   :  { %1630 = vrot.lane.b32.xlu0 %v2902_v61, %s3236_s11 }
0x37e1   :  { %1843 = vrot.lane.b32.xlu0 %v2904_v31, %s3236_s11 }
0x3843   :  { %v1980_v0 = vpop.permute.xlu0 %1979 }
0x3844   :  { %v1982_v1 = vmul.f32 %v1980_v0, %v1965_v39 }
0x3846   :  { %2905 = vtanh.f32 %v1982_v1 }
0x384b   :  { %v1631_v3 = vpop.permute.xlu0 %1630 }
0x384c   :  { %v2906_v32 = vpop.eup %2905  ;;  %1633 = vst.msk [vmem:[#allocation4 + $0x2] sm:$0x1] %vm289_vm9, %v1631_v3 }
0x384d   :  { %1985 = vrot.lane.b32.xlu2 %v2906_v32, %s3236_s11 }
0x3853   :  { %v1844_v38 = vpop.permute.xlu0 %1843 }
0x3854   :  { %1846 = vst.msk [vmem:[#allocation4 + $0x5] sm:$0x1] %vm289_vm9, %v1844_v38 }
0x38a7   :  { %v1986_v11 = vpop.permute.xlu2 %1985 }
0x38a8   :  { %1988 = vst.msk [vmem:[#allocation4 + $0x7] sm:$0x1] %vm289_vm9, %v1986_v11 }
0x38af   :  { %v1989_v12 = vld [vmem:[#allocation4] sm:$0xff] }
0x38b0   :  { %2629 = vmatmul.msk.f32.vlgmr.msra.gmra.mxu3 %vm221_vm8, %v1989_v12 }
0x38b1   :  { %2508 = vmatpush.msra.mxu3 %v2025_v8 }
0x38b3   :  { %2509 = vmatpush.msra.mxu3 %v2024_v59 }
0x38b5   :  { %2510 = vmatpush.msra.mxu3 %v2023_v9 }
0x38b7   :  { %2511 = vmatpush.msra.mxu3 %v2022_v10 }
0x3933   :  { %v2018_v13 = vpop.f32.mrf.mxu3 }
0x3934   :  { %v2019_v14 = vadd.f32 %v2666_v7, %v2018_v13 }
0x3936   :  { %2021 = vst [vmem:[#allocation8] sm:$0xff] %v2019_v14 }
0x393d   :  { %v2026_v16 = vld [vmem:[#allocation8] sm:$0x1]  ;;  %v2091_v52 = vld [vmem:[#allocation8 + $0x1] sm:$0x1]  ;;  %v2158_v8 = vld [vmem:[#allocation8 + $0x2] sm:$0x1] }
0x393e   :  { %v2047_v17 = vadd.f32 %v2044_v15, %v2026_v16 }
0x3940   :  { %v2630_v18 = vmul.f32 -1.442695, %v2047_v17 }
0x3942   :  { %2907 = vpow2.f32 %v2630_v18 }
0x3948   :  { %v2908_v20 = vpop.eup %2907 }
0x3949   :  { %v2052_v21 = vadd.f32 1.0, %v2908_v20 }
0x394b   :  { %2909 = vrcp.f32 %v2052_v21  ;;  %v2064_v26 = vand.u32 2147483648, %v2052_v21  ;;  %v2062_v33 = vand.u32 2147483647, %v2052_v21  ;;  %vm2058_vm3 = vweird.f32 %v2052_v21 }
0x394c   :  { %2911 = vtanh.f32 %v2047_v17 }
0x394d   :  { %v2065_v35 = vor.u32 1.1754944e-38, %v2064_v26  ;;  %vm2063_vm6 = vcmp.eq.f32.partialorder %v2062_v33, 8.507059e+37 }
0x3951   :  { %v2910_v22 = vpop.eup %2909 }
0x3952   :  { %v2054_v23 = vmul.f32 %v2910_v22, %v2052_v21  ;;  %vm2059_vm2 = vweird.f32 %v2910_v22  ;;  %v2912_v37 = vpop.eup %2911 }
0x3953   :  { %vm2060_vm5 = vmor %vm2058_vm3, %vm2059_vm2 }
0x3954   :  { %v2055_v24 = vsub.f32 1.0, %v2054_v23 }
0x3956   :  { %v2056_v28 = vmul.f32 %v2910_v22, %v2055_v24 }
0x3958   :  { %v2057_v34 = vadd.f32 %v2910_v22, %v2056_v28 }
0x395a   :  { %v2061_v36 = vsel %vm2060_vm5, %v2910_v22, %v2057_v34 }
0x395b   :  { %v2066_v40 = vsel %vm2063_vm6, %v2065_v35, %v2061_v36 }
0x395c   :  { %v2068_v41 = vsel %vm3367_vm4, %v2912_v37, %v2066_v40 }
0x395d   :  { %2071 = vrot.lane.b32.xlu0 %v2068_v41, %s3235_s3  ;;  %v2069_v45 = vmul.f32 0.0, %v2068_v41 }
0x39cf   :  { %v2072_v42 = vpop.permute.xlu0 %2071 }
0x39d0   :  { %v2074_v43 = vmul.f32 %v2072_v42, %v2068_v41  ;;  %v2225_v42 = vld [vmem:[#allocation8 + $0x3] sm:$0x1] }
0x39d2   :  { %2076 = vrot.lane.b32.xlu1 %v2074_v43, %s3236_s11 }
0x3a44   :  { %v2077_v46 = vpop.permute.xlu1 %2076 }
0x3a45   :  { %v2079_v47 = vadd.f32 %v2077_v46, %v2069_v45 }
0x3a47   :  { %2913 = vtanh.f32 %v2079_v47 }
0x3a4d   :  { %v2914_v49 = vpop.eup %2913 }
0x3a4e   :  { %2082 = vrot.lane.b32.xlu2 %v2914_v49, %s3235_s3 }
0x3aa8   :  { %v2083_v50 = vpop.permute.xlu2 %2082 }
0x3aa9   :  { %v2085_v51 = vmul.f32 %v2083_v50, %v2068_v41 }
0x3aab   :  { %2087 = vrot.lane.b32.xlu0 %v2085_v51, %s3236_s11 }
0x3b1d   :  { %v2088_v39 = vpop.permute.xlu0 %2087 }
0x3b1e   :  { %2090 = vst.msk [vmem:[#allocation24] sm:$0x1] %vm289_vm9, %v2088_v39  ;;  %2631 = vmatmul.msk.f32.vlgmr.msrb.gmra.mxu1 %vm221_vm8, %v2088_v39 }
0x3b9b   :  { %v2111_v60 = vpop.f32.mrf.mxu1 }
0x3b9c   :  { %v2114_v53 = vadd.f32 %v2111_v60, %v2091_v52 }
0x3b9e   :  { %v2632_v54 = vmul.f32 -1.442695, %v2114_v53 }
0x3ba0   :  { %2915 = vpow2.f32 %v2632_v54 }
0x3ba6   :  { %v2916_v29 = vpop.eup %2915 }
0x3ba7   :  { %v2119_v44 = vadd.f32 1.0, %v2916_v29 }
0x3ba9   :  { %2917 = vrcp.f32 %v2119_v44  ;;  %v2131_v55 = vand.u32 2147483648, %v2119_v44  ;;  %v2129_v57 = vand.u32 2147483647, %v2119_v44  ;;  %vm2125_vm10 = vweird.f32 %v2119_v44 }
0x3baa   :  { %2919 = vtanh.f32 %v2114_v53 }
0x3bab   :  { %v2132_v58 = vor.u32 1.1754944e-38, %v2131_v55  ;;  %vm2130_vm1 = vcmp.eq.f32.partialorder %v2129_v57, 8.507059e+37 }
0x3baf   :  { %v2918_v48 = vpop.eup %2917 }
0x3bb0   :  { %v2121_v62 = vmul.f32 %v2918_v48, %v2119_v44  ;;  %vm2126_vm7 = vweird.f32 %v2918_v48  ;;  %v2920_v30 = vpop.eup %2919 }
0x3bb1   :  { %vm2127_vm13 = vmor %vm2125_vm10, %vm2126_vm7 }
0x3bb2   :  { %v2122_v63 = vsub.f32 1.0, %v2121_v62 }
0x3bb4   :  { %v2123_v2 = vmul.f32 %v2918_v48, %v2122_v63 }
0x3bb6   :  { %v2124_v6 = vadd.f32 %v2918_v48, %v2123_v2 }
0x3bb8   :  { %v2128_v27 = vsel %vm2127_vm13, %v2918_v48, %v2124_v6 }
0x3bb9   :  { %v2133_v61 = vsel %vm2130_vm1, %v2132_v58, %v2128_v27 }
0x3bba   :  { %v2135_v31 = vsel %vm3367_vm4, %v2920_v30, %v2133_v61 }
0x3bbb   :  { %2138 = vrot.lane.b32.xlu1 %v2135_v31, %s3235_s3  ;;  %v2136_v3 = vmul.f32 %v2135_v31, %v2079_v47 }
0x3c2d   :  { %v2139_v0 = vpop.permute.xlu1 %2138 }
0x3c2e   :  { %v2141_v1 = vmul.f32 %v2139_v0, %v2135_v31  ;;  %v2292_v0 = vld [vmem:[#allocation8 + $0x4] sm:$0x1] }
0x3c30   :  { %2143 = vrot.lane.b32.xlu2 %v2141_v1, %s3236_s11 }
0x3c8a   :  { %v2144_v32 = vpop.permute.xlu2 %2143 }
0x3c8b   :  { %v2146_v38 = vadd.f32 %v2144_v32, %v2136_v3 }
0x3c8d   :  { %2921 = vtanh.f32 %v2146_v38 }
0x3c93   :  { %v2922_v4 = vpop.eup %2921 }
0x3c94   :  { %2149 = vrot.lane.b32.xlu0 %v2922_v4, %s3235_s3 }
0x3d06   :  { %v2150_v19 = vpop.permute.xlu0 %2149 }
0x3d07   :  { %v2152_v56 = vmul.f32 %v2150_v19, %v2135_v31 }
0x3d09   :  { %2154 = vrot.lane.b32.xlu1 %v2152_v56, %s3236_s11 }
0x3d7b   :  { %v2155_v5 = vpop.permute.xlu1 %2154 }
0x3d7c   :  { %2157 = vst.msk [vmem:[#allocation24 + $0x1] sm:$0x1] %vm289_vm9, %v2155_v5  ;;  %2633 = vmatmul.msk.f32.vlgmr.msrb.gmra.mxu2 %vm221_vm8, %v2155_v5 }
0x3dff   :  { %v2178_v59 = vpop.f32.mrf.mxu2 }
0x3e00   :  { %v2181_v9 = vadd.f32 %v2178_v59, %v2158_v8 }
0x3e02   :  { %v2634_v10 = vmul.f32 -1.442695, %v2181_v9 }
0x3e04   :  { %2923 = vpow2.f32 %v2634_v10 }
0x3e0a   :  { %v2924_v11 = vpop.eup %2923 }
0x3e0b   :  { %v2186_v12 = vadd.f32 1.0, %v2924_v11 }
0x3e0d   :  { %2925 = vrcp.f32 %v2186_v12  ;;  %v2198_v15 = vand.u32 2147483648, %v2186_v12  ;;  %v2196_v17 = vand.u32 2147483647, %v2186_v12  ;;  %vm2192_vm12 = vweird.f32 %v2186_v12 }
0x3e0e   :  { %2927 = vtanh.f32 %v2181_v9 }
0x3e0f   :  { %v2199_v20 = vor.u32 1.1754944e-38, %v2198_v15  ;;  %vm2197_vm15 = vcmp.eq.f32.partialorder %v2196_v17, 8.507059e+37 }
0x3e13   :  { %v2926_v7 = vpop.eup %2925 }
0x3e14   :  { %v2188_v13 = vmul.f32 %v2926_v7, %v2186_v12  ;;  %vm2193_vm11 = vweird.f32 %v2926_v7  ;;  %v2928_v22 = vpop.eup %2927 }
0x3e15   :  { %vm2194_vm14 = vmor %vm2192_vm12, %vm2193_vm11 }
0x3e16   :  { %v2189_v14 = vsub.f32 1.0, %v2188_v13 }
0x3e18   :  { %v2190_v16 = vmul.f32 %v2926_v7, %v2189_v14 }
0x3e1a   :  { %v2191_v18 = vadd.f32 %v2926_v7, %v2190_v16 }
0x3e1c   :  { %v2195_v21 = vsel %vm2194_vm14, %v2926_v7, %v2191_v18 }
0x3e1d   :  { %v2200_v23 = vsel %vm2197_vm15, %v2199_v20, %v2195_v21 }
0x3e1e   :  { %v2202_v24 = vsel %vm3367_vm4, %v2928_v22, %v2200_v23 }
0x3e1f   :  { %2205 = vrot.lane.b32.xlu2 %v2202_v24, %s3235_s3  ;;  %v2203_v33 = vmul.f32 %v2202_v24, %v2146_v38 }
0x3e79   :  { %v2206_v26 = vpop.permute.xlu2 %2205 }
0x3e7a   :  { %v2208_v28 = vmul.f32 %v2206_v26, %v2202_v24  ;;  %v2359_v26 = vld [vmem:[#allocation8 + $0x5] sm:$0x1] }
0x3e7c   :  { %2210 = vrot.lane.b32.xlu0 %v2208_v28, %s3236_s11 }
0x3eee   :  { %v2211_v34 = vpop.permute.xlu0 %2210 }
0x3eef   :  { %v2213_v35 = vadd.f32 %v2211_v34, %v2203_v33 }
0x3ef1   :  { %2929 = vtanh.f32 %v2213_v35 }
0x3ef7   :  { %v2930_v36 = vpop.eup %2929 }
0x3ef8   :  { %2216 = vrot.lane.b32.xlu1 %v2930_v36, %s3235_s3 }
0x3f6a   :  { %v2217_v37 = vpop.permute.xlu1 %2216 }
0x3f6b   :  { %v2219_v40 = vmul.f32 %v2217_v37, %v2202_v24 }
0x3f6d   :  { %2221 = vrot.lane.b32.xlu2 %v2219_v40, %s3236_s11 }
0x3fc7   :  { %v2222_v41 = vpop.permute.xlu2 %2221 }
0x3fc8   :  { %2224 = vst.msk [vmem:[#allocation24 + $0x2] sm:$0x1] %vm289_vm9, %v2222_v41  ;;  %2635 = vmatmul.msk.f32.vlgmr.msrb.gmra.mxu3 %vm221_vm8, %v2222_v41 }
0x404b   :  { %v2245_v43 = vpop.f32.mrf.mxu3 }
0x404c   :  { %v2248_v45 = vadd.f32 %v2245_v43, %v2225_v42 }
0x404e   :  { %v2636_v46 = vmul.f32 -1.442695, %v2248_v45 }
0x4050   :  { %2931 = vpow2.f32 %v2636_v46 }
0x4056   :  { %v2932_v47 = vpop.eup %2931 }
0x4057   :  { %v2253_v49 = vadd.f32 1.0, %v2932_v47 }
0x4059   :  { %2933 = vrcp.f32 %v2253_v49  ;;  %v2265_v52 = vand.u32 2147483648, %v2253_v49  ;;  %v2263_v53 = vand.u32 2147483647, %v2253_v49  ;;  %vm2259_vm2 = vweird.f32 %v2253_v49 }
0x405a   :  { %2935 = vtanh.f32 %v2248_v45 }
0x405b   :  { %v2266_v29 = vor.u32 1.1754944e-38, %v2265_v52  ;;  %vm2264_vm5 = vcmp.eq.f32.partialorder %v2263_v53, 8.507059e+37 }
0x405f   :  { %v2934_v50 = vpop.eup %2933 }
0x4060   :  { %v2255_v51 = vmul.f32 %v2934_v50, %v2253_v49  ;;  %vm2260_vm0 = vweird.f32 %v2934_v50  ;;  %v2936_v48 = vpop.eup %2935 }
0x4061   :  { %vm2261_vm3 = vmor %vm2259_vm2, %vm2260_vm0 }
0x4062   :  { %v2256_v39 = vsub.f32 1.0, %v2255_v51 }
0x4064   :  { %v2257_v60 = vmul.f32 %v2934_v50, %v2256_v39 }
0x4066   :  { %v2258_v54 = vadd.f32 %v2934_v50, %v2257_v60 }
0x4068   :  { %v2262_v44 = vsel %vm2261_vm3, %v2934_v50, %v2258_v54 }
0x4069   :  { %v2267_v62 = vsel %vm2264_vm5, %v2266_v29, %v2262_v44 }
0x406a   :  { %v2269_v63 = vsel %vm3367_vm4, %v2936_v48, %v2267_v62 }
0x406b   :  { %2272 = vrot.lane.b32.xlu0 %v2269_v63, %s3235_s3  ;;  %v2270_v57 = vmul.f32 %v2269_v63, %v2213_v35 }
0x40dd   :  { %v2273_v55 = vpop.permute.xlu0 %2272 }
0x40de   :  { %v2275_v2 = vmul.f32 %v2273_v55, %v2269_v63  ;;  %v2426_v55 = vld [vmem:[#allocation8 + $0x6] sm:$0x1] }
0x40e0   :  { %2277 = vrot.lane.b32.xlu1 %v2275_v2, %s3236_s11 }
0x4152   :  { %v2278_v6 = vpop.permute.xlu1 %2277 }
0x4153   :  { %v2280_v58 = vadd.f32 %v2278_v6, %v2270_v57 }
0x4155   :  { %2937 = vtanh.f32 %v2280_v58 }
0x415b   :  { %v2938_v27 = vpop.eup %2937 }
0x415c   :  { %2283 = vrot.lane.b32.xlu2 %v2938_v27, %s3235_s3 }
0x41b6   :  { %v2284_v30 = vpop.permute.xlu2 %2283 }
0x41b7   :  { %v2286_v61 = vmul.f32 %v2284_v30, %v2269_v63 }
0x41b9   :  { %2288 = vrot.lane.b32.xlu0 %v2286_v61, %s3236_s11 }
0x422b   :  { %v2289_v31 = vpop.permute.xlu0 %2288 }
0x422c   :  { %2291 = vst.msk [vmem:[#allocation24 + $0x3] sm:$0x1] %vm289_vm9, %v2289_v31  ;;  %2637 = vmatmul.msk.f32.vlgmr.msra.gmra.mxu0 %vm221_vm8, %v2289_v31 }
0x42a9   :  { %v2312_v1 = vpop.f32.mrf.mxu0 }
0x42aa   :  { %v2315_v3 = vadd.f32 %v2312_v1, %v2292_v0 }
0x42ac   :  { %v2638_v32 = vmul.f32 -1.442695, %v2315_v3 }
0x42ae   :  { %2939 = vpow2.f32 %v2638_v32 }
0x42b4   :  { %v2940_v38 = vpop.eup %2939 }
0x42b5   :  { %v2320_v4 = vadd.f32 1.0, %v2940_v38 }
0x42b7   :  { %2941 = vrcp.f32 %v2320_v4  ;;  %v2332_v8 = vand.u32 2147483648, %v2320_v4  ;;  %v2330_v9 = vand.u32 2147483647, %v2320_v4  ;;  %vm2326_vm7 = vweird.f32 %v2320_v4 }
0x42b8   :  { %2943 = vtanh.f32 %v2315_v3 }
0x42b9   :  { %v2333_v11 = vor.u32 1.1754944e-38, %v2332_v8  ;;  %vm2331_vm13 = vcmp.eq.f32.partialorder %v2330_v9, 8.507059e+37 }
0x42bd   :  { %v2942_v19 = vpop.eup %2941 }
0x42be   :  { %v2322_v56 = vmul.f32 %v2942_v19, %v2320_v4  ;;  %vm2327_vm6 = vweird.f32 %v2942_v19  ;;  %v2944_v7 = vpop.eup %2943 }
0x42bf   :  { %vm2328_vm10 = vmor %vm2326_vm7, %vm2327_vm6 }
0x42c0   :  { %v2323_v5 = vsub.f32 1.0, %v2322_v56 }
0x42c2   :  { %v2324_v59 = vmul.f32 %v2942_v19, %v2323_v5 }
0x42c4   :  { %v2325_v10 = vadd.f32 %v2942_v19, %v2324_v59 }
0x42c6   :  { %v2329_v12 = vsel %vm2328_vm10, %v2942_v19, %v2325_v10 }
0x42c7   :  { %v2334_v13 = vsel %vm2331_vm13, %v2333_v11, %v2329_v12 }
0x42c8   :  { %v2336_v14 = vsel %vm3367_vm4, %v2944_v7, %v2334_v13 }
0x42c9   :  { %2339 = vrot.lane.b32.xlu1 %v2336_v14, %s3235_s3  ;;  %v2337_v17 = vmul.f32 %v2336_v14, %v2280_v58 }
0x433b   :  { %v2340_v15 = vpop.permute.xlu1 %2339 }
0x433c   :  { %v2342_v16 = vmul.f32 %v2340_v15, %v2336_v14  ;;  %v2493_v15 = vld [vmem:[#allocation8 + $0x7] sm:$0x1] }
0x433e   :  { %2344 = vrot.lane.b32.xlu2 %v2342_v16, %s3236_s11 }
0x4398   :  { %v2345_v18 = vpop.permute.xlu2 %2344 }
0x4399   :  { %v2347_v20 = vadd.f32 %v2345_v18, %v2337_v17 }
0x439b   :  { %2945 = vtanh.f32 %v2347_v20 }
0x43a1   :  { %v2946_v21 = vpop.eup %2945 }
0x43a2   :  { %2350 = vrot.lane.b32.xlu0 %v2946_v21, %s3235_s3 }
0x4414   :  { %v2351_v22 = vpop.permute.xlu0 %2350 }
0x4415   :  { %v2353_v23 = vmul.f32 %v2351_v22, %v2336_v14 }
0x4417   :  { %2355 = vrot.lane.b32.xlu1 %v2353_v23, %s3236_s11 }
0x4489   :  { %v2356_v24 = vpop.permute.xlu1 %2355 }
0x448a   :  { %2358 = vst.msk [vmem:[#allocation24 + $0x4] sm:$0x1] %vm289_vm9, %v2356_v24  ;;  %2639 = vmatmul.msk.f32.vlgmr.msra.gmra.mxu1 %vm221_vm8, %v2356_v24 }
0x4507   :  { %v2379_v28 = vpop.f32.mrf.mxu1 }
0x4508   :  { %v2382_v33 = vadd.f32 %v2379_v28, %v2359_v26 }
0x450a   :  { %v2640_v34 = vmul.f32 -1.442695, %v2382_v33 }
0x450c   :  { %2947 = vpow2.f32 %v2640_v34 }
0x4512   :  { %v2948_v35 = vpop.eup %2947 }
0x4513   :  { %v2387_v36 = vadd.f32 1.0, %v2948_v35 }
0x4515   :  { %2949 = vrcp.f32 %v2387_v36  ;;  %v2399_v42 = vand.u32 2147483648, %v2387_v36  ;;  %v2397_v45 = vand.u32 2147483647, %v2387_v36  ;;  %vm2393_vm11 = vweird.f32 %v2387_v36 }
0x4516   :  { %2951 = vtanh.f32 %v2382_v33 }
0x4517   :  { %v2400_v47 = vor.u32 1.1754944e-38, %v2399_v42  ;;  %vm2398_vm14 = vcmp.eq.f32.partialorder %v2397_v45, 8.507059e+37 }
0x451b   :  { %v2950_v37 = vpop.eup %2949 }
0x451c   :  { %v2389_v40 = vmul.f32 %v2950_v37, %v2387_v36  ;;  %vm2394_vm1 = vweird.f32 %v2950_v37  ;;  %v2952_v50 = vpop.eup %2951 }
0x451d   :  { %vm2395_vm12 = vmor %vm2393_vm11, %vm2394_vm1 }
0x451e   :  { %v2390_v41 = vsub.f32 1.0, %v2389_v40 }
0x4520   :  { %v2391_v43 = vmul.f32 %v2950_v37, %v2390_v41 }
0x4522   :  { %v2392_v46 = vadd.f32 %v2950_v37, %v2391_v43 }
0x4524   :  { %v2396_v49 = vsel %vm2395_vm12, %v2950_v37, %v2392_v46 }
0x4525   :  { %v2401_v51 = vsel %vm2398_vm14, %v2400_v47, %v2396_v49 }
0x4526   :  { %v2403_v39 = vsel %vm3367_vm4, %v2952_v50, %v2401_v51 }
0x4527   :  { %2406 = vrot.lane.b32.xlu2 %v2403_v39, %s3235_s3  ;;  %v2404_v53 = vmul.f32 %v2403_v39, %v2347_v20 }
0x4581   :  { %v2407_v52 = vpop.permute.xlu2 %2406 }
0x4582   :  { %v2409_v60 = vmul.f32 %v2407_v52, %v2403_v39 }
0x4584   :  { %2411 = vrot.lane.b32.xlu0 %v2409_v60, %s3236_s11 }
0x45f6   :  { %v2412_v54 = vpop.permute.xlu0 %2411 }
0x45f7   :  { %v2414_v29 = vadd.f32 %v2412_v54, %v2404_v53 }
0x45f9   :  { %2953 = vtanh.f32 %v2414_v29 }
0x45ff   :  { %v2954_v44 = vpop.eup %2953 }
0x4600   :  { %2417 = vrot.lane.b32.xlu1 %v2954_v44, %s3235_s3 }
0x4672   :  { %v2418_v48 = vpop.permute.xlu1 %2417 }
0x4673   :  { %v2420_v62 = vmul.f32 %v2418_v48, %v2403_v39 }
0x4675   :  { %2422 = vrot.lane.b32.xlu2 %v2420_v62, %s3236_s11 }
0x46cf   :  { %v2423_v63 = vpop.permute.xlu2 %2422 }
0x46d0   :  { %2425 = vst.msk [vmem:[#allocation24 + $0x5] sm:$0x1] %vm289_vm9, %v2423_v63  ;;  %2641 = vmatmul.msk.f32.vlgmr.msra.gmra.mxu2 %vm221_vm8, %v2423_v63 }
0x4753   :  { %v2446_v2 = vpop.f32.mrf.mxu2 }
0x4754   :  { %v2449_v57 = vadd.f32 %v2446_v2, %v2426_v55 }
0x4756   :  { %v2642_v6 = vmul.f32 -1.442695, %v2449_v57 }
0x4758   :  { %2955 = vpow2.f32 %v2642_v6 }
0x475e   :  { %v2956_v58 = vpop.eup %2955 }
0x475f   :  { %v2454_v27 = vadd.f32 1.0, %v2956_v58 }
0x4761   :  { %2957 = vrcp.f32 %v2454_v27  ;;  %v2466_v0 = vand.u32 2147483648, %v2454_v27  ;;  %v2464_v3 = vand.u32 2147483647, %v2454_v27  ;;  %vm2460_vm0 = vweird.f32 %v2454_v27 }
0x4762   :  { %2959 = vtanh.f32 %v2449_v57 }
0x4763   :  { %v2467_v38 = vor.u32 1.1754944e-38, %v2466_v0  ;;  %vm2465_vm3 = vcmp.eq.f32.partialorder %v2464_v3, 8.507059e+37 }
0x4767   :  { %v2958_v30 = vpop.eup %2957 }
0x4768   :  { %v2456_v61 = vmul.f32 %v2958_v30, %v2454_v27  ;;  %vm2461_vm15 = vweird.f32 %v2958_v30  ;;  %v2960_v19 = vpop.eup %2959 }
0x4769   :  { %vm2462_vm2 = vmor %vm2460_vm0, %vm2461_vm15 }
0x476a   :  { %v2457_v31 = vsub.f32 1.0, %v2456_v61 }
0x476c   :  { %v2458_v1 = vmul.f32 %v2958_v30, %v2457_v31 }
0x476e   :  { %v2459_v32 = vadd.f32 %v2958_v30, %v2458_v1 }
0x4770   :  { %v2463_v4 = vsel %vm2462_vm2, %v2958_v30, %v2459_v32 }
0x4771   :  { %v2468_v56 = vsel %vm2465_vm3, %v2467_v38, %v2463_v4 }
0x4772   :  { %v2470_v5 = vsel %vm3367_vm4, %v2960_v19, %v2468_v56 }
0x4773   :  { %2473 = vrot.lane.b32.xlu0 %v2470_v5, %s3235_s3  ;;  %v2471_v9 = vmul.f32 %v2470_v5, %v2414_v29 }
0x47e5   :  { %v2474_v8 = vpop.permute.xlu0 %2473 }
0x47e6   :  { %v2476_v59 = vmul.f32 %v2474_v8, %v2470_v5 }
0x47e8   :  { %2478 = vrot.lane.b32.xlu1 %v2476_v59, %s3236_s11 }
0x485a   :  { %v2479_v10 = vpop.permute.xlu1 %2478 }
0x485b   :  { %v2481_v11 = vadd.f32 %v2479_v10, %v2471_v9 }
0x485d   :  { %2961 = vtanh.f32 %v2481_v11 }
0x4863   :  { %v2962_v12 = vpop.eup %2961 }
0x4864   :  { %2484 = vrot.lane.b32.xlu2 %v2962_v12, %s3235_s3 }
0x48be   :  { %v2485_v7 = vpop.permute.xlu2 %2484 }
0x48bf   :  { %v2487_v13 = vmul.f32 %v2485_v7, %v2470_v5 }
0x48c1   :  { %2489 = vrot.lane.b32.xlu0 %v2487_v13, %s3236_s11 }
0x4933   :  { %v2490_v14 = vpop.permute.xlu0 %2489 }
0x4934   :  { %2492 = vst.msk [vmem:[#allocation24 + $0x6] sm:$0x1] %vm289_vm9, %v2490_v14  ;;  %2643 = vmatmul.msk.f32.vlgmr.msra.gmra.mxu3 %vm221_vm8, %v2490_v14 }
0x49b7   :  { %v2513_v16 = vpop.f32.mrf.mxu3 }
0x49b8   :  { %v2516_v17 = vadd.f32 %v2513_v16, %v2493_v15 }
0x49ba   :  { %v2644_v18 = vmul.f32 -1.442695, %v2516_v17 }
0x49bc   :  { %2963 = vpow2.f32 %v2644_v18 }
0x49c2   :  { %v2964_v20 = vpop.eup %2963 }
0x49c3   :  { %v2521_v21 = vadd.f32 1.0, %v2964_v20 }
0x49c5   :  { %2965 = vrcp.f32 %v2521_v21  ;;  %v2533_v26 = vand.u32 2147483648, %v2521_v21  ;;  %v2531_v33 = vand.u32 2147483647, %v2521_v21  ;;  %vm2527_vm6 = vweird.f32 %v2521_v21 }
0x49c6   :  { %2967 = vtanh.f32 %v2516_v17 }
0x49c7   :  { %v2534_v35 = vor.u32 1.1754944e-38, %v2533_v26  ;;  %vm2532_vm8 = vcmp.eq.f32.partialorder %v2531_v33, 8.507059e+37 }
0x49cb   :  { %v2966_v22 = vpop.eup %2965 }
0x49cc   :  { %v2523_v23 = vmul.f32 %v2966_v22, %v2521_v21  ;;  %vm2528_vm5 = vweird.f32 %v2966_v22  ;;  %v2968_v37 = vpop.eup %2967 }
0x49cd   :  { %vm2529_vm7 = vmor %vm2527_vm6, %vm2528_vm5 }
0x49ce   :  { %v2524_v24 = vsub.f32 1.0, %v2523_v23 }
0x49d0   :  { %v2525_v28 = vmul.f32 %v2966_v22, %v2524_v24 }
0x49d2   :  { %v2526_v34 = vadd.f32 %v2966_v22, %v2525_v28 }
0x49d4   :  { %v2530_v36 = vsel %vm2529_vm7, %v2966_v22, %v2526_v34 }
0x49d5   :  { %v2535_v40 = vsel %vm2532_vm8, %v2534_v35, %v2530_v36 }
0x49d6   :  { %v2537_v41 = vsel %vm3367_vm4, %v2968_v37, %v2535_v40 }
0x49d7   :  { %2540 = vrot.lane.b32.xlu1 %v2537_v41, %s3235_s3  ;;  %v2538_v45 = vmul.f32 %v2537_v41, %v2481_v11 }
0x4a49   :  { %v2541_v42 = vpop.permute.xlu1 %2540 }
0x4a4a   :  { %v2543_v43 = vmul.f32 %v2541_v42, %v2537_v41 }
0x4a4c   :  { %2545 = vrot.lane.b32.xlu2 %v2543_v43, %s3236_s11 }
0x4aa6   :  { %v2546_v46 = vpop.permute.xlu2 %2545 }
0x4aa7   :  { %v2548_v47 = vadd.f32 %v2546_v46, %v2538_v45 }
0x4aa9   :  { %2969 = vtanh.f32 %v2548_v47 }
0x4aaf   :  { %v2970_v49 = vpop.eup %2969 }
0x4ab0   :  { %2551 = vrot.lane.b32.xlu0 %v2970_v49, %s3235_s3 }
0x4b22   :  { %v2552_v50 = vpop.permute.xlu0 %2551 }
0x4b23   :  { %v2554_v51 = vmul.f32 %v2552_v50, %v2537_v41 }
0x4b25   :  { %2556 = vrot.lane.b32.xlu1 %v2554_v51, %s3236_s11 }
0x4b97   :  { %v2557_v25 = vpop.permute.xlu1 %2556 }
0x4b98   :  { %2559 = vst.msk [vmem:[#allocation24 + $0x7] sm:$0x1] %vm289_vm9, %v2557_v25 }
0x4b99   :  { %2570 = dma.vmem_to_hbm [thread:$0]  %s2566_s1, 128, %s2568_s2, [#allocation11]  }
0x4b9a   :  { %3221 = dma.done.wait [#allocation11], 128  }
0x4b9b   :  { %3222 = vsyncadd [#allocation11], 4294967168 }
0x4b9c   :  { %2575 = vsyncpa [#allocation10], 1 }
0x4b9d   :  { %2576 = vsyncpa [#allocation13], 1 }
0x4b9e   :  { %2577 = vsyncpa [#allocation16], 1 }
0x4b9f   :  { %2578 = vsyncpa [#allocation19], 1 }
0x4ba0   :  { %2579 = vsyncpa [#allocation22], 1 }
0x4ba1   :  { %2580 = vsyncpa [#allocation11], 1 }

</bundles_post_ra>
